<compile_context>
chip_gen: v7x
topology: tpu7x:2x2x1
jax: 0.10.0
libtpu: 0.0.40
codegen_flags: <defaults>
</compile_context>

<pallas_src>
import jax
import jax.numpy as jnp
from jax import lax
from jax.experimental import pallas as pl
from jax.experimental.pallas import tpu as pltpu


def _silu(v):
    return v * jax.nn.sigmoid(v)


def _group_avg_factors(channels, groups):
    """Factored group-average: (C,G) 'mean over group' and (G,C) 'broadcast back'.

    (1,C) per-channel stats @ (C,G) -> (1,G) group stats @ (G,C) -> (1,C)
    per-channel group stats.  O(C*G) memory instead of a dense (C,C) matrix.
    """
    cg = channels // groups
    gid = jnp.arange(channels) // cg
    onehot = (gid[:, None] == jnp.arange(groups)[None, :]).astype(jnp.float32)  # (C, G)
    return onehot / cg, onehot.T                                                # (C,G), (G,C)


def _make_resnet_block_kernel(H, W, C_in, C_out, T, has_res_conv, eps=1e-5):
    HW = H * W

    def groupnorm(xf, down_ref, up_ref, gamma_ref, beta_ref):
        # xf: (HW, C) f32.  Centered two-pass statistics, all in f32.
        mean_c = jnp.sum(xf, axis=0, keepdims=True) * (1.0 / HW)               # (1, C)
        gmean = jnp.dot(
            jnp.dot(mean_c, down_ref[...], preferred_element_type=jnp.float32),
            up_ref[...], preferred_element_type=jnp.float32)                    # (1, C)
        centered = xf - gmean
        var_c = jnp.sum(centered * centered, axis=0, keepdims=True) * (1.0 / HW)
        gvar = jnp.dot(
            jnp.dot(var_c, down_ref[...], preferred_element_type=jnp.float32),
            up_ref[...], preferred_element_type=jnp.float32)                    # (1, C)
        inv = lax.rsqrt(gvar + eps)
        return centered * inv * gamma_ref[...] + beta_ref[...]

    def conv3x3(act, w_ref, b_ref, pad_ref):
        # act: (HW, C_n) f32.  pad_ref: (H+2, W+2, Cmax) halo scratch with a
        # permanently-zero border -> no column masks, padding is implicit.
        # IMPORTANT: the interior store must cover exactly [1:H+1, 1:W+1, :C_n]
        # so the border zeros are never clobbered.
        c_n = act.shape[1]
        n_out = w_ref.shape[-1]
        pad_ref[1:H + 1, 1:W + 1, 0:c_n] = act.reshape(H, W, c_n)
        acc = jnp.zeros((HW, n_out), jnp.float32)
        for t in range(9):
            dy, dx = t // 3, t % 3
            if dy == 1 and dx == 1:
                tap = act                        # center tap: no pad round-trip
            else:
                tap = pad_ref[dy:dy + H, dx:dx + W, 0:c_n].reshape(HW, c_n)
            # Cast to the weight dtype right at the dot so the MXU runs bf16 when
            # bf16 weights are supplied; accumulation stays f32.
            acc = acc + jnp.dot(tap.astype(w_ref.dtype), w_ref[t],
                                preferred_element_type=jnp.float32)
        return acc + b_ref[...]

    def kernel(x_ref, te_ref,
               d1_ref, u1_ref, g1_ref, b1_ref, w1_ref, cb1_ref,
               d2_ref, u2_ref, g2_ref, b2_ref, w2_ref, cb2_ref,
               tws_ref, tbs_ref, twh_ref, tbh_ref,
               *rest):
        if has_res_conv:
            rw_ref, rb_ref, o_ref, pad_ref = rest
        else:
            o_ref, pad_ref = rest

        # Zero ONLY the halo border of the shared scratch, once per grid step
        # (the interior is fully overwritten by each conv before it is read).
        cmax = pad_ref.shape[2]
        zrow = jnp.zeros((1, W + 2, cmax), jnp.float32)
        zcol = jnp.zeros((H + 2, 1, cmax), jnp.float32)
        pad_ref[0:1, :, :] = zrow
        pad_ref[H + 1:H + 2, :, :] = zrow
        pad_ref[:, 0:1, :] = zcol
        pad_ref[:, W + 1:W + 2, :] = zcol

        xf = x_ref[0].astype(jnp.float32)                          # (HW, C_in)

        # ---- time_mlp: SiLU -> Linear (weights pre-split into scale / shift).
        te = _silu(te_ref[0].astype(jnp.float32))                  # (1, T)
        scale = jnp.dot(te.astype(tws_ref.dtype), tws_ref[...],
                        preferred_element_type=jnp.float32) + tbs_ref[...]
        shift = jnp.dot(te.astype(twh_ref.dtype), twh_ref[...],
                        preferred_element_type=jnp.float32) + tbh_ref[...]

        # ---- block1: GroupNorm -> SiLU -> Conv3x3
        h = _silu(groupnorm(xf, d1_ref, u1_ref, g1_ref, b1_ref))
        h = conv3x3(h, w1_ref, cb1_ref, pad_ref)                   # (HW, C_out)

        # TODO(synk): CrossAttention branch (cond_dim) not implemented (default None).

        # ---- block2: GroupNorm -> FiLM x*(scale+1)+shift -> SiLU -> Conv3x3
        h2 = groupnorm(h, d2_ref, u2_ref, g2_ref, b2_ref)
        h2 = _silu(h2 * (scale + 1.0) + shift)
        h2 = conv3x3(h2, w2_ref, cb2_ref, pad_ref)                 # (HW, C_out)

        # gca = Always(1) (use_gca=False): multiply by 1 is a no-op.
        # TODO(synk): GlobalContext squeeze-excite (use_gca=True) not implemented.

        # ---- residual: 1x1 conv when dim != dim_out, plain identity otherwise.
        if has_res_conv:
            res = jnp.dot(xf.astype(rw_ref.dtype), rw_ref[...],
                          preferred_element_type=jnp.float32) + rb_ref[...]
        else:
            res = xf

        o_ref[0] = (h2 + res).astype(o_ref.dtype)

    return kernel


def _vmem_limit_bytes(H, W, C_in, C_out, T, groups, has_res_conv, w_itemsize):
    """Per-grid-step VMEM working-set estimate (generous), clamped to sane bounds."""
    f32, HW, cmax = 4, H * W, max(C_in, C_out)
    block = (HW * C_in + HW * C_out + T) * f32                        # x / out / te blocks
    consts = (9 * C_in * C_out + 9 * C_out * C_out + 2 * T * C_out
              + (C_in * C_out if has_res_conv else 0)) * w_itemsize   # matmul weights
    consts += (2 * groups * (C_in + C_out)                            # group-avg factors
               + 2 * C_in + 9 * C_out) * f32                          # affines / biases
    scratch = (H + 2) * (W + 2) * cmax * f32                          # shared halo pad
    temps = 8 * HW * cmax * f32                                       # live (HW, C) f32 values
    est = 2 * (block + consts) + scratch + temps                      # x2: double buffering
    return int(min(max(int(est * 1.25), 32 * 2**20), 100 * 2**20))


def resnet_block_forward(x_nchw, time_emb, params, *, groups, mxu_dtype=None):
    """Fused ResnetBlock forward.  x_nchw: (B, C_in, H, W), time_emb: (B, T).

    mxu_dtype=jnp.bfloat16 stores matmul weights in bf16 and feeds the MXU bf16
    operands while keeping all element-wise / GroupNorm math in f32.
    """
    B, C_in, H, W = x_nchw.shape
    C_out = params["conv1_w"].shape[-1]
    T = time_emb.shape[-1]
    HW = H * W
    cmax = max(C_in, C_out)
    has_res_conv = params.get("res_w", None) is not None
    if not has_res_conv:
        assert C_in == C_out, "identity residual requires dim == dim_out"

    cast_w = (lambda a: a.astype(mxu_dtype)) if mxu_dtype is not None else (lambda a: a)

    # NOTE: the NCHW<->NHWC transposes below exist only to match the PyTorch
    # layout; in a channels-last pipeline they disappear (kernel is channels-last).
    x_flat = jnp.transpose(x_nchw, (0, 2, 3, 1)).reshape(B, HW, C_in)
    te3 = time_emb.reshape(B, 1, T)

    d1, u1 = _group_avg_factors(C_in, groups)
    d2, u2 = _group_avg_factors(C_out, groups)

    # Pre-split the time-MLP projection into scale / shift halves on the host.
    tws, twh = params["time_w"][:, :C_out], params["time_w"][:, C_out:]
    tbs, tbh = params["time_b"][:, :C_out], params["time_b"][:, C_out:]

    operands = [
        x_flat, te3,
        d1, u1, params["gn1_gamma"], params["gn1_beta"],
        cast_w(params["conv1_w"]), params["conv1_b"],
        d2, u2, params["gn2_gamma"], params["gn2_beta"],
        cast_w(params["conv2_w"]), params["conv2_b"],
        cast_w(tws), tbs, cast_w(twh), tbh,
    ]
    if has_res_conv:
        operands += [cast_w(params["res_w"]), params["res_b"]]

    def batch_spec(shape):
        return pl.BlockSpec(shape, lambda b: (b, 0, 0))

    def const_spec(shape):
        # Grid-invariant operand.  At large C additionally pass
        # pipeline_mode=pl.Buffered(1) here to single-buffer it (halves its VMEM
        # footprint; most important under v7x's 64 MiB VMEM).
        zeros = (0,) * len(shape)
        return pl.BlockSpec(shape, lambda b: zeros)

    in_specs = [
        batch_spec((1, HW, C_in)),
        batch_spec((1, 1, T)),
        const_spec(d1.shape), const_spec(u1.shape),
        const_spec((1, C_in)), const_spec((1, C_in)),
        const_spec((9, C_in, C_out)), const_spec((1, C_out)),
        const_spec(d2.shape), const_spec(u2.shape),
        const_spec((1, C_out)), const_spec((1, C_out)),
        const_spec((9, C_out, C_out)), const_spec((1, C_out)),
        const_spec((T, C_out)), const_spec((1, C_out)),
        const_spec((T, C_out)), const_spec((1, C_out)),
    ]
    if has_res_conv:
        in_specs += [const_spec((C_in, C_out)), const_spec((1, C_out))]

    kernel = _make_resnet_block_kernel(H, W, C_in, C_out, T, has_res_conv)
    w_itemsize = 2 if mxu_dtype == jnp.bfloat16 else 4
    vmem_limit = _vmem_limit_bytes(H, W, C_in, C_out, T, groups, has_res_conv, w_itemsize)

    grid_spec = pltpu.PrefetchScalarGridSpec(
        num_scalar_prefetch=0,
        grid=(B,),
        in_specs=in_specs,
        out_specs=pl.BlockSpec((1, HW, C_out), lambda b: (b, 0, 0)),
        scratch_shapes=[
            # Single halo scratch shared by both 3x3 convs.
            pltpu.VMEM((H + 2, W + 2, cmax), jnp.float32),
        ],
    )
    # TODO(synk): add a second "parallel" spatial grid axis (H-row tiles with a
    # 1-row halo + two-phase GroupNorm) for very large feature maps / B==1 on v7x.

    out_flat = pl.pallas_call(
        kernel,
        out_shape=jax.ShapeDtypeStruct((B, HW, C_out), x_nchw.dtype),
        grid_spec=grid_spec,
        compiler_params=pltpu.CompilerParams(
            dimension_semantics=("parallel",),
            vmem_limit_bytes=vmem_limit),
    )(*operands)

    return jnp.transpose(out_flat.reshape(B, H, W, C_out), (0, 3, 1, 2))


def ref_forward(x, time_emb, p, *, groups, eps=1e-5):
    """Pure-JAX reference mirroring the PyTorch ResnetBlock (for verification)."""
    B, C_in, H, W = x.shape
    C_out = p["conv1_w"].shape[-1]

    def gn(v, gamma, beta):
        Bv, C = v.shape[0], v.shape[1]
        vg = v.reshape(Bv, groups, C // groups, H, W)
        mean = vg.mean(axis=(2, 3, 4), keepdims=True)
        var = ((vg - mean) ** 2).mean(axis=(2, 3, 4), keepdims=True)
        vg = (vg - mean) * lax.rsqrt(var + eps)
        v = vg.reshape(Bv, C, H, W)
        return v * gamma.reshape(1, C, 1, 1) + beta.reshape(1, C, 1, 1)

    def conv3(v, w9, b):
        ci, co = w9.shape[1], w9.shape[2]
        w = w9.reshape(3, 3, ci, co)                    # HWIO
        out = lax.conv_general_dilated(
            v, w, window_strides=(1, 1), padding="SAME",
            dimension_numbers=("NCHW", "HWIO", "NCHW"),
            precision=lax.Precision.HIGHEST)
        return out + b.reshape(1, co, 1, 1)

    silu = lambda t: t * jax.nn.sigmoid(t)

    tp = silu(time_emb) @ p["time_w"] + p["time_b"]
    scale, shift = tp[:, :C_out], tp[:, C_out:]

    h = conv3(silu(gn(x, p["gn1_gamma"], p["gn1_beta"])), p["conv1_w"], p["conv1_b"])
    h2 = gn(h, p["gn2_gamma"], p["gn2_beta"])
    h2 = h2 * (scale[:, :, None, None] + 1.0) + shift[:, :, None, None]
    h2 = conv3(silu(h2), p["conv2_w"], p["conv2_b"])
    if p.get("res_w", None) is not None:
        res = jnp.einsum("bchw,cd->bdhw", x, p["res_w"],
                         precision=lax.Precision.HIGHEST) \
            + p["res_b"].reshape(1, C_out, 1, 1)
    else:
        res = x
    return h2 + res


def make_params(key, C_in, C_out, T, with_res):
    ks = jax.random.split(key, 12)
    p = {
        "gn1_gamma": 1.0 + 0.1 * jax.random.normal(ks[0], (1, C_in), jnp.float32),
        "gn1_beta": 0.1 * jax.random.normal(ks[1], (1, C_in), jnp.float32),
        "conv1_w": 0.2 * jax.random.normal(ks[2], (9, C_in, C_out), jnp.float32),
        "conv1_b": 0.1 * jax.random.normal(ks[3], (1, C_out), jnp.float32),
        "gn2_gamma": 1.0 + 0.1 * jax.random.normal(ks[4], (1, C_out), jnp.float32),
        "gn2_beta": 0.1 * jax.random.normal(ks[5], (1, C_out), jnp.float32),
        "conv2_w": 0.2 * jax.random.normal(ks[6], (9, C_out, C_out), jnp.float32),
        "conv2_b": 0.1 * jax.random.normal(ks[7], (1, C_out), jnp.float32),
        "time_w": 0.2 * jax.random.normal(ks[8], (T, 2 * C_out), jnp.float32),
        "time_b": 0.1 * jax.random.normal(ks[9], (1, 2 * C_out), jnp.float32),
    }
    if with_res:
        p["res_w"] = 0.3 * jax.random.normal(ks[10], (C_in, C_out), jnp.float32)
        p["res_b"] = 0.1 * jax.random.normal(ks[11], (1, C_out), jnp.float32)
    return p


if __name__ == "__main__":
    B, C_in, H, W = 2, 4, 16, 16
    C_out, groups, T = 8, 2, 32

    key = jax.random.PRNGKey(0)
    k_x, k_t, k_p, k_x2, k_p2 = jax.random.split(key, 5)

    x = jax.random.normal(k_x, (B, C_in, H, W), dtype=jnp.float32)
    time_emb = jax.random.normal(k_t, (B, T), dtype=jnp.float32)
    params = make_params(k_p, C_in, C_out, T, with_res=True)

    # 1) f32 path, dim != dim_out (1x1 residual conv).
    y = jax.block_until_ready(resnet_block_forward(x, time_emb, params, groups=groups))
    y_ref = ref_forward(x, time_emb, params, groups=groups)
    assert y.shape == (B, C_out, H, W) and y.dtype == x.dtype
    # Intended precision: f32 element-wise math + f32-accumulated MXU dots.  The
    # in-kernel f32 dots may be lowered with reduced-precision MXU passes, so the
    # tolerance covers that case (multi-pass f32 lands around 1e-5 here).
    err = float(jnp.max(jnp.abs(y - y_ref)))
    assert err < 4e-2, f"f32 path max abs err vs reference: {err}"

    # 2) bf16 MXU-feed path (weights + dot operands bf16, element-wise math f32).
    y_bf16 = jax.block_until_ready(
        resnet_block_forward(x, time_emb, params, groups=groups, mxu_dtype=jnp.bfloat16))
    err_bf16 = float(jnp.max(jnp.abs(y_bf16 - y_ref)))
    assert err_bf16 < 1.5e-1, f"bf16 path max abs err vs reference: {err_bf16}"

    # 3) dim == dim_out -> identity residual (no 1x1 conv, no res weights in VMEM).
    x_id = jax.random.normal(k_x2, (B, C_out, H, W), dtype=jnp.float32)
    params_id = make_params(k_p2, C_out, C_out, T, with_res=False)
    y_id = jax.block_until_ready(
        resnet_block_forward(x_id, time_emb, params_id, groups=groups))
    y_id_ref = ref_forward(x_id, time_emb, params_id, groups=groups)
    err_id = float(jnp.max(jnp.abs(y_id - y_id_ref)))
    assert err_id < 4e-2, f"identity-residual path max abs err vs reference: {err_id}"

    print("KERNEL_OK")
</pallas_src>

<mosaic_0001>
module attributes {stable_mosaic.version = 11 : i64} {
  func.func @kernel(%arg0: i32, %arg1: memref<1x256x4xf32, #tpu.memory_space<vmem>>, %arg2: memref<1x1x32xf32, #tpu.memory_space<vmem>>, %arg3: memref<4x2xf32, #tpu.memory_space<vmem>>, %arg4: memref<2x4xf32, #tpu.memory_space<vmem>>, %arg5: memref<1x4xf32, #tpu.memory_space<vmem>>, %arg6: memref<1x4xf32, #tpu.memory_space<vmem>>, %arg7: memref<9x4x8xf32, #tpu.memory_space<vmem>>, %arg8: memref<1x8xf32, #tpu.memory_space<vmem>>, %arg9: memref<8x2xf32, #tpu.memory_space<vmem>>, %arg10: memref<2x8xf32, #tpu.memory_space<vmem>>, %arg11: memref<1x8xf32, #tpu.memory_space<vmem>>, %arg12: memref<1x8xf32, #tpu.memory_space<vmem>>, %arg13: memref<9x8x8xf32, #tpu.memory_space<vmem>>, %arg14: memref<1x8xf32, #tpu.memory_space<vmem>>, %arg15: memref<32x8xf32, #tpu.memory_space<vmem>>, %arg16: memref<1x8xf32, #tpu.memory_space<vmem>>, %arg17: memref<32x8xf32, #tpu.memory_space<vmem>>, %arg18: memref<1x8xf32, #tpu.memory_space<vmem>>, %arg19: memref<4x8xf32, #tpu.memory_space<vmem>>, %arg20: memref<1x8xf32, #tpu.memory_space<vmem>>, %arg21: memref<1x256x8xf32, #tpu.memory_space<vmem>>, %arg22: memref<18x18x8xf32, #tpu.memory_space<vmem>>) attributes {dimension_semantics = [#tpu.dimension_semantics<parallel>], iteration_bounds = array<i64: 2>, scalar_prefetch = 0 : i64, scratch_operands = 1 : i64, tpu.core_type = #tpu.core_type<tc>, window_params = [{transform_indices = @transform_0, window_bounds = array<i64: 1, 256, 4>}, {transform_indices = @transform_1, window_bounds = array<i64: 1, 1, 32>}, {pipeline_mode = #tpu.pipeline_mode<synchronous>, transform_indices = @transform_2, window_bounds = array<i64: 4, 2>}, {pipeline_mode = #tpu.pipeline_mode<synchronous>, transform_indices = @transform_3, window_bounds = array<i64: 2, 4>}, {pipeline_mode = #tpu.pipeline_mode<synchronous>, transform_indices = @transform_4, window_bounds = array<i64: 1, 4>}, {pipeline_mode = #tpu.pipeline_mode<synchronous>, transform_indices = @transform_5, window_bounds = array<i64: 1, 4>}, {pipeline_mode = #tpu.pipeline_mode<synchronous>, transform_indices = @transform_6, window_bounds = array<i64: 9, 4, 8>}, {pipeline_mode = #tpu.pipeline_mode<synchronous>, transform_indices = @transform_7, window_bounds = array<i64: 1, 8>}, {pipeline_mode = #tpu.pipeline_mode<synchronous>, transform_indices = @transform_8, window_bounds = array<i64: 8, 2>}, {pipeline_mode = #tpu.pipeline_mode<synchronous>, transform_indices = @transform_9, window_bounds = array<i64: 2, 8>}, {pipeline_mode = #tpu.pipeline_mode<synchronous>, transform_indices = @transform_10, window_bounds = array<i64: 1, 8>}, {pipeline_mode = #tpu.pipeline_mode<synchronous>, transform_indices = @transform_11, window_bounds = array<i64: 1, 8>}, {pipeline_mode = #tpu.pipeline_mode<synchronous>, transform_indices = @transform_12, window_bounds = array<i64: 9, 8, 8>}, {pipeline_mode = #tpu.pipeline_mode<synchronous>, transform_indices = @transform_13, window_bounds = array<i64: 1, 8>}, {pipeline_mode = #tpu.pipeline_mode<synchronous>, transform_indices = @transform_14, window_bounds = array<i64: 32, 8>}, {pipeline_mode = #tpu.pipeline_mode<synchronous>, transform_indices = @transform_15, window_bounds = array<i64: 1, 8>}, {pipeline_mode = #tpu.pipeline_mode<synchronous>, transform_indices = @transform_16, window_bounds = array<i64: 32, 8>}, {pipeline_mode = #tpu.pipeline_mode<synchronous>, transform_indices = @transform_17, window_bounds = array<i64: 1, 8>}, {pipeline_mode = #tpu.pipeline_mode<synchronous>, transform_indices = @transform_18, window_bounds = array<i64: 4, 8>}, {pipeline_mode = #tpu.pipeline_mode<synchronous>, transform_indices = @transform_19, window_bounds = array<i64: 1, 8>}, {transform_indices = @transform_20, window_bounds = array<i64: 1, 256, 8>}]} {
    %cst = arith.constant 0.000000e+00 : f32
    %0 = vector.broadcast %cst : f32 to vector<1x18x8xf32>
    %cst_0 = arith.constant 0.000000e+00 : f32
    %1 = vector.broadcast %cst_0 : f32 to vector<18x1x8xf32>
    %c0 = arith.constant 0 : index
    %c0_1 = arith.constant 0 : index
    %c0_2 = arith.constant 0 : index
    %2 = vector.load %arg22[%c0, %c0_1, %c0_2] : memref<18x18x8xf32, #tpu.memory_space<vmem>>, vector<1x18x8xf32>
    tpu.vector_store %arg22[%c0, %c0_1, %c0_2], %0 {strides = array<i32>} : memref<18x18x8xf32, #tpu.memory_space<vmem>>, vector<1x18x8xf32>,
    %c17 = arith.constant 17 : index
    %c0_3 = arith.constant 0 : index
    %c0_4 = arith.constant 0 : index
    %3 = vector.load %arg22[%c17, %c0_3, %c0_4] : memref<18x18x8xf32, #tpu.memory_space<vmem>>, vector<1x18x8xf32>
    tpu.vector_store %arg22[%c17, %c0_3, %c0_4], %0 {strides = array<i32>} : memref<18x18x8xf32, #tpu.memory_space<vmem>>, vector<1x18x8xf32>,
    %c0_5 = arith.constant 0 : index
    %c0_6 = arith.constant 0 : index
    %c0_7 = arith.constant 0 : index
    %4 = vector.load %arg22[%c0_5, %c0_6, %c0_7] : memref<18x18x8xf32, #tpu.memory_space<vmem>>, vector<18x1x8xf32>
    tpu.vector_store %arg22[%c0_5, %c0_6, %c0_7], %1 {strides = array<i32>} : memref<18x18x8xf32, #tpu.memory_space<vmem>>, vector<18x1x8xf32>,
    %c0_8 = arith.constant 0 : index
    %c17_9 = arith.constant 17 : index
    %c0_10 = arith.constant 0 : index
    %5 = vector.load %arg22[%c0_8, %c17_9, %c0_10] : memref<18x18x8xf32, #tpu.memory_space<vmem>>, vector<18x1x8xf32>
    tpu.vector_store %arg22[%c0_8, %c17_9, %c0_10], %1 {strides = array<i32>} : memref<18x18x8xf32, #tpu.memory_space<vmem>>, vector<18x1x8xf32>,
    %c0_11 = arith.constant 0 : index
    %c0_12 = arith.constant 0 : index
    %c0_13 = arith.constant 0 : index
    %6 = vector.load %arg1[%c0_11, %c0_12, %c0_13] : memref<1x256x4xf32, #tpu.memory_space<vmem>>, vector<1x256x4xf32>
    %7 = vector.shape_cast %6 : vector<1x256x4xf32> to vector<256x4xf32>
    %c0_14 = arith.constant 0 : index
    %c0_15 = arith.constant 0 : index
    %c0_16 = arith.constant 0 : index
    %8 = vector.load %arg2[%c0_14, %c0_15, %c0_16] : memref<1x1x32xf32, #tpu.memory_space<vmem>>, vector<1x1x32xf32>
    %9 = vector.shape_cast %8 : vector<1x1x32xf32> to vector<1x32xf32>
    %10 = arith.negf %9 : vector<1x32xf32>
    %11 = math.exp %10 : vector<1x32xf32>
    %cst_17 = arith.constant 1.000000e+00 : f32
    %12 = vector.broadcast %cst_17 : f32 to vector<1x32xf32>
    %13 = arith.addf %12, %11 : vector<1x32xf32>
    %14 = arith.divf %12, %13 : vector<1x32xf32>
    %15 = arith.mulf %9, %14 : vector<1x32xf32>
    %c0_18 = arith.constant 0 : index
    %c0_19 = arith.constant 0 : index
    %16 = vector.load %arg15[%c0_18, %c0_19] : memref<32x8xf32, #tpu.memory_space<vmem>>, vector<32x8xf32>
    %cst_20 = arith.constant dense<0.000000e+00> : vector<1x8xf32>
    %17 = tpu.matmul %15, %16, %cst_20 {dimension_numbers = #tpu.dot_dimension_numbers<[1], [0], [0], [1], [0, 0, 1, 1], [], []>} : vector<1x32xf32>, vector<32x8xf32>, vector<1x8xf32> -> vector<1x8xf32>
    %c0_21 = arith.constant 0 : index
    %c0_22 = arith.constant 0 : index
    %18 = vector.load %arg16[%c0_21, %c0_22] : memref<1x8xf32, #tpu.memory_space<vmem>>, vector<1x8xf32>
    %19 = arith.addf %17, %18 : vector<1x8xf32>
    %c0_23 = arith.constant 0 : index
    %c0_24 = arith.constant 0 : index
    %20 = vector.load %arg17[%c0_23, %c0_24] : memref<32x8xf32, #tpu.memory_space<vmem>>, vector<32x8xf32>
    %cst_25 = arith.constant dense<0.000000e+00> : vector<1x8xf32>
    %21 = tpu.matmul %15, %20, %cst_25 {dimension_numbers = #tpu.dot_dimension_numbers<[1], [0], [0], [1], [0, 0, 1, 1], [], []>} : vector<1x32xf32>, vector<32x8xf32>, vector<1x8xf32> -> vector<1x8xf32>
    %c0_26 = arith.constant 0 : index
    %c0_27 = arith.constant 0 : index
    %22 = vector.load %arg18[%c0_26, %c0_27] : memref<1x8xf32, #tpu.memory_space<vmem>>, vector<1x8xf32>
    %23 = arith.addf %21, %22 : vector<1x8xf32>
    %cst_28 = arith.constant dense<0.000000e+00> : vector<4xf32>
    %24 = vector.multi_reduction <add>, %7, %cst_28 [0] : vector<256x4xf32> to vector<4xf32>
    %25 = vector.shape_cast %24 : vector<4xf32> to vector<1x4xf32>
    %cst_29 = arith.constant 3.906250e-03 : f32
    %26 = vector.broadcast %cst_29 : f32 to vector<1x4xf32>
    %27 = arith.mulf %25, %26 : vector<1x4xf32>
    %c0_30 = arith.constant 0 : index
    %c0_31 = arith.constant 0 : index
    %28 = vector.load %arg3[%c0_30, %c0_31] : memref<4x2xf32, #tpu.memory_space<vmem>>, vector<4x2xf32>
    %cst_32 = arith.constant dense<0.000000e+00> : vector<1x2xf32>
    %29 = tpu.matmul %27, %28, %cst_32 {dimension_numbers = #tpu.dot_dimension_numbers<[1], [0], [0], [1], [0, 0, 1, 1], [], []>} : vector<1x4xf32>, vector<4x2xf32>, vector<1x2xf32> -> vector<1x2xf32>
    %c0_33 = arith.constant 0 : index
    %c0_34 = arith.constant 0 : index
    %30 = vector.load %arg4[%c0_33, %c0_34] : memref<2x4xf32, #tpu.memory_space<vmem>>, vector<2x4xf32>
    %cst_35 = arith.constant dense<0.000000e+00> : vector<1x4xf32>
    %31 = tpu.matmul %29, %30, %cst_35 {dimension_numbers = #tpu.dot_dimension_numbers<[1], [0], [0], [1], [0, 0, 1, 1], [], []>} : vector<1x2xf32>, vector<2x4xf32>, vector<1x4xf32> -> vector<1x4xf32>
    %32 = vector.broadcast %31 : vector<1x4xf32> to vector<256x4xf32>
    %33 = arith.subf %7, %32 : vector<256x4xf32>
    %34 = arith.mulf %33, %33 : vector<256x4xf32>
    %cst_36 = arith.constant dense<0.000000e+00> : vector<4xf32>
    %35 = vector.multi_reduction <add>, %34, %cst_36 [0] : vector<256x4xf32> to vector<4xf32>
    %36 = vector.shape_cast %35 : vector<4xf32> to vector<1x4xf32>
    %cst_37 = arith.constant 3.906250e-03 : f32
    %37 = vector.broadcast %cst_37 : f32 to vector<1x4xf32>
    %38 = arith.mulf %36, %37 : vector<1x4xf32>
    %c0_38 = arith.constant 0 : index
    %c0_39 = arith.constant 0 : index
    %39 = vector.load %arg3[%c0_38, %c0_39] : memref<4x2xf32, #tpu.memory_space<vmem>>, vector<4x2xf32>
    %cst_40 = arith.constant dense<0.000000e+00> : vector<1x2xf32>
    %40 = tpu.matmul %38, %39, %cst_40 {dimension_numbers = #tpu.dot_dimension_numbers<[1], [0], [0], [1], [0, 0, 1, 1], [], []>} : vector<1x4xf32>, vector<4x2xf32>, vector<1x2xf32> -> vector<1x2xf32>
    %c0_41 = arith.constant 0 : index
    %c0_42 = arith.constant 0 : index
    %41 = vector.load %arg4[%c0_41, %c0_42] : memref<2x4xf32, #tpu.memory_space<vmem>>, vector<2x4xf32>
    %cst_43 = arith.constant dense<0.000000e+00> : vector<1x4xf32>
    %42 = tpu.matmul %40, %41, %cst_43 {dimension_numbers = #tpu.dot_dimension_numbers<[1], [0], [0], [1], [0, 0, 1, 1], [], []>} : vector<1x2xf32>, vector<2x4xf32>, vector<1x4xf32> -> vector<1x4xf32>
    %cst_44 = arith.constant 9.99999974E-6 : f32
    %43 = vector.broadcast %cst_44 : f32 to vector<1x4xf32>
    %44 = arith.addf %42, %43 : vector<1x4xf32>
    %45 = math.rsqrt %44 : vector<1x4xf32>
    %46 = vector.broadcast %45 : vector<1x4xf32> to vector<256x4xf32>
    %47 = arith.mulf %33, %46 : vector<256x4xf32>
    %c0_45 = arith.constant 0 : index
    %c0_46 = arith.constant 0 : index
    %48 = vector.load %arg5[%c0_45, %c0_46] : memref<1x4xf32, #tpu.memory_space<vmem>>, vector<1x4xf32>
    %49 = vector.broadcast %48 : vector<1x4xf32> to vector<256x4xf32>
    %50 = arith.mulf %47, %49 : vector<256x4xf32>
    %c0_47 = arith.constant 0 : index
    %c0_48 = arith.constant 0 : index
    %51 = vector.load %arg6[%c0_47, %c0_48] : memref<1x4xf32, #tpu.memory_space<vmem>>, vector<1x4xf32>
    %52 = vector.broadcast %51 : vector<1x4xf32> to vector<256x4xf32>
    %53 = arith.addf %50, %52 : vector<256x4xf32>
    %54 = arith.negf %53 : vector<256x4xf32>
    %55 = math.exp %54 : vector<256x4xf32>
    %cst_49 = arith.constant 1.000000e+00 : f32
    %56 = vector.broadcast %cst_49 : f32 to vector<256x4xf32>
    %57 = arith.addf %56, %55 : vector<256x4xf32>
    %58 = arith.divf %56, %57 : vector<256x4xf32>
    %59 = arith.mulf %53, %58 : vector<256x4xf32>
    %60 = vector.shape_cast %59 : vector<256x4xf32> to vector<16x16x4xf32>
    %c1 = arith.constant 1 : index
    %c1_50 = arith.constant 1 : index
    %c0_51 = arith.constant 0 : index
    %61 = vector.load %arg22[%c1, %c1_50, %c0_51] : memref<18x18x8xf32, #tpu.memory_space<vmem>>, vector<16x16x4xf32>
    tpu.vector_store %arg22[%c1, %c1_50, %c0_51], %60 {strides = array<i32>} : memref<18x18x8xf32, #tpu.memory_space<vmem>>, vector<16x16x4xf32>,
    %cst_52 = arith.constant 0.000000e+00 : f32
    %62 = vector.broadcast %cst_52 : f32 to vector<256x8xf32>
    %c0_53 = arith.constant 0 : index
    %c0_54 = arith.constant 0 : index
    %c0_55 = arith.constant 0 : index
    %63 = vector.load %arg22[%c0_53, %c0_54, %c0_55] : memref<18x18x8xf32, #tpu.memory_space<vmem>>, vector<16x16x4xf32>
    %64 = vector.shape_cast %63 : vector<16x16x4xf32> to vector<256x4xf32>
    %c0_56 = arith.constant 0 : index
    %c0_57 = arith.constant 0 : index
    %c0_58 = arith.constant 0 : index
    %65 = vector.load %arg7[%c0_56, %c0_57, %c0_58] : memref<9x4x8xf32, #tpu.memory_space<vmem>>, vector<1x4x8xf32>
    %66 = vector.shape_cast %65 : vector<1x4x8xf32> to vector<4x8xf32>
    %cst_59 = arith.constant dense<0.000000e+00> : vector<256x8xf32>
    %67 = tpu.matmul %64, %66, %cst_59 {dimension_numbers = #tpu.dot_dimension_numbers<[1], [0], [0], [1], [0, 0, 1, 1], [], []>} : vector<256x4xf32>, vector<4x8xf32>, vector<256x8xf32> -> vector<256x8xf32>
    %68 = arith.addf %62, %67 : vector<256x8xf32>
    %c0_60 = arith.constant 0 : index
    %c1_61 = arith.constant 1 : index
    %c0_62 = arith.constant 0 : index
    %69 = vector.load %arg22[%c0_60, %c1_61, %c0_62] : memref<18x18x8xf32, #tpu.memory_space<vmem>>, vector<16x16x4xf32>
    %70 = vector.shape_cast %69 : vector<16x16x4xf32> to vector<256x4xf32>
    %c1_63 = arith.constant 1 : index
    %c0_64 = arith.constant 0 : index
    %c0_65 = arith.constant 0 : index
    %71 = vector.load %arg7[%c1_63, %c0_64, %c0_65] : memref<9x4x8xf32, #tpu.memory_space<vmem>>, vector<1x4x8xf32>
    %72 = vector.shape_cast %71 : vector<1x4x8xf32> to vector<4x8xf32>
    %cst_66 = arith.constant dense<0.000000e+00> : vector<256x8xf32>
    %73 = tpu.matmul %70, %72, %cst_66 {dimension_numbers = #tpu.dot_dimension_numbers<[1], [0], [0], [1], [0, 0, 1, 1], [], []>} : vector<256x4xf32>, vector<4x8xf32>, vector<256x8xf32> -> vector<256x8xf32>
    %74 = arith.addf %68, %73 : vector<256x8xf32>
    %c0_67 = arith.constant 0 : index
    %c2 = arith.constant 2 : index
    %c0_68 = arith.constant 0 : index
    %75 = vector.load %arg22[%c0_67, %c2, %c0_68] : memref<18x18x8xf32, #tpu.memory_space<vmem>>, vector<16x16x4xf32>
    %76 = vector.shape_cast %75 : vector<16x16x4xf32> to vector<256x4xf32>
    %c2_69 = arith.constant 2 : index
    %c0_70 = arith.constant 0 : index
    %c0_71 = arith.constant 0 : index
    %77 = vector.load %arg7[%c2_69, %c0_70, %c0_71] : memref<9x4x8xf32, #tpu.memory_space<vmem>>, vector<1x4x8xf32>
    %78 = vector.shape_cast %77 : vector<1x4x8xf32> to vector<4x8xf32>
    %cst_72 = arith.constant dense<0.000000e+00> : vector<256x8xf32>
    %79 = tpu.matmul %76, %78, %cst_72 {dimension_numbers = #tpu.dot_dimension_numbers<[1], [0], [0], [1], [0, 0, 1, 1], [], []>} : vector<256x4xf32>, vector<4x8xf32>, vector<256x8xf32> -> vector<256x8xf32>
    %80 = arith.addf %74, %79 : vector<256x8xf32>
    %c1_73 = arith.constant 1 : index
    %c0_74 = arith.constant 0 : index
    %c0_75 = arith.constant 0 : index
    %81 = vector.load %arg22[%c1_73, %c0_74, %c0_75] : memref<18x18x8xf32, #tpu.memory_space<vmem>>, vector<16x16x4xf32>
    %82 = vector.shape_cast %81 : vector<16x16x4xf32> to vector<256x4xf32>
    %c3 = arith.constant 3 : index
    %c0_76 = arith.constant 0 : index
    %c0_77 = arith.constant 0 : index
    %83 = vector.load %arg7[%c3, %c0_76, %c0_77] : memref<9x4x8xf32, #tpu.memory_space<vmem>>, vector<1x4x8xf32>
    %84 = vector.shape_cast %83 : vector<1x4x8xf32> to vector<4x8xf32>
    %cst_78 = arith.constant dense<0.000000e+00> : vector<256x8xf32>
    %85 = tpu.matmul %82, %84, %cst_78 {dimension_numbers = #tpu.dot_dimension_numbers<[1], [0], [0], [1], [0, 0, 1, 1], [], []>} : vector<256x4xf32>, vector<4x8xf32>, vector<256x8xf32> -> vector<256x8xf32>
    %86 = arith.addf %80, %85 : vector<256x8xf32>
    %c4 = arith.constant 4 : index
    %c0_79 = arith.constant 0 : index
    %c0_80 = arith.constant 0 : index
    %87 = vector.load %arg7[%c4, %c0_79, %c0_80] : memref<9x4x8xf32, #tpu.memory_space<vmem>>, vector<1x4x8xf32>
    %88 = vector.shape_cast %87 : vector<1x4x8xf32> to vector<4x8xf32>
    %cst_81 = arith.constant dense<0.000000e+00> : vector<256x8xf32>
    %89 = tpu.matmul %59, %88, %cst_81 {dimension_numbers = #tpu.dot_dimension_numbers<[1], [0], [0], [1], [0, 0, 1, 1], [], []>} : vector<256x4xf32>, vector<4x8xf32>, vector<256x8xf32> -> vector<256x8xf32>
    %90 = arith.addf %86, %89 : vector<256x8xf32>
    %c1_82 = arith.constant 1 : index
    %c2_83 = arith.constant 2 : index
    %c0_84 = arith.constant 0 : index
    %91 = vector.load %arg22[%c1_82, %c2_83, %c0_84] : memref<18x18x8xf32, #tpu.memory_space<vmem>>, vector<16x16x4xf32>
    %92 = vector.shape_cast %91 : vector<16x16x4xf32> to vector<256x4xf32>
    %c5 = arith.constant 5 : index
    %c0_85 = arith.constant 0 : index
    %c0_86 = arith.constant 0 : index
    %93 = vector.load %arg7[%c5, %c0_85, %c0_86] : memref<9x4x8xf32, #tpu.memory_space<vmem>>, vector<1x4x8xf32>
    %94 = vector.shape_cast %93 : vector<1x4x8xf32> to vector<4x8xf32>
    %cst_87 = arith.constant dense<0.000000e+00> : vector<256x8xf32>
    %95 = tpu.matmul %92, %94, %cst_87 {dimension_numbers = #tpu.dot_dimension_numbers<[1], [0], [0], [1], [0, 0, 1, 1], [], []>} : vector<256x4xf32>, vector<4x8xf32>, vector<256x8xf32> -> vector<256x8xf32>
    %96 = arith.addf %90, %95 : vector<256x8xf32>
    %c2_88 = arith.constant 2 : index
    %c0_89 = arith.constant 0 : index
    %c0_90 = arith.constant 0 : index
    %97 = vector.load %arg22[%c2_88, %c0_89, %c0_90] : memref<18x18x8xf32, #tpu.memory_space<vmem>>, vector<16x16x4xf32>
    %98 = vector.shape_cast %97 : vector<16x16x4xf32> to vector<256x4xf32>
    %c6 = arith.constant 6 : index
    %c0_91 = arith.constant 0 : index
    %c0_92 = arith.constant 0 : index
    %99 = vector.load %arg7[%c6, %c0_91, %c0_92] : memref<9x4x8xf32, #tpu.memory_space<vmem>>, vector<1x4x8xf32>
    %100 = vector.shape_cast %99 : vector<1x4x8xf32> to vector<4x8xf32>
    %cst_93 = arith.constant dense<0.000000e+00> : vector<256x8xf32>
    %101 = tpu.matmul %98, %100, %cst_93 {dimension_numbers = #tpu.dot_dimension_numbers<[1], [0], [0], [1], [0, 0, 1, 1], [], []>} : vector<256x4xf32>, vector<4x8xf32>, vector<256x8xf32> -> vector<256x8xf32>
    %102 = arith.addf %96, %101 : vector<256x8xf32>
    %c2_94 = arith.constant 2 : index
    %c1_95 = arith.constant 1 : index
    %c0_96 = arith.constant 0 : index
    %103 = vector.load %arg22[%c2_94, %c1_95, %c0_96] : memref<18x18x8xf32, #tpu.memory_space<vmem>>, vector<16x16x4xf32>
    %104 = vector.shape_cast %103 : vector<16x16x4xf32> to vector<256x4xf32>
    %c7 = arith.constant 7 : index
    %c0_97 = arith.constant 0 : index
    %c0_98 = arith.constant 0 : index
    %105 = vector.load %arg7[%c7, %c0_97, %c0_98] : memref<9x4x8xf32, #tpu.memory_space<vmem>>, vector<1x4x8xf32>
    %106 = vector.shape_cast %105 : vector<1x4x8xf32> to vector<4x8xf32>
    %cst_99 = arith.constant dense<0.000000e+00> : vector<256x8xf32>
    %107 = tpu.matmul %104, %106, %cst_99 {dimension_numbers = #tpu.dot_dimension_numbers<[1], [0], [0], [1], [0, 0, 1, 1], [], []>} : vector<256x4xf32>, vector<4x8xf32>, vector<256x8xf32> -> vector<256x8xf32>
    %108 = arith.addf %102, %107 : vector<256x8xf32>
    %c2_100 = arith.constant 2 : index
    %c2_101 = arith.constant 2 : index
    %c0_102 = arith.constant 0 : index
    %109 = vector.load %arg22[%c2_100, %c2_101, %c0_102] : memref<18x18x8xf32, #tpu.memory_space<vmem>>, vector<16x16x4xf32>
    %110 = vector.shape_cast %109 : vector<16x16x4xf32> to vector<256x4xf32>
    %c8 = arith.constant 8 : index
    %c0_103 = arith.constant 0 : index
    %c0_104 = arith.constant 0 : index
    %111 = vector.load %arg7[%c8, %c0_103, %c0_104] : memref<9x4x8xf32, #tpu.memory_space<vmem>>, vector<1x4x8xf32>
    %112 = vector.shape_cast %111 : vector<1x4x8xf32> to vector<4x8xf32>
    %cst_105 = arith.constant dense<0.000000e+00> : vector<256x8xf32>
    %113 = tpu.matmul %110, %112, %cst_105 {dimension_numbers = #tpu.dot_dimension_numbers<[1], [0], [0], [1], [0, 0, 1, 1], [], []>} : vector<256x4xf32>, vector<4x8xf32>, vector<256x8xf32> -> vector<256x8xf32>
    %114 = arith.addf %108, %113 : vector<256x8xf32>
    %c0_106 = arith.constant 0 : index
    %c0_107 = arith.constant 0 : index
    %115 = vector.load %arg8[%c0_106, %c0_107] : memref<1x8xf32, #tpu.memory_space<vmem>>, vector<1x8xf32>
    %116 = vector.broadcast %115 : vector<1x8xf32> to vector<256x8xf32>
    %117 = arith.addf %114, %116 : vector<256x8xf32>
    %cst_108 = arith.constant dense<0.000000e+00> : vector<8xf32>
    %118 = vector.multi_reduction <add>, %117, %cst_108 [0] : vector<256x8xf32> to vector<8xf32>
    %119 = vector.shape_cast %118 : vector<8xf32> to vector<1x8xf32>
    %cst_109 = arith.constant 3.906250e-03 : f32
    %120 = vector.broadcast %cst_109 : f32 to vector<1x8xf32>
    %121 = arith.mulf %119, %120 : vector<1x8xf32>
    %c0_110 = arith.constant 0 : index
    %c0_111 = arith.constant 0 : index
    %122 = vector.load %arg9[%c0_110, %c0_111] : memref<8x2xf32, #tpu.memory_space<vmem>>, vector<8x2xf32>
    %cst_112 = arith.constant dense<0.000000e+00> : vector<1x2xf32>
    %123 = tpu.matmul %121, %122, %cst_112 {dimension_numbers = #tpu.dot_dimension_numbers<[1], [0], [0], [1], [0, 0, 1, 1], [], []>} : vector<1x8xf32>, vector<8x2xf32>, vector<1x2xf32> -> vector<1x2xf32>
    %c0_113 = arith.constant 0 : index
    %c0_114 = arith.constant 0 : index
    %124 = vector.load %arg10[%c0_113, %c0_114] : memref<2x8xf32, #tpu.memory_space<vmem>>, vector<2x8xf32>
    %cst_115 = arith.constant dense<0.000000e+00> : vector<1x8xf32>
    %125 = tpu.matmul %123, %124, %cst_115 {dimension_numbers = #tpu.dot_dimension_numbers<[1], [0], [0], [1], [0, 0, 1, 1], [], []>} : vector<1x2xf32>, vector<2x8xf32>, vector<1x8xf32> -> vector<1x8xf32>
    %126 = vector.broadcast %125 : vector<1x8xf32> to vector<256x8xf32>
    %127 = arith.subf %117, %126 : vector<256x8xf32>
    %128 = arith.mulf %127, %127 : vector<256x8xf32>
    %cst_116 = arith.constant dense<0.000000e+00> : vector<8xf32>
    %129 = vector.multi_reduction <add>, %128, %cst_116 [0] : vector<256x8xf32> to vector<8xf32>
    %130 = vector.shape_cast %129 : vector<8xf32> to vector<1x8xf32>
    %cst_117 = arith.constant 3.906250e-03 : f32
    %131 = vector.broadcast %cst_117 : f32 to vector<1x8xf32>
    %132 = arith.mulf %130, %131 : vector<1x8xf32>
    %c0_118 = arith.constant 0 : index
    %c0_119 = arith.constant 0 : index
    %133 = vector.load %arg9[%c0_118, %c0_119] : memref<8x2xf32, #tpu.memory_space<vmem>>, vector<8x2xf32>
    %cst_120 = arith.constant dense<0.000000e+00> : vector<1x2xf32>
    %134 = tpu.matmul %132, %133, %cst_120 {dimension_numbers = #tpu.dot_dimension_numbers<[1], [0], [0], [1], [0, 0, 1, 1], [], []>} : vector<1x8xf32>, vector<8x2xf32>, vector<1x2xf32> -> vector<1x2xf32>
    %c0_121 = arith.constant 0 : index
    %c0_122 = arith.constant 0 : index
    %135 = vector.load %arg10[%c0_121, %c0_122] : memref<2x8xf32, #tpu.memory_space<vmem>>, vector<2x8xf32>
    %cst_123 = arith.constant dense<0.000000e+00> : vector<1x8xf32>
    %136 = tpu.matmul %134, %135, %cst_123 {dimension_numbers = #tpu.dot_dimension_numbers<[1], [0], [0], [1], [0, 0, 1, 1], [], []>} : vector<1x2xf32>, vector<2x8xf32>, vector<1x8xf32> -> vector<1x8xf32>
    %cst_124 = arith.constant 9.99999974E-6 : f32
    %137 = vector.broadcast %cst_124 : f32 to vector<1x8xf32>
    %138 = arith.addf %136, %137 : vector<1x8xf32>
    %139 = math.rsqrt %138 : vector<1x8xf32>
    %140 = vector.broadcast %139 : vector<1x8xf32> to vector<256x8xf32>
    %141 = arith.mulf %127, %140 : vector<256x8xf32>
    %c0_125 = arith.constant 0 : index
    %c0_126 = arith.constant 0 : index
    %142 = vector.load %arg11[%c0_125, %c0_126] : memref<1x8xf32, #tpu.memory_space<vmem>>, vector<1x8xf32>
    %143 = vector.broadcast %142 : vector<1x8xf32> to vector<256x8xf32>
    %144 = arith.mulf %141, %143 : vector<256x8xf32>
    %c0_127 = arith.constant 0 : index
    %c0_128 = arith.constant 0 : index
    %145 = vector.load %arg12[%c0_127, %c0_128] : memref<1x8xf32, #tpu.memory_space<vmem>>, vector<1x8xf32>
    %146 = vector.broadcast %145 : vector<1x8xf32> to vector<256x8xf32>
    %147 = arith.addf %144, %146 : vector<256x8xf32>
    %cst_129 = arith.constant 1.000000e+00 : f32
    %148 = vector.broadcast %cst_129 : f32 to vector<1x8xf32>
    %149 = arith.addf %19, %148 : vector<1x8xf32>
    %150 = vector.broadcast %149 : vector<1x8xf32> to vector<256x8xf32>
    %151 = arith.mulf %147, %150 : vector<256x8xf32>
    %152 = vector.broadcast %23 : vector<1x8xf32> to vector<256x8xf32>
    %153 = arith.addf %151, %152 : vector<256x8xf32>
    %154 = arith.negf %153 : vector<256x8xf32>
    %155 = math.exp %154 : vector<256x8xf32>
    %cst_130 = arith.constant 1.000000e+00 : f32
    %156 = vector.broadcast %cst_130 : f32 to vector<256x8xf32>
    %157 = arith.addf %156, %155 : vector<256x8xf32>
    %158 = arith.divf %156, %157 : vector<256x8xf32>
    %159 = arith.mulf %153, %158 : vector<256x8xf32>
    %160 = vector.shape_cast %159 : vector<256x8xf32> to vector<16x16x8xf32>
    %c1_131 = arith.constant 1 : index
    %c1_132 = arith.constant 1 : index
    %c0_133 = arith.constant 0 : index
    %161 = vector.load %arg22[%c1_131, %c1_132, %c0_133] : memref<18x18x8xf32, #tpu.memory_space<vmem>>, vector<16x16x8xf32>
    tpu.vector_store %arg22[%c1_131, %c1_132, %c0_133], %160 {strides = array<i32>} : memref<18x18x8xf32, #tpu.memory_space<vmem>>, vector<16x16x8xf32>,
    %cst_134 = arith.constant 0.000000e+00 : f32
    %162 = vector.broadcast %cst_134 : f32 to vector<256x8xf32>
    %c0_135 = arith.constant 0 : index
    %c0_136 = arith.constant 0 : index
    %c0_137 = arith.constant 0 : index
    %163 = vector.load %arg22[%c0_135, %c0_136, %c0_137] : memref<18x18x8xf32, #tpu.memory_space<vmem>>, vector<16x16x8xf32>
    %164 = vector.shape_cast %163 : vector<16x16x8xf32> to vector<256x8xf32>
    %c0_138 = arith.constant 0 : index
    %c0_139 = arith.constant 0 : index
    %c0_140 = arith.constant 0 : index
    %165 = vector.load %arg13[%c0_138, %c0_139, %c0_140] : memref<9x8x8xf32, #tpu.memory_space<vmem>>, vector<1x8x8xf32>
    %166 = vector.shape_cast %165 : vector<1x8x8xf32> to vector<8x8xf32>
    %cst_141 = arith.constant dense<0.000000e+00> : vector<256x8xf32>
    %167 = tpu.matmul %164, %166, %cst_141 {dimension_numbers = #tpu.dot_dimension_numbers<[1], [0], [0], [1], [0, 0, 1, 1], [], []>} : vector<256x8xf32>, vector<8x8xf32>, vector<256x8xf32> -> vector<256x8xf32>
    %168 = arith.addf %162, %167 : vector<256x8xf32>
    %c0_142 = arith.constant 0 : index
    %c1_143 = arith.constant 1 : index
    %c0_144 = arith.constant 0 : index
    %169 = vector.load %arg22[%c0_142, %c1_143, %c0_144] : memref<18x18x8xf32, #tpu.memory_space<vmem>>, vector<16x16x8xf32>
    %170 = vector.shape_cast %169 : vector<16x16x8xf32> to vector<256x8xf32>
    %c1_145 = arith.constant 1 : index
    %c0_146 = arith.constant 0 : index
    %c0_147 = arith.constant 0 : index
    %171 = vector.load %arg13[%c1_145, %c0_146, %c0_147] : memref<9x8x8xf32, #tpu.memory_space<vmem>>, vector<1x8x8xf32>
    %172 = vector.shape_cast %171 : vector<1x8x8xf32> to vector<8x8xf32>
    %cst_148 = arith.constant dense<0.000000e+00> : vector<256x8xf32>
    %173 = tpu.matmul %170, %172, %cst_148 {dimension_numbers = #tpu.dot_dimension_numbers<[1], [0], [0], [1], [0, 0, 1, 1], [], []>} : vector<256x8xf32>, vector<8x8xf32>, vector<256x8xf32> -> vector<256x8xf32>
    %174 = arith.addf %168, %173 : vector<256x8xf32>
    %c0_149 = arith.constant 0 : index
    %c2_150 = arith.constant 2 : index
    %c0_151 = arith.constant 0 : index
    %175 = vector.load %arg22[%c0_149, %c2_150, %c0_151] : memref<18x18x8xf32, #tpu.memory_space<vmem>>, vector<16x16x8xf32>
    %176 = vector.shape_cast %175 : vector<16x16x8xf32> to vector<256x8xf32>
    %c2_152 = arith.constant 2 : index
    %c0_153 = arith.constant 0 : index
    %c0_154 = arith.constant 0 : index
    %177 = vector.load %arg13[%c2_152, %c0_153, %c0_154] : memref<9x8x8xf32, #tpu.memory_space<vmem>>, vector<1x8x8xf32>
    %178 = vector.shape_cast %177 : vector<1x8x8xf32> to vector<8x8xf32>
    %cst_155 = arith.constant dense<0.000000e+00> : vector<256x8xf32>
    %179 = tpu.matmul %176, %178, %cst_155 {dimension_numbers = #tpu.dot_dimension_numbers<[1], [0], [0], [1], [0, 0, 1, 1], [], []>} : vector<256x8xf32>, vector<8x8xf32>, vector<256x8xf32> -> vector<256x8xf32>
    %180 = arith.addf %174, %179 : vector<256x8xf32>
    %c1_156 = arith.constant 1 : index
    %c0_157 = arith.constant 0 : index
    %c0_158 = arith.constant 0 : index
    %181 = vector.load %arg22[%c1_156, %c0_157, %c0_158] : memref<18x18x8xf32, #tpu.memory_space<vmem>>, vector<16x16x8xf32>
    %182 = vector.shape_cast %181 : vector<16x16x8xf32> to vector<256x8xf32>
    %c3_159 = arith.constant 3 : index
    %c0_160 = arith.constant 0 : index
    %c0_161 = arith.constant 0 : index
    %183 = vector.load %arg13[%c3_159, %c0_160, %c0_161] : memref<9x8x8xf32, #tpu.memory_space<vmem>>, vector<1x8x8xf32>
    %184 = vector.shape_cast %183 : vector<1x8x8xf32> to vector<8x8xf32>
    %cst_162 = arith.constant dense<0.000000e+00> : vector<256x8xf32>
    %185 = tpu.matmul %182, %184, %cst_162 {dimension_numbers = #tpu.dot_dimension_numbers<[1], [0], [0], [1], [0, 0, 1, 1], [], []>} : vector<256x8xf32>, vector<8x8xf32>, vector<256x8xf32> -> vector<256x8xf32>
    %186 = arith.addf %180, %185 : vector<256x8xf32>
    %c4_163 = arith.constant 4 : index
    %c0_164 = arith.constant 0 : index
    %c0_165 = arith.constant 0 : index
    %187 = vector.load %arg13[%c4_163, %c0_164, %c0_165] : memref<9x8x8xf32, #tpu.memory_space<vmem>>, vector<1x8x8xf32>
    %188 = vector.shape_cast %187 : vector<1x8x8xf32> to vector<8x8xf32>
    %cst_166 = arith.constant dense<0.000000e+00> : vector<256x8xf32>
    %189 = tpu.matmul %159, %188, %cst_166 {dimension_numbers = #tpu.dot_dimension_numbers<[1], [0], [0], [1], [0, 0, 1, 1], [], []>} : vector<256x8xf32>, vector<8x8xf32>, vector<256x8xf32> -> vector<256x8xf32>
    %190 = arith.addf %186, %189 : vector<256x8xf32>
    %c1_167 = arith.constant 1 : index
    %c2_168 = arith.constant 2 : index
    %c0_169 = arith.constant 0 : index
    %191 = vector.load %arg22[%c1_167, %c2_168, %c0_169] : memref<18x18x8xf32, #tpu.memory_space<vmem>>, vector<16x16x8xf32>
    %192 = vector.shape_cast %191 : vector<16x16x8xf32> to vector<256x8xf32>
    %c5_170 = arith.constant 5 : index
    %c0_171 = arith.constant 0 : index
    %c0_172 = arith.constant 0 : index
    %193 = vector.load %arg13[%c5_170, %c0_171, %c0_172] : memref<9x8x8xf32, #tpu.memory_space<vmem>>, vector<1x8x8xf32>
    %194 = vector.shape_cast %193 : vector<1x8x8xf32> to vector<8x8xf32>
    %cst_173 = arith.constant dense<0.000000e+00> : vector<256x8xf32>
    %195 = tpu.matmul %192, %194, %cst_173 {dimension_numbers = #tpu.dot_dimension_numbers<[1], [0], [0], [1], [0, 0, 1, 1], [], []>} : vector<256x8xf32>, vector<8x8xf32>, vector<256x8xf32> -> vector<256x8xf32>
    %196 = arith.addf %190, %195 : vector<256x8xf32>
    %c2_174 = arith.constant 2 : index
    %c0_175 = arith.constant 0 : index
    %c0_176 = arith.constant 0 : index
    %197 = vector.load %arg22[%c2_174, %c0_175, %c0_176] : memref<18x18x8xf32, #tpu.memory_space<vmem>>, vector<16x16x8xf32>
    %198 = vector.shape_cast %197 : vector<16x16x8xf32> to vector<256x8xf32>
    %c6_177 = arith.constant 6 : index
    %c0_178 = arith.constant 0 : index
    %c0_179 = arith.constant 0 : index
    %199 = vector.load %arg13[%c6_177, %c0_178, %c0_179] : memref<9x8x8xf32, #tpu.memory_space<vmem>>, vector<1x8x8xf32>
    %200 = vector.shape_cast %199 : vector<1x8x8xf32> to vector<8x8xf32>
    %cst_180 = arith.constant dense<0.000000e+00> : vector<256x8xf32>
    %201 = tpu.matmul %198, %200, %cst_180 {dimension_numbers = #tpu.dot_dimension_numbers<[1], [0], [0], [1], [0, 0, 1, 1], [], []>} : vector<256x8xf32>, vector<8x8xf32>, vector<256x8xf32> -> vector<256x8xf32>
    %202 = arith.addf %196, %201 : vector<256x8xf32>
    %c2_181 = arith.constant 2 : index
    %c1_182 = arith.constant 1 : index
    %c0_183 = arith.constant 0 : index
    %203 = vector.load %arg22[%c2_181, %c1_182, %c0_183] : memref<18x18x8xf32, #tpu.memory_space<vmem>>, vector<16x16x8xf32>
    %204 = vector.shape_cast %203 : vector<16x16x8xf32> to vector<256x8xf32>
    %c7_184 = arith.constant 7 : index
    %c0_185 = arith.constant 0 : index
    %c0_186 = arith.constant 0 : index
    %205 = vector.load %arg13[%c7_184, %c0_185, %c0_186] : memref<9x8x8xf32, #tpu.memory_space<vmem>>, vector<1x8x8xf32>
    %206 = vector.shape_cast %205 : vector<1x8x8xf32> to vector<8x8xf32>
    %cst_187 = arith.constant dense<0.000000e+00> : vector<256x8xf32>
    %207 = tpu.matmul %204, %206, %cst_187 {dimension_numbers = #tpu.dot_dimension_numbers<[1], [0], [0], [1], [0, 0, 1, 1], [], []>} : vector<256x8xf32>, vector<8x8xf32>, vector<256x8xf32> -> vector<256x8xf32>
    %208 = arith.addf %202, %207 : vector<256x8xf32>
    %c2_188 = arith.constant 2 : index
    %c2_189 = arith.constant 2 : index
    %c0_190 = arith.constant 0 : index
    %209 = vector.load %arg22[%c2_188, %c2_189, %c0_190] : memref<18x18x8xf32, #tpu.memory_space<vmem>>, vector<16x16x8xf32>
    %210 = vector.shape_cast %209 : vector<16x16x8xf32> to vector<256x8xf32>
    %c8_191 = arith.constant 8 : index
    %c0_192 = arith.constant 0 : index
    %c0_193 = arith.constant 0 : index
    %211 = vector.load %arg13[%c8_191, %c0_192, %c0_193] : memref<9x8x8xf32, #tpu.memory_space<vmem>>, vector<1x8x8xf32>
    %212 = vector.shape_cast %211 : vector<1x8x8xf32> to vector<8x8xf32>
    %cst_194 = arith.constant dense<0.000000e+00> : vector<256x8xf32>
    %213 = tpu.matmul %210, %212, %cst_194 {dimension_numbers = #tpu.dot_dimension_numbers<[1], [0], [0], [1], [0, 0, 1, 1], [], []>} : vector<256x8xf32>, vector<8x8xf32>, vector<256x8xf32> -> vector<256x8xf32>
    %214 = arith.addf %208, %213 : vector<256x8xf32>
    %c0_195 = arith.constant 0 : index
    %c0_196 = arith.constant 0 : index
    %215 = vector.load %arg14[%c0_195, %c0_196] : memref<1x8xf32, #tpu.memory_space<vmem>>, vector<1x8xf32>
    %216 = vector.broadcast %215 : vector<1x8xf32> to vector<256x8xf32>
    %217 = arith.addf %214, %216 : vector<256x8xf32>
    %c0_197 = arith.constant 0 : index
    %c0_198 = arith.constant 0 : index
    %218 = vector.load %arg19[%c0_197, %c0_198] : memref<4x8xf32, #tpu.memory_space<vmem>>, vector<4x8xf32>
    %cst_199 = arith.constant dense<0.000000e+00> : vector<256x8xf32>
    %219 = tpu.matmul %7, %218, %cst_199 {dimension_numbers = #tpu.dot_dimension_numbers<[1], [0], [0], [1], [0, 0, 1, 1], [], []>} : vector<256x4xf32>, vector<4x8xf32>, vector<256x8xf32> -> vector<256x8xf32>
    %c0_200 = arith.constant 0 : index
    %c0_201 = arith.constant 0 : index
    %220 = vector.load %arg20[%c0_200, %c0_201] : memref<1x8xf32, #tpu.memory_space<vmem>>, vector<1x8xf32>
    %221 = vector.broadcast %220 : vector<1x8xf32> to vector<256x8xf32>
    %222 = arith.addf %219, %221 : vector<256x8xf32>
    %223 = arith.addf %217, %222 : vector<256x8xf32>
    %c0_202 = arith.constant 0 : index
    %c0_203 = arith.constant 0 : index
    %c0_204 = arith.constant 0 : index
    %224 = vector.load %arg21[%c0_202, %c0_203, %c0_204] : memref<1x256x8xf32, #tpu.memory_space<vmem>>, vector<1x256x8xf32>
    %225 = vector.shape_cast %224 : vector<1x256x8xf32> to vector<256x8xf32>
    %226 = vector.shape_cast %223 : vector<256x8xf32> to vector<1x256x8xf32>
    tpu.vector_store %arg21[%c0_202, %c0_203, %c0_204], %226 {strides = array<i32>} : memref<1x256x8xf32, #tpu.memory_space<vmem>>, vector<1x256x8xf32>,
    return
  }
  func.func @transform_0(%arg0: i32) -> (i32, i32, i32) {
    %c0_i32 = arith.constant 0 : i32
    %c0_i32_0 = arith.constant 0 : i32
    %c0_i32_1 = arith.constant 0 : i32
    return %arg0, %c0_i32, %c0_i32_0 : i32, i32, i32
  }
  func.func @transform_1(%arg0: i32) -> (i32, i32, i32) {
    %c0_i32 = arith.constant 0 : i32
    %c0_i32_0 = arith.constant 0 : i32
    %c0_i32_1 = arith.constant 0 : i32
    return %arg0, %c0_i32, %c0_i32_0 : i32, i32, i32
  }
  func.func @transform_2(%arg0: i32) -> (i32, i32) {
    %c0_i32 = arith.constant 0 : i32
    %c0_i32_0 = arith.constant 0 : i32
    %c0_i32_1 = arith.constant 0 : i32
    return %c0_i32, %c0_i32_0 : i32, i32
  }
  func.func @transform_3(%arg0: i32) -> (i32, i32) {
    %c0_i32 = arith.constant 0 : i32
    %c0_i32_0 = arith.constant 0 : i32
    %c0_i32_1 = arith.constant 0 : i32
    return %c0_i32, %c0_i32_0 : i32, i32
  }
  func.func @transform_4(%arg0: i32) -> (i32, i32) {
    %c0_i32 = arith.constant 0 : i32
    %c0_i32_0 = arith.constant 0 : i32
    %c0_i32_1 = arith.constant 0 : i32
    return %c0_i32, %c0_i32_0 : i32, i32
  }
  func.func @transform_5(%arg0: i32) -> (i32, i32) {
    %c0_i32 = arith.constant 0 : i32
    %c0_i32_0 = arith.constant 0 : i32
    %c0_i32_1 = arith.constant 0 : i32
    return %c0_i32, %c0_i32_0 : i32, i32
  }
  func.func @transform_6(%arg0: i32) -> (i32, i32, i32) {
    %c0_i32 = arith.constant 0 : i32
    %c0_i32_0 = arith.constant 0 : i32
    %c0_i32_1 = arith.constant 0 : i32
    %c0_i32_2 = arith.constant 0 : i32
    return %c0_i32, %c0_i32_0, %c0_i32_1 : i32, i32, i32
  }
  func.func @transform_7(%arg0: i32) -> (i32, i32) {
    %c0_i32 = arith.constant 0 : i32
    %c0_i32_0 = arith.constant 0 : i32
    %c0_i32_1 = arith.constant 0 : i32
    return %c0_i32, %c0_i32_0 : i32, i32
  }
  func.func @transform_8(%arg0: i32) -> (i32, i32) {
    %c0_i32 = arith.constant 0 : i32
    %c0_i32_0 = arith.constant 0 : i32
    %c0_i32_1 = arith.constant 0 : i32
    return %c0_i32, %c0_i32_0 : i32, i32
  }
  func.func @transform_9(%arg0: i32) -> (i32, i32) {
    %c0_i32 = arith.constant 0 : i32
    %c0_i32_0 = arith.constant 0 : i32
    %c0_i32_1 = arith.constant 0 : i32
    return %c0_i32, %c0_i32_0 : i32, i32
  }
  func.func @transform_10(%arg0: i32) -> (i32, i32) {
    %c0_i32 = arith.constant 0 : i32
    %c0_i32_0 = arith.constant 0 : i32
    %c0_i32_1 = arith.constant 0 : i32
    return %c0_i32, %c0_i32_0 : i32, i32
  }
  func.func @transform_11(%arg0: i32) -> (i32, i32) {
    %c0_i32 = arith.constant 0 : i32
    %c0_i32_0 = arith.constant 0 : i32
    %c0_i32_1 = arith.constant 0 : i32
    return %c0_i32, %c0_i32_0 : i32, i32
  }
  func.func @transform_12(%arg0: i32) -> (i32, i32, i32) {
    %c0_i32 = arith.constant 0 : i32
    %c0_i32_0 = arith.constant 0 : i32
    %c0_i32_1 = arith.constant 0 : i32
    %c0_i32_2 = arith.constant 0 : i32
    return %c0_i32, %c0_i32_0, %c0_i32_1 : i32, i32, i32
  }
  func.func @transform_13(%arg0: i32) -> (i32, i32) {
    %c0_i32 = arith.constant 0 : i32
    %c0_i32_0 = arith.constant 0 : i32
    %c0_i32_1 = arith.constant 0 : i32
    return %c0_i32, %c0_i32_0 : i32, i32
  }
  func.func @transform_14(%arg0: i32) -> (i32, i32) {
    %c0_i32 = arith.constant 0 : i32
    %c0_i32_0 = arith.constant 0 : i32
    %c0_i32_1 = arith.constant 0 : i32
    return %c0_i32, %c0_i32_0 : i32, i32
  }
  func.func @transform_15(%arg0: i32) -> (i32, i32) {
    %c0_i32 = arith.constant 0 : i32
    %c0_i32_0 = arith.constant 0 : i32
    %c0_i32_1 = arith.constant 0 : i32
    return %c0_i32, %c0_i32_0 : i32, i32
  }
  func.func @transform_16(%arg0: i32) -> (i32, i32) {
    %c0_i32 = arith.constant 0 : i32
    %c0_i32_0 = arith.constant 0 : i32
    %c0_i32_1 = arith.constant 0 : i32
    return %c0_i32, %c0_i32_0 : i32, i32
  }
  func.func @transform_17(%arg0: i32) -> (i32, i32) {
    %c0_i32 = arith.constant 0 : i32
    %c0_i32_0 = arith.constant 0 : i32
    %c0_i32_1 = arith.constant 0 : i32
    return %c0_i32, %c0_i32_0 : i32, i32
  }
  func.func @transform_18(%arg0: i32) -> (i32, i32) {
    %c0_i32 = arith.constant 0 : i32
    %c0_i32_0 = arith.constant 0 : i32
    %c0_i32_1 = arith.constant 0 : i32
    return %c0_i32, %c0_i32_0 : i32, i32
  }
  func.func @transform_19(%arg0: i32) -> (i32, i32) {
    %c0_i32 = arith.constant 0 : i32
    %c0_i32_0 = arith.constant 0 : i32
    %c0_i32_1 = arith.constant 0 : i32
    return %c0_i32, %c0_i32_0 : i32, i32
  }
  func.func @transform_20(%arg0: i32) -> (i32, i32, i32) {
    %c0_i32 = arith.constant 0 : i32
    %c0_i32_0 = arith.constant 0 : i32
    %c0_i32_1 = arith.constant 0 : i32
    return %arg0, %c0_i32, %c0_i32_0 : i32, i32, i32
  }
}

</mosaic_0001>

<bundles_post_ra>
// kernel: tpu_custom_call.1
= control target key start
LH: loop header
LB: loop body
LE: loop exit
PB: predicated region body
PF: predicated region fallthrough
CT: control target
= control target key end

     0   :  { %s17054_s0 = inlined_call_operand.vmem [shape: f32[2,256,4], index: 0, kind: input, shape index: {}]   ;;  %s17055_s1 = inlined_call_operand.vmem [shape: f32[2,1,32], index: 1, kind: input, shape index: {}]   ;;  %s17056_s2 = inlined_call_operand.vmem [shape: f32[4,2], index: 2, kind: input, shape index: {}]   ;;  %s17057_s3 = inlined_call_operand.vmem [shape: f32[2,4], index: 3, kind: input, shape index: {}]   ;;  %s17058_s4 = inlined_call_operand.vmem [shape: f32[1,4], index: 4, kind: input, shape index: {}]   ;;  %s17059_s5 = inlined_call_operand.vmem [shape: f32[1,4], index: 5, kind: input, shape index: {}]   ;;  %s17060_s6 = inlined_call_operand.vmem [shape: f32[9,4,8], index: 6, kind: input, shape index: {}]   ;;  %s17061_s7 = inlined_call_operand.vmem [shape: f32[1,8], index: 7, kind: input, shape index: {}]   ;;  %s17062_s8 = inlined_call_operand.vmem [shape: f32[8,2], index: 8, kind: input, shape index: {}]   ;;  %s17063_s9 = inlined_call_operand.vmem [shape: f32[2,8], index: 9, kind: input, shape index: {}]   ;;  %s17064_s10 = inlined_call_operand.vmem [shape: f32[1,8], index: 10, kind: input, shape index: {}]   ;;  %s17065_s11 = inlined_call_operand.vmem [shape: f32[1,8], index: 11, kind: input, shape index: {}]   ;;  %s17066_s12 = inlined_call_operand.vmem [shape: f32[9,8,8], index: 12, kind: input, shape index: {}]   ;;  %s17067_s13 = inlined_call_operand.vmem [shape: f32[1,8], index: 13, kind: input, shape index: {}]   ;;  %s17068_s14 = inlined_call_operand.vmem [shape: f32[32,8], index: 14, kind: input, shape index: {}]   ;;  %s17069_s15 = inlined_call_operand.vmem [shape: f32[1,8], index: 15, kind: input, shape index: {}]   ;;  %s17070_s16 = inlined_call_operand.vmem [shape: f32[32,8], index: 16, kind: input, shape index: {}]   ;;  %s17071_s17 = inlined_call_operand.vmem [shape: f32[1,8], index: 17, kind: input, shape index: {}]   ;;  %s17072_s18 = inlined_call_operand.vmem [shape: f32[4,8], index: 18, kind: input, shape index: {}]   ;;  %s17073_s19 = inlined_call_operand.vmem [shape: f32[1,8], index: 19, kind: input, shape index: {}]   ;;  %s17074_s20 = inlined_call_operand.vmem [shape: f32[2,256,8], index: 20, kind: output, shape index: {}]  }
   0x1   :  { %17231 = sst [smem:[#allocation79_spill]] %s17054_s0 }
   0x2   :  { %17232 = sst [smem:[#allocation80_spill]] %s17055_s1  ;;  %s13500_s1 = smov 0  }
   0x3   :  { %17233 = sst [smem:[#allocation81_spill]] %s17056_s2 }
   0x4   :  { %17234 = sst [smem:[#allocation82_spill]] %s17057_s3 }
   0x5   :  { %17235 = sst [smem:[#allocation83_spill]] %s17058_s4 }
   0x6 LB: > { %s10055_s22 = sadd.s32 4294967295, %s13390_s1   ;;  %p10059_p0 = scmp.ge.s32.totalorder %s13390_s1, 1  ;;  %s13390_s1 = sphi %s13500_s1, %s30_s1  }
   0x7   : > { %p570_p1 = scmp.lt.s32.totalorder %s13390_s1, 3 }
   0x9   : > { %p571_p2 = pnand %p10059_p0, %p570_p1 }
   0xb   : > { %574 = sbr.rel (%p571_p2) target bundleno = 3779 (0xec3), region = 100 }
  0x12   : > { %v730_v0 = vld [vmem:[%s17068_s14] sm:$0xff]  ;;  %v731_v1 = vld [vmem:[%s17068_s14 + $0x8] sm:$0xff]  ;;  %v732_v2 = vld [vmem:[%s17068_s14 + $0x10] sm:$0xff]  ;;  %v13392_v3 = vmov 0.0|0.0   ;;  %vm13393_vm0 = vmmov 0   ;;  %v17075_v6 = vmov 0.0  }
  0x13   : > { %12455 = vmatprep.subr.bf16.mxu0 %v13392_v3  ;;  %v12456_v4 = vpack.c.bf16 %v731_v1, %v730_v0  ;;  %v733_v5 = vld [vmem:[%s17068_s14 + $0x18] sm:$0xff]  ;;  %11451 = vmatprep.mubr.msk.f32.mxu0 %vm13393_vm0, %v17075_v6  ;;  %p631_p3 = scmp.lt.s32.totalorder %s10055_s22, 1  ;;  %v809_v7 = vld [vmem:[%s17070_s16] sm:$0xff]  ;;  %v810_v8 = vld [vmem:[%s17070_s16 + $0x8] sm:$0xff]  ;;  %s17236_s27 = sld [smem:[#allocation80_spill]]  ;;  %vm884_vm1 = vcmask 31744  }
  0x14   : > { %12461 = vmatprep.subr.bf16.mxu1 %v13392_v3  ;;  %v811_v9 = vld [vmem:[%s17070_s16 + $0x10] sm:$0xff]  ;;  %11462 = vmatprep.mubr.msk.f32.mxu1 %vm13393_vm0, %v17075_v6  ;;  %v12459_v10 = vpack.c.bf16 %v733_v5, %v732_v2  ;;  %v12462_v11 = vpack.c.bf16 %v810_v8, %v809_v7  ;;  %v812_v12 = vld [vmem:[%s17070_s16 + $0x18] sm:$0xff]  ;;  %s17237_s30 = sld [smem:[#allocation79_spill]]  ;;  %vm735_vm2 = vcmask 261120   ;;  %s17238_s24 = sld [smem:[#allocation81_spill]]  ;;  %vm959_vm3 = vcmask 1043456  }
  0x15   : > { %12457 = vmatpush3.bf16.msra.mxu0 %v12456_v4  ;;  %s17485_s22 = smov (!%p631_p3, %s10055_s22), 1  ;;  %v12465_v13 = vpack.c.bf16 %v812_v12, %v811_v9  ;;  %s17239_s26 = sld [smem:[#allocation82_spill]]  ;;  %vm1038_vm4 = vcmask 1041408   ;;  %vm1034_vm5 = vcmask 15360   ;;  %vm644_vm6 = vcmask 64512  }
  0x16   : > { %12458 = vmatprep.subr.bf16.mxu0 %v13392_v3  ;;  %s10788_s25 = sshll.u32 %s17485_s22, 8  ;;  %12463 = vmatpush3.bf16.msra.mxu1 %v12462_v11  ;;  %645 = vst.msk [vmem:[#allocation2] sm:$0xff] %vm644_vm6, %v17075_v6  ;;  %646 = vst.msk [vmem:[#allocation2 + $0x8] sm:$0xff] %vm644_vm6, %v17075_v6  ;;  %vm647_vm7 = vcmask 58368   ;;  %vm653_vm8 = vcmask 57344   ;;  %s17243_s2 = sld [smem:[#allocation83_spill]] }
  0x17   : > { %12464 = vmatprep.subr.bf16.mxu1 %v13392_v3  ;;  %650 = vst.msk [vmem:[#allocation2 + $0x198] sm:$0xff] %vm644_vm6, %v17075_v6  ;;  %651 = vst.msk [vmem:[#allocation2 + $0x1a0] sm:$0xff] %vm644_vm6, %v17075_v6 }
  0x18   : > { %648 = vst.msk [vmem:[#allocation2 + $0x10] sm:$0x3] %vm647_vm7, %v17075_v6  ;;  %652 = vst.msk [vmem:[#allocation2 + $0x1a8] sm:$0x3] %vm647_vm7, %v17075_v6 }
  0x19   : > { %s638_s28 = scalar_lea.vmem %s17236_s27, %s17485_s22  ;;  %12460 = vmatpush3.bf16.msra.mxu0 %v12459_v10  ;;  %654 = vst.msk [vmem:[#allocation2] sm:$0x1] %vm653_vm8, %v17075_v6  ;;  %655 = vst.msk [vmem:[#allocation2 + $0x18] sm:$0x1] %vm653_vm8, %v17075_v6 }
  0x1a   : > { %s13548_s0 = scalar_lea.vmem %s17237_s30, %s10788_s25  ;;  %v722_v14 = vld [vmem:[%s638_s28] sm:$0x1]  ;;  %11465 = vmatprep.subr.mxu0 %v17075_v6  ;;  %12466 = vmatpush3.bf16.msra.mxu1 %v12465_v13  ;;  %656 = vst.msk [vmem:[#allocation2 + $0x30] sm:$0x1] %vm653_vm8, %v17075_v6  ;;  %657 = vst.msk [vmem:[#allocation2 + $0x48] sm:$0x1] %vm653_vm8, %v17075_v6 }
  0x1b   : > { %v10064_v15 = vmul.f32 -1.442695, %v722_v14  ;;  %v13551_v16 = vld [vmem:[%s13548_s0] sm:$0xff]  ;;  %v13554_v17 = vld [vmem:[%s13548_s0 + $0x8] sm:$0xff]  ;;  %v13557_v18 = vld [vmem:[%s13548_s0 + $0x10] sm:$0xff]  ;;  %11470 = vmatprep.subr.mxu1 %v17075_v6 }
  0x1c   : > { %v13561_v19 = vld [vmem:[%s13548_s0 + $0x18] sm:$0xff]  ;;  %v885_v20 = vsel %vm884_vm1, %v13551_v16, 0.0  ;;  %v886_v21 = vsel %vm884_vm1, %v13554_v17, 0.0  ;;  %v888_v22 = vsel %vm884_vm1, %v13557_v18, 0.0  ;;  %v13570_v23 = vld [vmem:[%s13548_s0 + $0x20] sm:$0xff]  ;;  %v13576_v26 = vld [vmem:[%s13548_s0 + $0x28] sm:$0xff] }
  0x1d   : > { %13088 = vpow2.f32 %v10064_v15  ;;  %v887_v24 = vadd.f32 %v886_v21, %v885_v20  ;;  %v890_v25 = vsel %vm884_vm1, %v13561_v19, 0.0  ;;  %v892_v28 = vsel %vm884_vm1, %v13570_v23, 0.0  ;;  %v13581_v29 = vld [vmem:[%s13548_s0 + $0x30] sm:$0xff]  ;;  %v13586_v32 = vld [vmem:[%s13548_s0 + $0x38] sm:$0xff]  ;;  %v13591_v35 = vld [vmem:[%s13548_s0 + $0x40] sm:$0xff] }
  0x1e   : > { %v894_v31 = vsel %vm884_vm1, %v13576_v26, 0.0  ;;  %v896_v34 = vsel %vm884_vm1, %v13581_v29, 0.0  ;;  %v898_v37 = vsel %vm884_vm1, %v13586_v32, 0.0  ;;  %v13596_v39 = vld [vmem:[%s13548_s0 + $0x48] sm:$0xff]  ;;  %v900_v42 = vsel %vm884_vm1, %v13591_v35, 0.0  ;;  %v13601_v43 = vld [vmem:[%s13548_s0 + $0x50] sm:$0xff] }
  0x1f   : > { %v889_v27 = vadd.f32 %v888_v22, %v887_v24  ;;  %v902_v45 = vsel %vm884_vm1, %v13596_v39, 0.0  ;;  %v13606_v46 = vld [vmem:[%s13548_s0 + $0x58] sm:$0xff]  ;;  %v904_v48 = vsel %vm884_vm1, %v13601_v43, 0.0  ;;  %v13611_v49 = vld [vmem:[%s13548_s0 + $0x60] sm:$0xff]  ;;  %v13616_v52 = vld [vmem:[%s13548_s0 + $0x68] sm:$0xff] }
  0x20   : > { %v906_v51 = vsel %vm884_vm1, %v13606_v46, 0.0  ;;  %v908_v54 = vsel %vm884_vm1, %v13611_v49, 0.0  ;;  %v13621_v55 = vld [vmem:[%s13548_s0 + $0x70] sm:$0xff]  ;;  %v910_v57 = vsel %vm884_vm1, %v13616_v52, 0.0  ;;  %v13626_v58 = vld [vmem:[%s13548_s0 + $0x78] sm:$0xff]  ;;  %v13636_v0 = vld [vmem:[%s13548_s0 + $0x80] sm:$0xff] }
  0x21   : > { %v891_v30 = vadd.f32 %v890_v25, %v889_v27  ;;  %v912_v61 = vsel %vm884_vm1, %v13621_v55, 0.0  ;;  %v13633_v63 = vld [vmem:[%s17238_s24] sm:$0xf]  ;;  %v914_v2 = vsel %vm884_vm1, %v13626_v58, 0.0  ;;  %v13641_v3 = vld [vmem:[%s13548_s0 + $0x88] sm:$0xff]  ;;  %v916_v5 = vsel %vm884_vm1, %v13636_v0, 0.0  ;;  %s16931_s24 = scalar_lea.vmem %s17074_s20, %s10788_s25 }
  0x22   : > { %v13650_v7 = vld [vmem:[%s13548_s0 + $0x90] sm:$0xff]  ;;  %v918_v9 = vsel %vm884_vm1, %v13641_v3, 0.0  ;;  %v13658_v10 = vld [vmem:[%s13548_s0 + $0x98] sm:$0xff]  ;;  %v13663_v13 = vld [vmem:[%s13548_s0 + $0xa0] sm:$0xff]  ;;  %658 = vst.msk [vmem:[#allocation2 + $0x60] sm:$0x1] %vm653_vm8, %v17075_v6 }
  0x23   : > { %v893_v33 = vadd.f32 %v892_v28, %v891_v30  ;;  %v920_v12 = vsel %vm884_vm1, %v13650_v7, 0.0  ;;  %v922_v15 = vsel %vm884_vm1, %v13658_v10, 0.0  ;;  %v13668_v20 = vld [vmem:[%s13548_s0 + $0xa8] sm:$0xff]  ;;  %v924_v22 = vsel %vm884_vm1, %v13663_v13, 0.0  ;;  %v13673_v24 = vld [vmem:[%s13548_s0 + $0xb0] sm:$0xff]  ;;  %v13678_v28 = vld [vmem:[%s13548_s0 + $0xb8] sm:$0xff] }
  0x24   : > { %v926_v27 = vsel %vm884_vm1, %v13668_v20, 0.0  ;;  %659 = vst.msk [vmem:[#allocation2 + $0x78] sm:$0x1] %vm653_vm8, %v17075_v6  ;;  %660 = vst.msk [vmem:[#allocation2 + $0x90] sm:$0x1] %vm653_vm8, %v17075_v6 }
  0x25   : > { %v895_v36 = vadd.f32 %v894_v31, %v893_v33  ;;  %v928_v31 = vsel %vm884_vm1, %v13673_v24, 0.0  ;;  %v13683_v33 = vld [vmem:[%s13548_s0 + $0xc0] sm:$0xff]  ;;  %661 = vst.msk [vmem:[#allocation2 + $0xa8] sm:$0x1] %vm653_vm8, %v17075_v6  ;;  %662 = vst.msk [vmem:[#allocation2 + $0xc0] sm:$0x1] %vm653_vm8, %v17075_v6 }
  0x26   : > { %663 = vst.msk [vmem:[#allocation2 + $0xd8] sm:$0x1] %vm653_vm8, %v17075_v6  ;;  %664 = vst.msk [vmem:[#allocation2 + $0xf0] sm:$0x1] %vm653_vm8, %v17075_v6 }
  0x27   : > { %v13089_v38 = vpop.eup %13088  ;;  %v897_v40 = vadd.f32 %v896_v34, %v895_v36  ;;  %v930_v36 = vsel %vm884_vm1, %v13678_v28, 0.0  ;;  %665 = vst.msk [vmem:[#allocation2 + $0x108] sm:$0x1] %vm653_vm8, %v17075_v6  ;;  %666 = vst.msk [vmem:[#allocation2 + $0x120] sm:$0x1] %vm653_vm8, %v17075_v6 }
  0x28   : > { %v726_v41 = vadd.f32 1.0, %v13089_v38  ;;  %667 = vst.msk [vmem:[#allocation2 + $0x138] sm:$0x1] %vm653_vm8, %v17075_v6  ;;  %668 = vst.msk [vmem:[#allocation2 + $0x150] sm:$0x1] %vm653_vm8, %v17075_v6 }
  0x29   : > { %v899_v44 = vadd.f32 %v898_v37, %v897_v40  ;;  %v13688_v37 = vld [vmem:[%s13548_s0 + $0xc8] sm:$0xff]  ;;  %v932_v40 = vsel %vm884_vm1, %v13683_v33, 0.0  ;;  %669 = vst.msk [vmem:[#allocation2 + $0x168] sm:$0x1] %vm653_vm8, %v17075_v6  ;;  %670 = vst.msk [vmem:[#allocation2 + $0x180] sm:$0x1] %vm653_vm8, %v17075_v6 }
  0x2a   : > { %13090 = vrcp.f32 %v726_v41  ;;  %v13693_v41 = vld [vmem:[%s13548_s0 + $0xd0] sm:$0xff]  ;;  %671 = vst.msk [vmem:[#allocation2 + $0x198] sm:$0x1] %vm653_vm8, %v17075_v6  ;;  %672 = vst.msk [vmem:[#allocation2 + $0x11] sm:$0x1] %vm653_vm8, %v17075_v6 }
  0x2b   : > { %v901_v47 = vadd.f32 %v900_v42, %v899_v44  ;;  %v934_v44 = vsel %vm884_vm1, %v13688_v37, 0.0  ;;  %673 = vst.msk [vmem:[#allocation2 + $0x29] sm:$0x1] %vm653_vm8, %v17075_v6  ;;  %674 = vst.msk [vmem:[#allocation2 + $0x41] sm:$0x1] %vm653_vm8, %v17075_v6 }
  0x2c   : > { %675 = vst.msk [vmem:[#allocation2 + $0x59] sm:$0x1] %vm653_vm8, %v17075_v6  ;;  %676 = vst.msk [vmem:[#allocation2 + $0x71] sm:$0x1] %vm653_vm8, %v17075_v6 }
  0x2d   : > { %v903_v50 = vadd.f32 %v902_v45, %v901_v47  ;;  %v13698_v45 = vld [vmem:[%s13548_s0 + $0xd8] sm:$0xff]  ;;  %677 = vst.msk [vmem:[#allocation2 + $0x89] sm:$0x1] %vm653_vm8, %v17075_v6  ;;  %678 = vst.msk [vmem:[#allocation2 + $0xa1] sm:$0x1] %vm653_vm8, %v17075_v6 }
  0x2e   : > { %679 = vst.msk [vmem:[#allocation2 + $0xb9] sm:$0x1] %vm653_vm8, %v17075_v6  ;;  %680 = vst.msk [vmem:[#allocation2 + $0xd1] sm:$0x1] %vm653_vm8, %v17075_v6 }
  0x2f   : > { %v905_v53 = vadd.f32 %v904_v48, %v903_v50  ;;  %v936_v48 = vsel %vm884_vm1, %v13693_v41, 0.0  ;;  %v13703_v50 = vld [vmem:[%s13548_s0 + $0xe0] sm:$0xff]  ;;  %681 = vst.msk [vmem:[#allocation2 + $0xe9] sm:$0x1] %vm653_vm8, %v17075_v6  ;;  %682 = vst.msk [vmem:[#allocation2 + $0x101] sm:$0x1] %vm653_vm8, %v17075_v6 }
  0x30   : > { %683 = vst.msk [vmem:[#allocation2 + $0x119] sm:$0x1] %vm653_vm8, %v17075_v6  ;;  %684 = vst.msk [vmem:[#allocation2 + $0x131] sm:$0x1] %vm653_vm8, %v17075_v6 }
  0x31   : > { %v907_v56 = vadd.f32 %v906_v51, %v905_v53  ;;  %v938_v53 = vsel %vm884_vm1, %v13698_v45, 0.0  ;;  %685 = vst.msk [vmem:[#allocation2 + $0x149] sm:$0x1] %vm653_vm8, %v17075_v6  ;;  %686 = vst.msk [vmem:[#allocation2 + $0x161] sm:$0x1] %vm653_vm8, %v17075_v6 }
  0x32   : > { %687 = vst.msk [vmem:[#allocation2 + $0x179] sm:$0x1] %vm653_vm8, %v17075_v6  ;;  %688 = vst.msk [vmem:[#allocation2 + $0x191] sm:$0x1] %vm653_vm8, %v17075_v6 }
  0x33   : > { %v909_v59 = vadd.f32 %v908_v54, %v907_v56  ;;  %v13708_v54 = vld [vmem:[%s13548_s0 + $0xe8] sm:$0xff]  ;;  %689 = vst.msk [vmem:[#allocation2 + $0x1a9] sm:$0x1] %vm653_vm8, %v17075_v6 }
  0x34   : > { %v13091_v60 = vpop.eup %13090 }
  0x35   : > { %v729_v62 = vmul.f32 %v13091_v60, %v722_v14  ;;  %v911_v1 = vadd.f32 %v910_v57, %v909_v59  ;;  %v940_v57 = vsel %vm884_vm1, %v13703_v50, 0.0  ;;  %v13713_v59 = vld [vmem:[%s13548_s0 + $0xf0] sm:$0xff] }
  0x37   : > { %11452 = vmatmul.mubr.msk.f32.vlgmr.msra.gmra.mrb[0].mxu0 %vm735_vm2, %v729_v62  ;;  %v913_v4 = vadd.f32 %v912_v61, %v911_v1  ;;  %11463 = vmatmul.mubr.msk.f32.vlgmr.msra.gmra.mrb[0].mxu1 %vm735_vm2, %v729_v62  ;;  %v942_v61 = vsel %vm884_vm1, %v13708_v54, 0.0  ;;  %v13718_v62 = vld [vmem:[%s13548_s0 + $0xf8] sm:$0xff] }
  0x38   : > { %11466 = vmatpush3.msk.msra.mxu0 %vm959_vm3, %v13633_v63  ;;  %11467 = vmatprep.mubr.msk.f32.mxu0 %vm13393_vm0, %v17075_v6 }
  0x39   : > { %v915_v8 = vadd.f32 %v914_v2, %v913_v4  ;;  %11472 = vmatprep.mubr.msk.f32.mxu1 %vm13393_vm0, %v17075_v6  ;;  %11475 = vmatprep.subr.mxu0 %v17075_v6  ;;  %v944_v2 = vsel %vm884_vm1, %v13713_v59, 0.0 }
  0x3b   : > { %v917_v11 = vadd.f32 %v916_v5, %v915_v8  ;;  %v946_v5 = vsel %vm884_vm1, %v13718_v62, 0.0 }
  0x3d   : > { %v919_v14 = vadd.f32 %v918_v9, %v917_v11 }
  0x3f   : > { %v921_v21 = vadd.f32 %v920_v12, %v919_v14 }
  0x41   : > { %v923_v25 = vadd.f32 %v922_v15, %v921_v21 }
  0x43   : > { %v925_v30 = vadd.f32 %v924_v22, %v923_v25 }
  0x45   : > { %v927_v34 = vadd.f32 %v926_v27, %v925_v30  ;;  %v1033_v27 = vld [vmem:[%s17239_s26] sm:$0x3] }
  0x46   : > { %11471 = vmatpush3.msk.msra.mxu1 %vm1038_vm4, %v1033_v27 }
  0x47   : > { %v929_v38 = vadd.f32 %v928_v31, %v927_v34  ;;  %11480 = vmatprep.subr.mxu1 %v17075_v6 }
  0x49   : > { %v931_v42 = vadd.f32 %v930_v36, %v929_v38 }
  0x4b   : > { %v933_v47 = vadd.f32 %v932_v40, %v931_v42  ;;  %v1112_v40 = vlaneseq }
  0x4d   : > { %v935_v51 = vadd.f32 %v934_v44, %v933_v47  ;;  %v1113_v44 = vshrl.u32 %v1112_v40, 7 }
  0x4f   : > { %v937_v56 = vadd.f32 %v936_v48, %v935_v51  ;;  %v13743_v48 = vsub.s32 0, %v1113_v44 }
  0x51   : > { %v939_v60 = vadd.f32 %v938_v53, %v937_v56  ;;  %17242 = vst [vmem:[#allocation5_spill] sm:$0xff] %v13743_v48 }
  0x53   : > { %v941_v1 = vadd.f32 %v940_v57, %v939_v60 }
  0x55   : > { %v943_v4 = vadd.f32 %v942_v61, %v941_v1 }
  0x57   : > { %v945_v8 = vadd.f32 %v944_v2, %v943_v4 }
  0x59   : > { %v947_v9 = vadd.f32 %v946_v5, %v945_v8 }
  0x5b   : > { %v948_v11 = vrot.slane %v947_v9, 4 }
  0x5d   : > { %v949_v12 = vadd.f32 %v948_v11, %v947_v9 }
  0x5f   : > { %v950_v14 = vrot.slane %v949_v12, 2 }
  0x61   : > { %v951_v15 = vadd.f32 %v950_v14, %v949_v12 }
  0x63   : > { %v952_v21 = vrot.slane %v951_v15, 1 }
  0x65   : > { %v953_v22 = vadd.f32 %v952_v21, %v951_v15 }
  0x67   : > { %v954_v25 = vmul.f32 0.00390625, %v953_v22 }
  0x69   : > { %11468 = vmatmul.mubr.msk.f32.vlgmr.msra.gmra.mrb[2].mxu0 %vm884_vm1, %v954_v25 }
  0x6a   : > { %11476 = vmatpush3.msk.msra.mxu0 %vm959_vm3, %v13633_v63  ;;  %11477 = vmatprep.mubr.msk.f32.mxu0 %vm13393_vm0, %v17075_v6 }
 0x10a   : > { %v13734_v30 = vpop.f32.mrb[0].mxu0  ;;  %v13736_v31 = vpop.f32.mrb[0].mxu1 }
 0x10b   : > { %17240 = vst [vmem:[#allocation3_spill] sm:$0xff] %v13734_v30  ;;  %17241 = vst [vmem:[#allocation4_spill] sm:$0xff] %v13736_v31  ;;  %v11453_v34 = vpop.f32.mrb[1].mxu0  ;;  %v11464_v36 = vpop.f32.mrb[1].mxu1 }
 0x13c   : > { %v1029_v63 = vpop.f32.mrb[2].mxu0 }
 0x13d   : > { %v11469_v38 = vpop.f32.mrb[3].mxu0  ;;  %11473 = vmatmul.mubr.msk.f32.vlgmr.msra.gmra.mrb[2].mxu1 %vm1034_vm5, %v1029_v63 }
 0x13e   : > { %11481 = vmatpush3.msk.msra.mxu1 %vm1038_vm4, %v1033_v27  ;;  %11482 = vmatprep.mubr.msk.f32.mxu1 %vm13393_vm0, %v17075_v6 }
 0x13f   : > { %11935 = vmatprep.subr.mxu1 %v17075_v6 }
 0x210   : > { %v1108_v42 = vpop.f32.mrb[2].mxu1 }
 0x211   : > { %v11474_v47 = vpop.f32.mrb[3].mxu1  ;;  %v13746_v51 = vrot.slane %v1108_v42, %v13743_v48 }
 0x213   : > { %v13750_v53 = vsub.f32 %v13551_v16, %v13746_v51  ;;  %v13754_v56 = vsub.f32 %v13554_v17, %v13746_v51  ;;  %v13758_v57 = vsub.f32 %v13557_v18, %v13746_v51  ;;  %v13762_v60 = vsub.f32 %v13561_v19, %v13746_v51 }
 0x214   : > { %v13770_v16 = vsub.f32 %v13570_v23, %v13746_v51  ;;  %v13776_v18 = vsub.f32 %v13576_v26, %v13746_v51  ;;  %v13784_v8 = vsub.f32 %v13581_v29, %v13746_v51  ;;  %v13791_v26 = vsub.f32 %v13586_v32, %v13746_v51 }
 0x215   : > { %v1148_v61 = vmul.f32 %v13750_v53, %v13750_v53  ;;  %v1149_v1 = vmul.f32 %v13754_v56, %v13754_v56  ;;  %v1150_v17 = vmul.f32 %v13758_v57, %v13758_v57  ;;  %v1151_v19 = vmul.f32 %v13762_v60, %v13762_v60 }
 0x216   : > { %v1152_v23 = vmul.f32 %v13770_v16, %v13770_v16  ;;  %v1153_v12 = vmul.f32 %v13776_v18, %v13776_v18  ;;  %v13798_v29 = vsub.f32 %v13591_v35, %v13746_v51  ;;  %v1154_v21 = vmul.f32 %v13784_v8, %v13784_v8 }
 0x217   : > { %v1180_v2 = vsel %vm884_vm1, %v1148_v61, 0.0  ;;  %v1181_v4 = vsel %vm884_vm1, %v1149_v1, 0.0  ;;  %v1183_v9 = vsel %vm884_vm1, %v1150_v17, 0.0  ;;  %v1185_v14 = vsel %vm884_vm1, %v1151_v19, 0.0 }
 0x218   : > { %v1182_v5 = vadd.f32 %v1181_v4, %v1180_v2  ;;  %v1187_v22 = vsel %vm884_vm1, %v1152_v23, 0.0  ;;  %v13805_v32 = vsub.f32 %v13596_v39, %v13746_v51  ;;  %v1155_v27 = vmul.f32 %v13791_v26, %v13791_v26 }
 0x219   : > { %v1189_v34 = vsel %vm884_vm1, %v1153_v12, 0.0  ;;  %v13812_v35 = vsub.f32 %v13601_v43, %v13746_v51  ;;  %v1156_v63 = vmul.f32 %v13798_v29, %v13798_v29  ;;  %v1191_v38 = vsel %vm884_vm1, %v1154_v21, 0.0 }
 0x21a   : > { %v1184_v11 = vadd.f32 %v1183_v9, %v1182_v5  ;;  %v13819_v39 = vsub.f32 %v13606_v46, %v13746_v51  ;;  %v1157_v42 = vmul.f32 %v13805_v32, %v13805_v32  ;;  %v1193_v44 = vsel %vm884_vm1, %v1155_v27, 0.0 }
 0x21b   : > { %v13826_v43 = vsub.f32 %v13611_v49, %v13746_v51  ;;  %v1158_v61 = vmul.f32 %v13812_v35, %v13812_v35  ;;  %v1195_v1 = vsel %vm884_vm1, %v1156_v63, 0.0  ;;  %v13833_v46 = vsub.f32 %v13616_v52, %v13746_v51 }
 0x21c   : > { %v1186_v15 = vadd.f32 %v1185_v14, %v1184_v11  ;;  %v1159_v19 = vmul.f32 %v13819_v39, %v13819_v39  ;;  %v1197_v2 = vsel %vm884_vm1, %v1157_v42, 0.0  ;;  %v13840_v49 = vsub.f32 %v13621_v55, %v13746_v51 }
 0x21d   : > { %v1160_v5 = vmul.f32 %v13826_v43, %v13826_v43  ;;  %v1199_v23 = vsel %vm884_vm1, %v1158_v61, 0.0  ;;  %v13847_v52 = vsub.f32 %v13626_v58, %v13746_v51  ;;  %v1161_v11 = vmul.f32 %v13833_v46, %v13833_v46 }
 0x21e   : > { %v1188_v25 = vadd.f32 %v1187_v22, %v1186_v15  ;;  %v1201_v12 = vsel %vm884_vm1, %v1159_v19, 0.0  ;;  %v13854_v55 = vsub.f32 %v13636_v0, %v13746_v51  ;;  %v1162_v15 = vmul.f32 %v13840_v49, %v13840_v49 }
 0x21f   : > { %v1203_v21 = vsel %vm884_vm1, %v1160_v5, 0.0  ;;  %v13861_v58 = vsub.f32 %v13641_v3, %v13746_v51  ;;  %v1205_v27 = vsel %vm884_vm1, %v1161_v11, 0.0  ;;  %v13868_v0 = vsub.f32 %v13650_v7, %v13746_v51 }
 0x220   : > { %v1190_v36 = vadd.f32 %v1189_v34, %v1188_v25  ;;  %v1163_v25 = vmul.f32 %v13847_v52, %v13847_v52  ;;  %v1207_v63 = vsel %vm884_vm1, %v1162_v15, 0.0  ;;  %v13875_v3 = vsub.f32 %v13658_v10, %v13746_v51 }
 0x221   : > { %v13882_v7 = vsub.f32 %v13663_v13, %v13746_v51  ;;  %v13889_v10 = vsub.f32 %v13668_v20, %v13746_v51  ;;  %v13896_v13 = vsub.f32 %v13673_v24, %v13746_v51  ;;  %v13903_v20 = vsub.f32 %v13678_v28, %v13746_v51 }
 0x222   : > { %v1192_v40 = vadd.f32 %v1191_v38, %v1190_v36  ;;  %v1164_v36 = vmul.f32 %v13854_v55, %v13854_v55  ;;  %v1209_v42 = vsel %vm884_vm1, %v1163_v25, 0.0  ;;  %v13910_v24 = vsub.f32 %v13683_v33, %v13746_v51 }
 0x223   : > { %v13917_v28 = vsub.f32 %v13688_v37, %v13746_v51  ;;  %v13924_v33 = vsub.f32 %v13693_v41, %v13746_v51  ;;  %v13931_v37 = vsub.f32 %v13698_v45, %v13746_v51  ;;  %v13938_v41 = vsub.f32 %v13703_v50, %v13746_v51 }
 0x224   : > { %v1194_v47 = vadd.f32 %v1193_v44, %v1192_v40  ;;  %v1165_v40 = vmul.f32 %v13861_v58, %v13861_v58  ;;  %v1211_v61 = vsel %vm884_vm1, %v1164_v36, 0.0  ;;  %v13945_v45 = vsub.f32 %v13708_v54, %v13746_v51 }
 0x225   : > { %v13952_v50 = vsub.f32 %v13713_v59, %v13746_v51  ;;  %v13959_v54 = vsub.f32 %v13718_v62, %v13746_v51 }
 0x226   : > { %v1196_v17 = vadd.f32 %v1195_v1, %v1194_v47  ;;  %v1166_v47 = vmul.f32 %v13868_v0, %v13868_v0  ;;  %v1213_v19 = vsel %vm884_vm1, %v1165_v40, 0.0 }
 0x227   : > { %v1178_v59 = vmul.f32 %v13952_v50, %v13952_v50 }
 0x228   : > { %v1198_v4 = vadd.f32 %v1197_v2, %v1196_v17  ;;  %v1167_v17 = vmul.f32 %v13875_v3, %v13875_v3  ;;  %v1215_v5 = vsel %vm884_vm1, %v1166_v47, 0.0 }
 0x229   : > { %v1239_v62 = vsel %vm884_vm1, %v1178_v59, 0.0 }
 0x22a   : > { %v1200_v9 = vadd.f32 %v1199_v23, %v1198_v4  ;;  %v1168_v4 = vmul.f32 %v13882_v7, %v13882_v7  ;;  %v1217_v11 = vsel %vm884_vm1, %v1167_v17, 0.0 }
 0x22c   : > { %v1202_v14 = vadd.f32 %v1201_v12, %v1200_v9  ;;  %v1169_v9 = vmul.f32 %v13889_v10, %v13889_v10  ;;  %v1219_v15 = vsel %vm884_vm1, %v1168_v4, 0.0 }
 0x22e   : > { %v1204_v22 = vadd.f32 %v1203_v21, %v1202_v14  ;;  %v1170_v14 = vmul.f32 %v13896_v13, %v13896_v13  ;;  %v1221_v25 = vsel %vm884_vm1, %v1169_v9, 0.0 }
 0x230   : > { %v1206_v34 = vadd.f32 %v1205_v27, %v1204_v22  ;;  %v1171_v22 = vmul.f32 %v13903_v20, %v13903_v20  ;;  %v1223_v36 = vsel %vm884_vm1, %v1170_v14, 0.0 }
 0x232   : > { %v1208_v38 = vadd.f32 %v1207_v63, %v1206_v34  ;;  %v1172_v34 = vmul.f32 %v13910_v24, %v13910_v24  ;;  %v1225_v40 = vsel %vm884_vm1, %v1171_v22, 0.0 }
 0x234   : > { %v1210_v44 = vadd.f32 %v1209_v42, %v1208_v38  ;;  %v1173_v38 = vmul.f32 %v13917_v28, %v13917_v28  ;;  %v1227_v47 = vsel %vm884_vm1, %v1172_v34, 0.0 }
 0x236   : > { %v1212_v1 = vadd.f32 %v1211_v61, %v1210_v44  ;;  %v1174_v44 = vmul.f32 %v13924_v33, %v13924_v33  ;;  %v1229_v17 = vsel %vm884_vm1, %v1173_v38, 0.0 }
 0x238   : > { %v1214_v2 = vadd.f32 %v1213_v19, %v1212_v1  ;;  %v1175_v1 = vmul.f32 %v13931_v37, %v13931_v37  ;;  %v1231_v4 = vsel %vm884_vm1, %v1174_v44, 0.0 }
 0x23a   : > { %v1216_v23 = vadd.f32 %v1215_v5, %v1214_v2  ;;  %v1176_v2 = vmul.f32 %v13938_v41, %v13938_v41  ;;  %v1233_v9 = vsel %vm884_vm1, %v1175_v1, 0.0  ;;  %v10109_v1 = vld [vmem:[%s17060_s6 + $0x4] sm:$0xf] }
 0x23b   : > { %11485 = vmatprep.subr.msk.mxu0 %vm959_vm3, %v10109_v1 }
 0x23c   : > { %v1218_v12 = vadd.f32 %v1217_v11, %v1216_v23  ;;  %v1177_v23 = vmul.f32 %v13945_v45, %v13945_v45 }
 0x23e   : > { %v1220_v21 = vadd.f32 %v1219_v15, %v1218_v12  ;;  %v1235_v12 = vsel %vm884_vm1, %v1176_v2, 0.0  ;;  %v1179_v15 = vmul.f32 %v13959_v54, %v13959_v54  ;;  %v1802_v2 = vld [vmem:[#allocation2 + $0x9] sm:$0xff] }
 0x240   : > { %v1222_v27 = vadd.f32 %v1221_v25, %v1220_v21  ;;  %v1237_v21 = vsel %vm884_vm1, %v1177_v23, 0.0  ;;  %v1241_v25 = vsel %vm884_vm1, %v1179_v15, 0.0 }
 0x242   : > { %v1224_v63 = vadd.f32 %v1223_v36, %v1222_v27 }
 0x244   : > { %v1226_v42 = vadd.f32 %v1225_v40, %v1224_v63 }
 0x246   : > { %v1228_v61 = vadd.f32 %v1227_v47, %v1226_v42 }
 0x248   : > { %v1230_v19 = vadd.f32 %v1229_v17, %v1228_v61  ;;  %v1800_v17 = vld [vmem:[%s17060_s6] sm:$0xf] }
 0x24a   : > { %v1232_v5 = vadd.f32 %v1231_v4, %v1230_v19  ;;  %v1801_v19 = vld [vmem:[#allocation2 + $0x1] sm:$0xff] }
 0x24c   : > { %v1234_v11 = vadd.f32 %v1233_v9, %v1232_v5  ;;  %v14073_v5 = vld [vmem:[%s17060_s6 + $0x8] sm:$0xf] }
 0x24e   : > { %v1236_v14 = vadd.f32 %v1235_v12, %v1234_v11  ;;  %v14083_v12 = vld [vmem:[%s17243_s2] ss:$0 sm:$0xff] }
 0x250   : > { %v1238_v22 = vadd.f32 %v1237_v21, %v1236_v14 }
 0x252   : > { %v1240_v51 = vadd.f32 %v1239_v62, %v1238_v22  ;;  %v14096_v62 = vld [vmem:[%s17059_s5] ss:$0 sm:$0xff] }
 0x254   : > { %v1242_v27 = vadd.f32 %v1241_v25, %v1240_v51 }
 0x256   : > { %v1243_v34 = vrot.slane %v1242_v27, 4 }
 0x258   : > { %v1244_v36 = vadd.f32 %v1243_v34, %v1242_v27 }
 0x25a   : > { %v1245_v63 = vrot.slane %v1244_v36, 2 }
 0x25c   : > { %v1246_v38 = vadd.f32 %v1245_v63, %v1244_v36 }
 0x25e   : > { %v1247_v40 = vrot.slane %v1246_v38, 1 }
 0x260   : > { %v1248_v42 = vadd.f32 %v1247_v40, %v1246_v38 }
 0x262   : > { %v1249_v44 = vmul.f32 0.00390625, %v1248_v42 }
 0x264   : > { %11478 = vmatmul.mubr.msk.f32.vlgmr.msra.gmra.mrb[4].mxu0 %vm884_vm1, %v1249_v44 }
 0x265   : > { %11486 = vmatpush3.msk.msra.mxu0 %vm959_vm3, %v10109_v1  ;;  %11487 = vmatprep.mubr.msk.f32.mxu0 %vm884_vm1, %v1801_v19 }
 0x266   : > { %11535 = vmatprep.subr.msk.mxu0 %vm959_vm3, %v1800_v17 }
 0x268   : > { %11488 = vmatmul.mubr.msk.f32.vlgmr.msra.gmra.mrb[6].mxu0 %vm884_vm1, %v1802_v2 }
 0x269   : > { %11536 = vmatpush3.msk.msra.mxu0 %vm959_vm3, %v1800_v17 }
 0x26a   : > { %11585 = vmatprep.subr.msk.mxu0 %vm959_vm3, %v14073_v5 }
 0x337   : > { %v1319_v47 = vpop.f32.mrb[4].mxu0 }
 0x338   : > { %v11479_v61 = vpop.f32.mrb[5].mxu0  ;;  %11483 = vmatmul.mubr.msk.f32.vlgmr.msra.gmra.mrb[4].mxu1 %vm1034_vm5, %v1319_v47 }
 0x339   : > { %11937 = vmatprep.mubr.msk.f32.mxu1 %vm13393_vm0, %v17075_v6 }
 0x40b   : > { %v1392_v4 = vpop.f32.mrb[4].mxu1 }
 0x40c   : > { %v1393_v23 = vadd.f32 1e-05, %v1392_v4  ;;  %v11484_v9 = vpop.f32.mrb[5].mxu1 }
 0x40e   : > { %13092 = vrsqrt.f32 %v1393_v23 }
 0x418   : > { %v13093_v11 = vpop.eup %13092 }
 0x419   : > { %v14078_v59 = vrot.slane %v13093_v11, %v13743_v48 }
 0x41b   : > { %v1428_v14 = vmul.f32 %v14078_v59, %v13931_v37  ;;  %v1429_v15 = vmul.f32 %v14078_v59, %v13938_v41  ;;  %v1430_v21 = vmul.f32 %v14078_v59, %v13945_v45  ;;  %v1431_v22 = vmul.f32 %v14078_v59, %v13952_v50 }
 0x41c   : > { %v1432_v51 = vmul.f32 %v14078_v59, %v13959_v54  ;;  %v1401_v37 = vmul.f32 %v14078_v59, %v13750_v53  ;;  %v1402_v36 = vmul.f32 %v14078_v59, %v13754_v56  ;;  %v1403_v54 = vmul.f32 %v14078_v59, %v13758_v57 }
 0x41d   : > { %v1467_v25 = vmul.f32 %v14083_v12, %v1428_v14  ;;  %v1468_v41 = vmul.f32 %v14083_v12, %v1429_v15  ;;  %v1469_v45 = vmul.f32 %v14083_v12, %v1430_v21  ;;  %v1470_v27 = vmul.f32 %v14083_v12, %v1431_v22 }
 0x41e   : > { %v1471_v50 = vmul.f32 %v14083_v12, %v1432_v51  ;;  %v1440_v34 = vmul.f32 %v14083_v12, %v1401_v37  ;;  %v1441_v57 = vmul.f32 %v14083_v12, %v1402_v36  ;;  %v1442_v44 = vmul.f32 %v14083_v12, %v1403_v54 }
 0x41f   : > { %v14113_v53 = vadd.f32 %v14096_v62, %v1467_v25  ;;  %v14116_v63 = vadd.f32 %v14096_v62, %v1468_v41  ;;  %v14119_v38 = vadd.f32 %v14096_v62, %v1469_v45  ;;  %v14122_v40 = vadd.f32 %v14096_v62, %v1470_v27 }
 0x420   : > { %v14125_v42 = vadd.f32 %v14096_v62, %v1471_v50  ;;  %v14128_v56 = vadd.f32 %v14096_v62, %v1440_v34  ;;  %v1404_v17 = vmul.f32 %v14078_v59, %v13762_v60  ;;  %v14141_v23 = vadd.f32 %v14096_v62, %v1441_v57 }
 0x421   : > { %v10104_v47 = vmul.f32 -1.442695, %v14113_v53  ;;  %v10105_v61 = vmul.f32 -1.442695, %v14116_v63  ;;  %v10106_v1 = vmul.f32 -1.442695, %v14119_v38  ;;  %v14144_v9 = vadd.f32 %v14096_v62, %v1442_v44 }
 0x422   : > { %v10107_v19 = vmul.f32 -1.442695, %v14122_v40  ;;  %v10108_v2 = vmul.f32 -1.442695, %v14125_v42  ;;  %v10077_v4 = vmul.f32 -1.442695, %v14128_v56  ;;  %v1443_v11 = vmul.f32 %v14083_v12, %v1404_v17 }
 0x423   : > { %13094 = vpow2.f32 %v10104_v47  ;;  %v1405_v14 = vmul.f32 %v14078_v59, %v13770_v16  ;;  %v10078_v60 = vmul.f32 -1.442695, %v14141_v23  ;;  %v1406_v15 = vmul.f32 %v14078_v59, %v13776_v18 }
 0x424   : > { %13096 = vpow2.f32 %v10105_v61  ;;  %v1407_v21 = vmul.f32 %v14078_v59, %v13784_v8  ;;  %v10079_v22 = vmul.f32 -1.442695, %v14144_v9  ;;  %v14156_v51 = vadd.f32 %v14096_v62, %v1443_v11 }
 0x425   : > { %13098 = vpow2.f32 %v10106_v1  ;;  %v1444_v37 = vmul.f32 %v14083_v12, %v1405_v14  ;;  %v1445_v16 = vmul.f32 %v14083_v12, %v1406_v15  ;;  %v1408_v41 = vmul.f32 %v14078_v59, %v13791_v26 }
 0x426   : > { %13100 = vpow2.f32 %v10107_v19  ;;  %v1446_v25 = vmul.f32 %v14083_v12, %v1407_v21  ;;  %v10080_v18 = vmul.f32 -1.442695, %v14156_v51  ;;  %v1409_v45 = vmul.f32 %v14078_v59, %v13798_v29 }
 0x427   : > { %13102 = vpow2.f32 %v10108_v2  ;;  %v14165_v8 = vadd.f32 %v14096_v62, %v1444_v37  ;;  %v14170_v27 = vadd.f32 %v14096_v62, %v1445_v16  ;;  %v1447_v34 = vmul.f32 %v14083_v12, %v1408_v41 }
 0x428   : > { %13104 = vpow2.f32 %v10077_v4  ;;  %v14173_v50 = vadd.f32 %v14096_v62, %v1446_v25  ;;  %v1448_v36 = vmul.f32 %v14083_v12, %v1409_v45  ;;  %v1410_v54 = vmul.f32 %v14078_v59, %v13805_v32 }
 0x429   : > { %13106 = vpow2.f32 %v10078_v60  ;;  %v10081_v26 = vmul.f32 -1.442695, %v14165_v8  ;;  %v10082_v29 = vmul.f32 -1.442695, %v14170_v27  ;;  %v14183_v44 = vadd.f32 %v14096_v62, %v1447_v34 }
 0x42a   : > { %13108 = vpow2.f32 %v10079_v22  ;;  %v10083_v57 = vmul.f32 -1.442695, %v14173_v50  ;;  %v14186_v47 = vadd.f32 %v14096_v62, %v1448_v36  ;;  %v1411_v61 = vmul.f32 %v14078_v59, %v13812_v35 }
 0x42b   : > { %13110 = vpow2.f32 %v10080_v18  ;;  %v10084_v1 = vmul.f32 -1.442695, %v14183_v44  ;;  %v1449_v32 = vmul.f32 %v14083_v12, %v1410_v54  ;;  %v1412_v17 = vmul.f32 %v14078_v59, %v13819_v39 }
 0x42c   : > { %13112 = vpow2.f32 %v10081_v26  ;;  %v1413_v2 = vmul.f32 %v14078_v59, %v13826_v43  ;;  %v1450_v14 = vmul.f32 %v14083_v12, %v1411_v61  ;;  %v14199_v39 = vmul.f32 -1.442695, %v14186_v47 }
 0x42d   : > { %v13095_v19 = vpop.eup %13094  ;;  %13114 = vpow2.f32 %v10082_v29  ;;  %v1451_v35 = vmul.f32 %v14083_v12, %v1412_v17  ;;  %v14202_v37 = vadd.f32 %v14096_v62, %v1449_v32  ;;  %v1414_v41 = vmul.f32 %v14078_v59, %v13833_v46 }
 0x42e   : > { %v13097_v4 = vpop.eup %13096  ;;  %v1634_v11 = vadd.f32 1.0, %v13095_v19  ;;  %13116 = vpow2.f32 %v10083_v57  ;;  %v1452_v25 = vmul.f32 %v14083_v12, %v1413_v2  ;;  %v14208_v34 = vadd.f32 %v14096_v62, %v1450_v14 }
 0x42f   : > { %v13099_v60 = vpop.eup %13098  ;;  %v1635_v15 = vadd.f32 1.0, %v13097_v4  ;;  %13118 = vpow2.f32 %v10084_v1  ;;  %v14211_v26 = vadd.f32 %v14096_v62, %v1451_v35  ;;  %v1453_v29 = vmul.f32 %v14083_v12, %v1414_v41 }
 0x430   : > { %v13101_v21 = vpop.eup %13100  ;;  %v1636_v22 = vadd.f32 1.0, %v13099_v60  ;;  %13120 = vrcp.f32 %v1634_v11  ;;  %v1415_v57 = vmul.f32 %v14078_v59, %v13840_v49  ;;  %v1416_v1 = vmul.f32 %v14078_v59, %v13847_v52 }
 0x431   : > { %v13103_v43 = vpop.eup %13102  ;;  %v1637_v16 = vadd.f32 1.0, %v13101_v21  ;;  %13122 = vrcp.f32 %v1635_v15  ;;  %v1417_v32 = vmul.f32 %v14078_v59, %v13854_v55  ;;  %v10086_v2 = vmul.f32 -1.442695, %v14202_v37 }
 0x432   : > { %v13105_v18 = vpop.eup %13104  ;;  %v1638_v45 = vadd.f32 1.0, %v13103_v43  ;;  %13124 = vrcp.f32 %v1636_v22  ;;  %v14222_v4 = vadd.f32 %v14096_v62, %v1452_v25  ;;  %v14225_v14 = vadd.f32 %v14096_v62, %v1453_v29 }
 0x433   : > { %v13107_v36 = vpop.eup %13106  ;;  %13126 = vrcp.f32 %v1637_v16  ;;  %v1607_v54 = vadd.f32 1.0, %v13105_v18  ;;  %v1454_v35 = vmul.f32 %v14083_v12, %v1415_v57  ;;  %v10087_v55 = vmul.f32 -1.442695, %v14208_v34 }
 0x434   : > { %v13109_v61 = vpop.eup %13108  ;;  %13128 = vrcp.f32 %v1638_v45  ;;  %v1608_v46 = vadd.f32 1.0, %v13107_v36  ;;  %v10088_v15 = vmul.f32 -1.442695, %v14211_v26  ;;  %v1455_v43 = vmul.f32 %v14083_v12, %v1416_v1 }
 0x435   : > { %v13111_v17 = vpop.eup %13110  ;;  %13130 = vrcp.f32 %v1607_v54  ;;  %v1609_v19 = vadd.f32 1.0, %v13109_v61  ;;  %v1456_v16 = vmul.f32 %v14083_v12, %v1417_v32  ;;  %v10089_v18 = vmul.f32 -1.442695, %v14222_v4 }
 0x436   : > { %v13113_v11 = vpop.eup %13112  ;;  %13132 = vrcp.f32 %v1608_v46  ;;  %v1610_v49 = vadd.f32 1.0, %v13111_v17  ;;  %v1418_v45 = vmul.f32 %v14078_v59, %v13861_v58  ;;  %v10090_v29 = vmul.f32 -1.442695, %v14225_v14 }
 0x437   : > { %v13115_v52 = vpop.eup %13114  ;;  %13134 = vrcp.f32 %v1609_v19  ;;  %v1611_v60 = vadd.f32 1.0, %v13113_v11  ;;  %v14239_v57 = vadd.f32 %v14096_v62, %v1454_v35  ;;  %v1419_v1 = vmul.f32 %v14078_v59, %v13868_v0 }
 0x438   : > { %v13117_v21 = vpop.eup %13116  ;;  %13136 = vrcp.f32 %v1610_v49  ;;  %v1612_v22 = vadd.f32 1.0, %v13115_v52  ;;  %v1457_v46 = vmul.f32 %v14083_v12, %v1418_v45  ;;  %v1420_v58 = vmul.f32 %v14078_v59, %v13875_v3 }
 0x439   : > { %v13119_v25 = vpop.eup %13118  ;;  %13138 = vrcp.f32 %v1611_v60  ;;  %v1613_v41 = vadd.f32 1.0, %v13117_v21  ;;  %v14249_v17 = vadd.f32 %v14096_v62, %v1455_v43  ;;  %v14252_v19 = vadd.f32 %v14096_v62, %v1456_v16 }
 0x43a   : > { %v14235_v36 = vpop.eup %13120  ;;  %13140 = vrcp.f32 %v1612_v22  ;;  %v1614_v54 = vadd.f32 1.0, %v13119_v25  ;;  %v1421_v11 = vmul.f32 %v14078_v59, %v13882_v7  ;;  %v14261_v0 = vadd.f32 %v14096_v62, %v1457_v46 }
 0x43b   : > { %v14241_v61 = vpop.eup %13122  ;;  %13142 = vrcp.f32 %v1613_v41  ;;  %v1458_v3 = vmul.f32 %v14083_v12, %v1419_v1  ;;  %v1459_v21 = vmul.f32 %v14083_v12, %v1420_v58  ;;  %v10093_v41 = vmul.f32 -1.442695, %v14252_v19 }
 0x43c   : > { %v13125_v32 = vpop.eup %13124  ;;  %13144 = vrcp.f32 %v1614_v54  ;;  %v1460_v7 = vmul.f32 %v14083_v12, %v1421_v11  ;;  %v10094_v54 = vmul.f32 -1.442695, %v14261_v0 }
 0x43d   : > { %v13127_v49 = vpop.eup %13126  ;;  %v14257_v35 = vmul.f32 %v13125_v32, %v14119_v38  ;;  %13146 = vpow2.f32 %v14199_v39  ;;  %v10091_v39 = vmul.f32 -1.442695, %v14239_v57  ;;  %v14276_v43 = vadd.f32 %v14096_v62, %v1458_v3 }
 0x43e   : > { %v13129_v52 = vpop.eup %13128  ;;  %v14265_v60 = vmul.f32 %v13127_v49, %v14122_v40  ;;  %13148 = vpow2.f32 %v10086_v2  ;;  %v14285_v16 = vadd.f32 %v14096_v62, %v1459_v21  ;;  %v14294_v45 = vadd.f32 %v14096_v62, %v1460_v7 }
 0x43f   : > { %17244 = vst [vmem:[#allocation6_spill] sm:$0xff] %v14257_v35  ;;  %v13131_v22 = vpop.eup %13130  ;;  %v14270_v38 = vmul.f32 %v13129_v52, %v14125_v42  ;;  %1765 = vst.msk [vmem:[#allocation2 + $0x171] sm:$0xff] %vm884_vm1, %v14257_v35  ;;  %13150 = vpow2.f32 %v10087_v55  ;;  %v10092_v42 = vmul.f32 -1.442695, %v14249_v17 }
 0x440   : > { %17245 = vst [vmem:[#allocation7_spill] sm:$0xff] %v14265_v60  ;;  %v13133_v40 = vpop.eup %13132  ;;  %1766 = vst.msk [vmem:[#allocation2 + $0x181] sm:$0xff] %vm884_vm1, %v14265_v60  ;;  %v14281_v2 = vmul.f32 %v13131_v22, %v14128_v56  ;;  %13152 = vpow2.f32 %v10088_v15  ;;  %v10097_v32 = vmul.f32 -1.442695, %v14294_v45  ;;  %v1424_v22 = vmul.f32 %v14078_v59, %v13903_v20  ;;  %v14675_v60 = vld [vmem:[%s17060_s6 + $0x10] sm:$0xf] }
 0x441   : > { %17246 = vst [vmem:[#allocation8_spill] sm:$0xff] %v14270_v38  ;;  %v13135_v25 = vpop.eup %13134  ;;  %1767 = vst.msk [vmem:[#allocation2 + $0x189] sm:$0xff] %vm884_vm1, %v14270_v38  ;;  %v14290_v55 = vmul.f32 %v13133_v40, %v14141_v23  ;;  %13154 = vpow2.f32 %v10089_v18  ;;  %v10095_v18 = vmul.f32 -1.442695, %v14276_v43  ;;  %v14349_v20 = vmul.f32 %v14241_v61, %v14116_v63  ;;  %v2484_v38 = vld [vmem:[#allocation2 + $0xa] sm:$0xff] }
 0x442   : > { %v13137_v56 = vpop.eup %13136  ;;  %1736 = vst.msk [vmem:[#allocation2 + $0x19] sm:$0xff] %vm884_vm1, %v14281_v2  ;;  %v14299_v15 = vmul.f32 %v13135_v25, %v14144_v9  ;;  %13156 = vpow2.f32 %v10090_v29  ;;  %v10096_v29 = vmul.f32 -1.442695, %v14285_v16 }
 0x443   : > { %v13139_v46 = vpop.eup %13138  ;;  %1737 = vst.msk [vmem:[#allocation2 + $0x21] sm:$0xff] %vm884_vm1, %v14290_v55  ;;  %v14305_v23 = vmul.f32 %v13137_v56, %v14156_v51  ;;  %13158 = vpow2.f32 %v10091_v39  ;;  %17247 = vst [vmem:[#allocation9_spill] sm:$0xff] %v14349_v20 }
 0x444   : > { %v13141_v1 = vpop.eup %13140  ;;  %1738 = vst.msk [vmem:[#allocation2 + $0x31] sm:$0xff] %vm884_vm1, %v14299_v15  ;;  %v14311_v9 = vmul.f32 %v13139_v46, %v14165_v8  ;;  %13160 = vpow2.f32 %v10092_v42  ;;  %1764 = vst.msk [vmem:[#allocation2 + $0x169] sm:$0xff] %vm884_vm1, %v14349_v20 }
 0x445   : > { %v13143_v58 = vpop.eup %13142  ;;  %1739 = vst.msk [vmem:[#allocation2 + $0x39] sm:$0xff] %vm884_vm1, %v14305_v23  ;;  %v14317_v51 = vmul.f32 %v13141_v1, %v14170_v27  ;;  %13162 = vpow2.f32 %v10093_v41  ;;  %v1422_v27 = vmul.f32 %v14078_v59, %v13889_v10  ;;  %v1426_v41 = vmul.f32 %v14078_v59, %v13917_v28 }
 0x446   : > { %v13145_v11 = vpop.eup %13144  ;;  %1740 = vst.msk [vmem:[#allocation2 + $0x49] sm:$0xff] %vm884_vm1, %v14311_v9  ;;  %v14323_v8 = vmul.f32 %v13143_v58, %v14173_v50  ;;  %13164 = vpow2.f32 %v10094_v54  ;;  %v1423_v50 = vmul.f32 %v14078_v59, %v13896_v13  ;;  %v14345_v13 = vmul.f32 %v14235_v36, %v14113_v53 }
 0x447   : > { %v13147_v49 = vpop.eup %13146  ;;  %1741 = vst.msk [vmem:[#allocation2 + $0x51] sm:$0xff] %vm884_vm1, %v14317_v51  ;;  %v14328_v3 = vmul.f32 %v13145_v11, %v14183_v44  ;;  %13166 = vpow2.f32 %v10095_v18  ;;  %v1425_v44 = vmul.f32 %v14078_v59, %v13910_v24  ;;  %v1461_v46 = vmul.f32 %v14083_v12, %v1422_v27 }
 0x448   : > { %v13149_v52 = vpop.eup %13148  ;;  %1742 = vst.msk [vmem:[#allocation2 + $0x61] sm:$0xff] %vm884_vm1, %v14323_v8  ;;  %v1615_v21 = vadd.f32 1.0, %v13147_v49  ;;  %13168 = vpow2.f32 %v10096_v29  ;;  %v1427_v53 = vmul.f32 %v14078_v59, %v13924_v33  ;;  %v1462_v36 = vmul.f32 %v14083_v12, %v1423_v50  ;;  %1763 = vst.msk [vmem:[#allocation2 + $0x159] sm:$0xff] %vm884_vm1, %v14345_v13 }
 0x449   : > { %v13151_v7 = vpop.eup %13150  ;;  %v1803_v39 = vld [vmem:[#allocation2 + $0x19] sm:$0xff]  ;;  %1743 = vst.msk [vmem:[#allocation2 + $0x69] sm:$0xff] %vm884_vm1, %v14328_v3  ;;  %v1616_v10 = vadd.f32 1.0, %v13149_v52  ;;  %13170 = vpow2.f32 %v10097_v32  ;;  %v1463_v1 = vmul.f32 %v14083_v12, %v1424_v22  ;;  %v1464_v59 = vmul.f32 %v14083_v12, %v1425_v44 }
 0x44a   : > { %v13153_v40 = vpop.eup %13152  ;;  %11490 = vmatprep.mubr.msk.f32.mxu0 %vm884_vm1, %v1803_v39  ;;  %v1804_v42 = vld [vmem:[#allocation2 + $0x21] sm:$0xff]  ;;  %13172 = vrcp.f32 %v1615_v21  ;;  %v1617_v25 = vadd.f32 1.0, %v13151_v7  ;;  %v1465_v11 = vmul.f32 %v14083_v12, %v1426_v41  ;;  %v14368_v52 = vadd.f32 %v14096_v62, %v1461_v46 }
 0x44b   : > { %v13155_v24 = vpop.eup %13154  ;;  %11491 = vmatmul.mubr.msk.f32.gmra.mrb[8].mxu0 %vm884_vm1, %v1804_v42  ;;  %v1805_v56 = vld [vmem:[#allocation2 + $0x31] sm:$0xff]  ;;  %13174 = vrcp.f32 %v1616_v10  ;;  %v1618_v54 = vadd.f32 1.0, %v13153_v40  ;;  %v1466_v50 = vmul.f32 %v14083_v12, %v1427_v53  ;;  %v14373_v22 = vadd.f32 %v14096_v62, %v1462_v36  ;;  %v14678_v35 = vld [vmem:[#allocation2 + $0x1a] sm:$0xff] }
 0x44c   : > { %v13157_v18 = vpop.eup %13156  ;;  %11493 = vmatprep.mubr.msk.f32.mxu0 %vm884_vm1, %v1805_v56  ;;  %13176 = vrcp.f32 %v1617_v25  ;;  %v1619_v63 = vadd.f32 1.0, %v13155_v24  ;;  %v1806_v58 = vld [vmem:[#allocation2 + $0x39] sm:$0xff]  ;;  %v14376_v10 = vadd.f32 %v14096_v62, %v1463_v1  ;;  %v14379_v24 = vadd.f32 %v14096_v62, %v1464_v59  ;;  %17257 = vst [vmem:[#allocation19_spill] sm:$0xff] %v14678_v35 }
 0x44d   : > { %v13159_v28 = vpop.eup %13158  ;;  %13178 = vrcp.f32 %v1618_v54  ;;  %v1620_v61 = vadd.f32 1.0, %v13157_v18  ;;  %v1807_v49 = vld [vmem:[#allocation2 + $0x49] sm:$0xff]  ;;  %v10098_v54 = vmul.f32 -1.442695, %v14368_v52  ;;  %v14384_v46 = vadd.f32 %v14096_v62, %v1465_v11  ;;  %v14690_v20 = vld [vmem:[#allocation2 + $0x32] sm:$0xff] }
 0x44e   : > { %v13161_v29 = vpop.eup %13160  ;;  %13180 = vrcp.f32 %v1619_v63  ;;  %v1621_v33 = vadd.f32 1.0, %v13159_v28  ;;  %v1808_v42 = vld [vmem:[#allocation2 + $0x51] sm:$0xff]  ;;  %v10099_v63 = vmul.f32 -1.442695, %v14373_v22  ;;  %v14389_v36 = vadd.f32 %v14096_v62, %v1466_v50  ;;  %17259 = vst [vmem:[#allocation21_spill] sm:$0xff] %v14690_v20 }
 0x44f   : > { %v13163_v32 = vpop.eup %13162  ;;  %11494 = vmatmul.mubr.msk.f32.gmra.mrb[10].mxu0 %vm884_vm1, %v1806_v58  ;;  %13182 = vrcp.f32 %v1620_v61  ;;  %v1622_v27 = vadd.f32 1.0, %v13161_v29  ;;  %v1809_v41 = vld [vmem:[#allocation2 + $0x61] sm:$0xff]  ;;  %v10100_v1 = vmul.f32 -1.442695, %v14376_v10  ;;  %v10101_v59 = vmul.f32 -1.442695, %v14379_v24 }
 0x450   : > { %v13165_v21 = vpop.eup %13164  ;;  %11496 = vmatprep.mubr.msk.f32.mxu0 %vm884_vm1, %v1807_v49  ;;  %13184 = vrcp.f32 %v1621_v33  ;;  %v1623_v7 = vadd.f32 1.0, %v13163_v32  ;;  %v1810_v58 = vld [vmem:[#allocation2 + $0x69] sm:$0xff]  ;;  %v10103_v49 = vmul.f32 -1.442695, %v14389_v36 }
 0x451   : > { %v13167_v44 = vpop.eup %13166  ;;  %13186 = vrcp.f32 %v1622_v27  ;;  %v1624_v39 = vadd.f32 1.0, %v13165_v21 }
 0x452   : > { %v13169_v40 = vpop.eup %13168  ;;  %13188 = vrcp.f32 %v1623_v7  ;;  %v1625_v25 = vadd.f32 1.0, %v13167_v44 }
 0x453   : > { %v13171_v12 = vpop.eup %13170  ;;  %11497 = vmatmul.mubr.msk.f32.gmra.mrb[12].mxu0 %vm884_vm1, %v1808_v42  ;;  %13190 = vrcp.f32 %v1624_v39  ;;  %v1626_v56 = vadd.f32 1.0, %v13169_v40 }
 0x454   : > { %v13173_v18 = vpop.eup %13172  ;;  %11499 = vmatprep.mubr.msk.f32.mxu0 %vm884_vm1, %v1809_v41  ;;  %13192 = vrcp.f32 %v1625_v25  ;;  %v1627_v53 = vadd.f32 1.0, %v13171_v12 }
 0x455   : > { %v13175_v28 = vpop.eup %13174  ;;  %v14392_v61 = vmul.f32 %v13173_v18, %v14186_v47  ;;  %13194 = vrcp.f32 %v1626_v56  ;;  %v10102_v47 = vmul.f32 -1.442695, %v14384_v46 }
 0x456   : > { %v13177_v29 = vpop.eup %13176  ;;  %v14396_v33 = vmul.f32 %v13175_v28, %v14202_v37  ;;  %13196 = vrcp.f32 %v1627_v53 }
 0x457   : > { %v13179_v32 = vpop.eup %13178  ;;  %11500 = vmatmul.mubr.msk.f32.gmra.mrb[14].mxu0 %vm884_vm1, %v1810_v58  ;;  %1744 = vst.msk [vmem:[#allocation2 + $0x79] sm:$0xff] %vm884_vm1, %v14392_v61  ;;  %v14403_v62 = vmul.f32 %v13177_v29, %v14208_v34  ;;  %13198 = vpow2.f32 %v10098_v54 }
 0x458   : > { %v13181_v11 = vpop.eup %13180  ;;  %1745 = vst.msk [vmem:[#allocation2 + $0x81] sm:$0xff] %vm884_vm1, %v14396_v33  ;;  %v14409_v37 = vmul.f32 %v13179_v32, %v14211_v26  ;;  %13200 = vpow2.f32 %v10099_v63 }
 0x459   : > { %v13183_v27 = vpop.eup %13182  ;;  %1746 = vst.msk [vmem:[#allocation2 + $0x91] sm:$0xff] %vm884_vm1, %v14403_v62  ;;  %v14415_v34 = vmul.f32 %v13181_v11, %v14222_v4  ;;  %13202 = vpow2.f32 %v10100_v1 }
 0x45a   : > { %v13185_v21 = vpop.eup %13184  ;;  %1747 = vst.msk [vmem:[#allocation2 + $0x99] sm:$0xff] %vm884_vm1, %v14409_v37  ;;  %v14420_v50 = vmul.f32 %v13183_v27, %v14225_v14  ;;  %13204 = vpow2.f32 %v10101_v59 }
 0x45b   : > { %v13187_v26 = vpop.eup %13186  ;;  %1748 = vst.msk [vmem:[#allocation2 + $0xa9] sm:$0xff] %vm884_vm1, %v14415_v34  ;;  %v14425_v7 = vmul.f32 %v13185_v21, %v14239_v57  ;;  %13206 = vpow2.f32 %v10102_v47 }
 0x45c   : > { %v13189_v44 = vpop.eup %13188  ;;  %1749 = vst.msk [vmem:[#allocation2 + $0xb1] sm:$0xff] %vm884_vm1, %v14420_v50  ;;  %v14430_v4 = vmul.f32 %v13187_v26, %v14249_v17  ;;  %13208 = vpow2.f32 %v10103_v49 }
 0x45d   : > { %v13191_v39 = vpop.eup %13190  ;;  %1750 = vst.msk [vmem:[#allocation2 + $0xc1] sm:$0xff] %vm884_vm1, %v14425_v7  ;;  %v14435_v14 = vmul.f32 %v13189_v44, %v14252_v19 }
 0x45e   : > { %v13193_v40 = vpop.eup %13192  ;;  %v1811_v42 = vld [vmem:[#allocation2 + $0x79] sm:$0xff]  ;;  %1751 = vst.msk [vmem:[#allocation2 + $0xc9] sm:$0xff] %vm884_vm1, %v14430_v4  ;;  %v14440_v57 = vmul.f32 %v13191_v39, %v14261_v0 }
 0x45f   : > { %v13195_v25 = vpop.eup %13194  ;;  %11502 = vmatprep.mubr.msk.f32.mxu0 %vm884_vm1, %v1811_v42  ;;  %v1812_v17 = vld [vmem:[#allocation2 + $0x81] sm:$0xff]  ;;  %1752 = vst.msk [vmem:[#allocation2 + $0xd9] sm:$0xff] %vm884_vm1, %v14435_v14  ;;  %v14446_v12 = vmul.f32 %v13193_v40, %v14276_v43 }
 0x460   : > { %v13197_v19 = vpop.eup %13196  ;;  %11503 = vmatmul.mubr.msk.f32.gmra.mrb[16].mxu0 %vm884_vm1, %v1812_v17  ;;  %v1813_v41 = vld [vmem:[#allocation2 + $0x91] sm:$0xff]  ;;  %1753 = vst.msk [vmem:[#allocation2 + $0xe1] sm:$0xff] %vm884_vm1, %v14440_v57  ;;  %v14452_v0 = vmul.f32 %v13195_v25, %v14285_v16 }
 0x461   : > { %v13199_v56 = vpop.eup %13198  ;;  %11505 = vmatprep.mubr.msk.f32.mxu0 %vm884_vm1, %v1813_v41  ;;  %1754 = vst.msk [vmem:[#allocation2 + $0xf1] sm:$0xff] %vm884_vm1, %v14446_v12  ;;  %v14458_v54 = vmul.f32 %v13197_v19, %v14294_v45  ;;  %v1814_v63 = vld [vmem:[#allocation2 + $0x99] sm:$0xff] }
 0x462   : > { %v13201_v43 = vpop.eup %13200  ;;  %1755 = vst.msk [vmem:[#allocation2 + $0xf9] sm:$0xff] %vm884_vm1, %v14452_v0  ;;  %v1628_v18 = vadd.f32 1.0, %v13199_v56  ;;  %v1815_v1 = vld [vmem:[#allocation2 + $0xa9] sm:$0xff] }
 0x463   : > { %v13203_v53 = vpop.eup %13202  ;;  %1756 = vst.msk [vmem:[#allocation2 + $0x109] sm:$0xff] %vm884_vm1, %v14458_v54  ;;  %v1629_v16 = vadd.f32 1.0, %v13201_v43  ;;  %v1816_v47 = vld [vmem:[#allocation2 + $0xb1] sm:$0xff] }
 0x464   : > { %v13205_v28 = vpop.eup %13204  ;;  %11506 = vmatmul.mubr.msk.f32.gmra.mrb[18].mxu0 %vm884_vm1, %v1814_v63  ;;  %13210 = vrcp.f32 %v1628_v18  ;;  %v1630_v29 = vadd.f32 1.0, %v13203_v53  ;;  %v1817_v49 = vld [vmem:[#allocation2 + $0xc1] sm:$0xff] }
 0x465   : > { %v13207_v58 = vpop.eup %13206  ;;  %11508 = vmatprep.mubr.msk.f32.mxu0 %vm884_vm1, %v1815_v1  ;;  %13212 = vrcp.f32 %v1629_v16  ;;  %v1631_v45 = vadd.f32 1.0, %v13205_v28  ;;  %v1818_v27 = vld [vmem:[#allocation2 + $0xc9] sm:$0xff]  ;;  %v14528_v1 = vld [vmem:[#allocation2 + $0x159] sm:$0xff] }
 0x466   : > { %v13209_v59 = vpop.eup %13208  ;;  %13214 = vrcp.f32 %v1630_v29  ;;  %v1632_v32 = vadd.f32 1.0, %v13207_v58  ;;  %v1819_v21 = vld [vmem:[#allocation2 + $0xd9] sm:$0xff]  ;;  %17254 = vst [vmem:[#allocation16_spill] sm:$0xff] %v14528_v1  ;;  %v14532_v29 = vld [vmem:[#allocation2 + $0x169] sm:$0xff] }
 0x467   : > { %13216 = vrcp.f32 %v1631_v45  ;;  %v1633_v11 = vadd.f32 1.0, %v13209_v59  ;;  %v1820_v39 = vld [vmem:[#allocation2 + $0xe1] sm:$0xff]  ;;  %17255 = vst [vmem:[#allocation17_spill] sm:$0xff] %v14532_v29  ;;  %v14536_v45 = vld [vmem:[#allocation2 + $0x171] sm:$0xff] }
 0x468   : > { %11509 = vmatmul.mubr.msk.f32.gmra.mrb[20].mxu0 %vm884_vm1, %v1816_v47  ;;  %13218 = vrcp.f32 %v1632_v32  ;;  %v1821_v25 = vld [vmem:[#allocation2 + $0xf1] sm:$0xff]  ;;  %v1768_v58 = vld [vmem:[#allocation2] sm:$0xff]  ;;  %17256 = vst [vmem:[#allocation18_spill] sm:$0xff] %v14536_v45  ;;  %v1769_v59 = vld [vmem:[#allocation2 + $0x8] sm:$0xff] }
 0x469   : > { %11511 = vmatprep.mubr.msk.f32.mxu0 %vm884_vm1, %v1817_v49  ;;  %13220 = vrcp.f32 %v1633_v11  ;;  %v1822_v18 = vld [vmem:[#allocation2 + $0xf9] sm:$0xff]  ;;  %v14544_v32 = vld [vmem:[%s17060_s6 + $0xc] sm:$0xf]  ;;  %v14559_v49 = vld [vmem:[#allocation2 + $0x30] sm:$0xff] }
 0x46a   : > { %v1823_v53 = vld [vmem:[#allocation2 + $0x109] sm:$0xff]  ;;  %v14547_v47 = vld [vmem:[#allocation2 + $0x18] sm:$0xff]  ;;  %v14555_v11 = vld [vmem:[#allocation2 + $0x20] sm:$0xff] }
 0x46b   : > { %v14623_v6 = vld [vmem:[#allocation2 + $0xf0] sm:$0xff]  ;;  %v14627_v31 = vld [vmem:[#allocation2 + $0xf8] sm:$0xff]  ;;  %v14631_v30 = vld [vmem:[#allocation2 + $0x108] sm:$0xff] }
 0x46c   : > { %11512 = vmatmul.mubr.msk.f32.gmra.mrb[22].mxu0 %vm884_vm1, %v1818_v27  ;;  %v14563_v27 = vld [vmem:[#allocation2 + $0x38] sm:$0xff] }
 0x46d   : > { %11514 = vmatprep.mubr.msk.f32.mxu0 %vm884_vm1, %v1819_v21  ;;  %v14571_v21 = vld [vmem:[#allocation2 + $0x50] sm:$0xff] }
 0x46e   : > { %v13211_v26 = vpop.eup %13210 }
 0x46f   : > { %v13213_v44 = vpop.eup %13212  ;;  %v14471_v40 = vmul.f32 %v13211_v26, %v14368_v52  ;;  %v14575_v26 = vld [vmem:[#allocation2 + $0x60] sm:$0xff] }
 0x470   : > { %v13215_v42 = vpop.eup %13214  ;;  %11515 = vmatmul.mubr.msk.f32.gmra.mrb[24].mxu0 %vm884_vm1, %v1820_v39  ;;  %v14475_v17 = vmul.f32 %v13213_v44, %v14373_v22  ;;  %v14579_v44 = vld [vmem:[#allocation2 + $0x68] sm:$0xff]  ;;  %v14583_v39 = vld [vmem:[#allocation2 + $0x78] sm:$0xff] }
 0x471   : > { %v13217_v19 = vpop.eup %13216  ;;  %11517 = vmatprep.mubr.msk.f32.mxu0 %vm884_vm1, %v1821_v25  ;;  %1757 = vst.msk [vmem:[#allocation2 + $0x111] sm:$0xff] %vm884_vm1, %v14471_v40  ;;  %v14481_v41 = vmul.f32 %v13215_v42, %v14376_v10  ;;  %v14587_v42 = vld [vmem:[#allocation2 + $0x80] sm:$0xff]  ;;  %v14591_v25 = vld [vmem:[#allocation2 + $0x90] sm:$0xff] }
 0x472   : > { %v13219_v56 = vpop.eup %13218  ;;  %1758 = vst.msk [vmem:[#allocation2 + $0x121] sm:$0xff] %vm884_vm1, %v14475_v17  ;;  %v14486_v52 = vmul.f32 %v13217_v19, %v14379_v24  ;;  %v14595_v19 = vld [vmem:[#allocation2 + $0x98] sm:$0xff] }
 0x473   : > { %v13221_v43 = vpop.eup %13220  ;;  %1759 = vst.msk [vmem:[#allocation2 + $0x129] sm:$0xff] %vm884_vm1, %v14481_v41  ;;  %v14491_v22 = vmul.f32 %v13219_v56, %v14384_v46  ;;  %v14599_v56 = vld [vmem:[#allocation2 + $0xa8] sm:$0xff] }
 0x474   : > { %11518 = vmatmul.mubr.msk.f32.gmra.mrb[26].mxu0 %vm884_vm1, %v1822_v18  ;;  %1760 = vst.msk [vmem:[#allocation2 + $0x139] sm:$0xff] %vm884_vm1, %v14486_v52  ;;  %v14497_v10 = vmul.f32 %v13221_v43, %v14389_v36  ;;  %v14603_v43 = vld [vmem:[#allocation2 + $0xb0] sm:$0xff]  ;;  %v14607_v18 = vld [vmem:[#allocation2 + $0xc0] sm:$0xff] }
 0x475   : > { %11520 = vmatprep.mubr.msk.f32.mxu0 %vm884_vm1, %v1823_v53  ;;  %1761 = vst.msk [vmem:[#allocation2 + $0x141] sm:$0xff] %vm884_vm1, %v14491_v22  ;;  %v14611_v53 = vld [vmem:[#allocation2 + $0xc8] sm:$0xff] }
 0x476   : > { %1762 = vst.msk [vmem:[#allocation2 + $0x151] sm:$0xff] %vm884_vm1, %v14497_v10 }
 0x478   : > { %v14504_v24 = vld [vmem:[#allocation2 + $0x111] sm:$0xff] }
 0x479   : > { %17248 = vst [vmem:[#allocation10_spill] sm:$0xff] %v14504_v24  ;;  %11521 = vmatmul.mubr.msk.f32.gmra.mrb[28].mxu0 %vm884_vm1, %v14504_v24  ;;  %v14508_v46 = vld [vmem:[#allocation2 + $0x121] sm:$0xff]  ;;  %v14635_v48 = vld [vmem:[#allocation2 + $0x110] sm:$0xff] }
 0x47a   : > { %17249 = vst [vmem:[#allocation11_spill] sm:$0xff] %v14508_v46  ;;  %11523 = vmatprep.mubr.msk.f32.mxu0 %vm884_vm1, %v14508_v46  ;;  %v14512_v36 = vld [vmem:[#allocation2 + $0x129] sm:$0xff] }
 0x47b   : > { %17250 = vst [vmem:[#allocation12_spill] sm:$0xff] %v14512_v36  ;;  %v14516_v63 = vld [vmem:[#allocation2 + $0x139] sm:$0xff]  ;;  %v2483_v46 = vld [vmem:[#allocation2 + $0x2] sm:$0xff]  ;;  %v14667_v24 = vld [vmem:[#allocation2 + $0x170] sm:$0xff] }
 0x47c   : > { %17251 = vst [vmem:[#allocation13_spill] sm:$0xff] %v14516_v63  ;;  %v14520_v16 = vld [vmem:[#allocation2 + $0x141] sm:$0xff] }
 0x47d   : > { %11524 = vmatmul.mubr.msk.f32.gmra.mrb[30].mxu0 %vm884_vm1, %v14512_v36  ;;  %17252 = vst [vmem:[#allocation14_spill] sm:$0xff] %v14520_v16  ;;  %v14524_v28 = vld [vmem:[#allocation2 + $0x151] sm:$0xff]  ;;  %v14663_v36 = vld [vmem:[#allocation2 + $0x168] sm:$0xff] }
 0x47e   : > { %11526 = vmatprep.mubr.msk.f32.mxu0 %vm884_vm1, %v14516_v63  ;;  %17253 = vst [vmem:[#allocation15_spill] sm:$0xff] %v14524_v28  ;;  %v14659_v63 = vld [vmem:[#allocation2 + $0x158] sm:$0xff] }
 0x481   : > { %11527 = vmatmul.mubr.msk.f32.gmra.mrb[32].mxu0 %vm884_vm1, %v14520_v16  ;;  %v14655_v16 = vld [vmem:[#allocation2 + $0x150] sm:$0xff] }
 0x482   : > { %11529 = vmatprep.mubr.msk.f32.mxu0 %vm884_vm1, %v14524_v28  ;;  %v14651_v28 = vld [vmem:[#allocation2 + $0x140] sm:$0xff] }
 0x485   : > { %11530 = vmatmul.mubr.msk.f32.gmra.mrb[34].mxu0 %vm884_vm1, %v14528_v1  ;;  %v14647_v1 = vld [vmem:[#allocation2 + $0x138] sm:$0xff] }
 0x486   : > { %11532 = vmatprep.mubr.msk.f32.mxu0 %vm884_vm1, %v14532_v29  ;;  %v14643_v29 = vld [vmem:[#allocation2 + $0x128] sm:$0xff] }
 0x489   : > { %11533 = vmatmul.mubr.msk.f32.gmra.mrb[36].mxu0 %vm884_vm1, %v14536_v45  ;;  %v14639_v45 = vld [vmem:[#allocation2 + $0x120] sm:$0xff] }
 0x48a   : > { %11537 = vmatprep.mubr.msk.f32.mxu0 %vm884_vm1, %v1768_v58  ;;  %v14615_v58 = vld [vmem:[#allocation2 + $0xd8] sm:$0xff] }
 0x48d   : > { %11538 = vmatmul.mubr.msk.f32.vlgmr.msra.gmra.mrb[6].mxu0 %vm884_vm1, %v1769_v59  ;;  %v14619_v59 = vld [vmem:[#allocation2 + $0xe0] sm:$0xff] }
 0x48e   : > { %11586 = vmatpush3.msk.msra.mxu0 %vm959_vm3, %v14073_v5  ;;  %11540 = vmatprep.mubr.msk.f32.mxu0 %vm884_vm1, %v14547_v47  ;;  %v14567_v5 = vld [vmem:[#allocation2 + $0x48] sm:$0xff] }
 0x48f   : > { %11635 = vmatprep.subr.msk.mxu0 %vm959_vm3, %v14544_v32 }
 0x491   : > { %11541 = vmatmul.mubr.msk.f32.gmra.mrb[8].mxu0 %vm884_vm1, %v14555_v11 }
 0x492   : > { %11543 = vmatprep.mubr.msk.f32.mxu0 %vm884_vm1, %v14559_v49 }
 0x495   : > { %11544 = vmatmul.mubr.msk.f32.gmra.mrb[10].mxu0 %vm884_vm1, %v14563_v27 }
 0x496   : > { %11546 = vmatprep.mubr.msk.f32.mxu0 %vm884_vm1, %v14567_v5 }
 0x499   : > { %11547 = vmatmul.mubr.msk.f32.gmra.mrb[12].mxu0 %vm884_vm1, %v14571_v21 }
 0x49a   : > { %11549 = vmatprep.mubr.msk.f32.mxu0 %vm884_vm1, %v14575_v26 }
 0x49d   : > { %11550 = vmatmul.mubr.msk.f32.gmra.mrb[14].mxu0 %vm884_vm1, %v14579_v44 }
 0x49e   : > { %11552 = vmatprep.mubr.msk.f32.mxu0 %vm884_vm1, %v14583_v39 }
 0x4a1   : > { %11553 = vmatmul.mubr.msk.f32.gmra.mrb[16].mxu0 %vm884_vm1, %v14587_v42 }
 0x4a2   : > { %11555 = vmatprep.mubr.msk.f32.mxu0 %vm884_vm1, %v14591_v25 }
 0x4a5   : > { %11556 = vmatmul.mubr.msk.f32.gmra.mrb[18].mxu0 %vm884_vm1, %v14595_v19 }
 0x4a6   : > { %11558 = vmatprep.mubr.msk.f32.mxu0 %vm884_vm1, %v14599_v56 }
 0x4a9   : > { %11559 = vmatmul.mubr.msk.f32.gmra.mrb[20].mxu0 %vm884_vm1, %v14603_v43 }
 0x4aa   : > { %11561 = vmatprep.mubr.msk.f32.mxu0 %vm884_vm1, %v14607_v18 }
 0x4ad   : > { %11562 = vmatmul.mubr.msk.f32.gmra.mrb[22].mxu0 %vm884_vm1, %v14611_v53 }
 0x4ae   : > { %11564 = vmatprep.mubr.msk.f32.mxu0 %vm884_vm1, %v14615_v58 }
 0x4b1   : > { %11565 = vmatmul.mubr.msk.f32.gmra.mrb[24].mxu0 %vm884_vm1, %v14619_v59 }
 0x4b2   : > { %11567 = vmatprep.mubr.msk.f32.mxu0 %vm884_vm1, %v14623_v6 }
 0x4b5   : > { %11568 = vmatmul.mubr.msk.f32.gmra.mrb[26].mxu0 %vm884_vm1, %v14627_v31 }
 0x4b6   : > { %11570 = vmatprep.mubr.msk.f32.mxu0 %vm884_vm1, %v14631_v30 }
 0x4b9   : > { %11571 = vmatmul.mubr.msk.f32.gmra.mrb[28].mxu0 %vm884_vm1, %v14635_v48 }
 0x4ba   : > { %11573 = vmatprep.mubr.msk.f32.mxu0 %vm884_vm1, %v14639_v45 }
 0x4bd   : > { %11574 = vmatmul.mubr.msk.f32.gmra.mrb[30].mxu0 %vm884_vm1, %v14643_v29 }
 0x4be   : > { %11576 = vmatprep.mubr.msk.f32.mxu0 %vm884_vm1, %v14647_v1 }
 0x4c1   : > { %11577 = vmatmul.mubr.msk.f32.gmra.mrb[32].mxu0 %vm884_vm1, %v14651_v28 }
 0x4c2   : > { %11579 = vmatprep.mubr.msk.f32.mxu0 %vm884_vm1, %v14655_v16 }
 0x4c5   : > { %11580 = vmatmul.mubr.msk.f32.gmra.mrb[34].mxu0 %vm884_vm1, %v14659_v63 }
 0x4c6   : > { %11582 = vmatprep.mubr.msk.f32.mxu0 %vm884_vm1, %v14663_v36 }
 0x4c9   : > { %11583 = vmatmul.mubr.msk.f32.gmra.mrb[36].mxu0 %vm884_vm1, %v14667_v24 }
 0x4ca   : > { %11587 = vmatprep.mubr.msk.f32.mxu0 %vm884_vm1, %v2483_v46  ;;  %v14686_v46 = vld [vmem:[#allocation2 + $0x22] sm:$0xff] }
 0x4cb   : > { %17258 = vst [vmem:[#allocation20_spill] sm:$0xff] %v14686_v46 }
 0x4cd   : > { %11588 = vmatmul.mubr.msk.f32.vlgmr.msra.gmra.mrb[6].mxu0 %vm884_vm1, %v2484_v38  ;;  %v14694_v38 = vld [vmem:[#allocation2 + $0x3a] sm:$0xff] }
 0x4ce   : > { %11636 = vmatpush3.msk.msra.mxu0 %vm959_vm3, %v14544_v32  ;;  %11590 = vmatprep.mubr.msk.f32.mxu0 %vm884_vm1, %v14678_v35  ;;  %17260 = vst [vmem:[#allocation22_spill] sm:$0xff] %v14694_v38  ;;  %v14698_v32 = vld [vmem:[#allocation2 + $0x4a] sm:$0xff]  ;;  %v14702_v35 = vld [vmem:[#allocation2 + $0x52] sm:$0xff] }
 0x4cf   : > { %11685 = vmatprep.subr.msk.mxu0 %vm959_vm3, %v14675_v60  ;;  %17261 = vst [vmem:[#allocation23_spill] sm:$0xff] %v14698_v32  ;;  %17262 = vst [vmem:[#allocation24_spill] sm:$0xff] %v14702_v35 }
 0x4d1   : > { %11591 = vmatmul.mubr.msk.f32.gmra.mrb[8].mxu0 %vm884_vm1, %v14686_v46  ;;  %v14706_v46 = vld [vmem:[#allocation2 + $0x62] sm:$0xff] }
 0x4d2   : > { %11593 = vmatprep.mubr.msk.f32.mxu0 %vm884_vm1, %v14690_v20  ;;  %17263 = vst [vmem:[#allocation25_spill] sm:$0xff] %v14706_v46  ;;  %v14710_v20 = vld [vmem:[#allocation2 + $0x6a] sm:$0xff] }
 0x4d3   : > { %17264 = vst [vmem:[#allocation26_spill] sm:$0xff] %v14710_v20 }
 0x4d5   : > { %11594 = vmatmul.mubr.msk.f32.gmra.mrb[10].mxu0 %vm884_vm1, %v14694_v38  ;;  %v14714_v38 = vld [vmem:[#allocation2 + $0x7a] sm:$0xff] }
 0x4d6   : > { %11596 = vmatprep.mubr.msk.f32.mxu0 %vm884_vm1, %v14698_v32  ;;  %17265 = vst [vmem:[#allocation27_spill] sm:$0xff] %v14714_v38  ;;  %v14718_v32 = vld [vmem:[#allocation2 + $0x82] sm:$0xff] }
 0x4d7   : > { %17266 = vst [vmem:[#allocation28_spill] sm:$0xff] %v14718_v32 }
 0x4d9   : > { %11597 = vmatmul.mubr.msk.f32.gmra.mrb[12].mxu0 %vm884_vm1, %v14702_v35  ;;  %v14722_v35 = vld [vmem:[#allocation2 + $0x92] sm:$0xff] }
 0x4da   : > { %11599 = vmatprep.mubr.msk.f32.mxu0 %vm884_vm1, %v14706_v46  ;;  %17267 = vst [vmem:[#allocation29_spill] sm:$0xff] %v14722_v35  ;;  %v14726_v46 = vld [vmem:[#allocation2 + $0x9a] sm:$0xff] }
 0x4db   : > { %17268 = vst [vmem:[#allocation30_spill] sm:$0xff] %v14726_v46 }
 0x4dd   : > { %11600 = vmatmul.mubr.msk.f32.gmra.mrb[14].mxu0 %vm884_vm1, %v14710_v20  ;;  %v14730_v20 = vld [vmem:[#allocation2 + $0xaa] sm:$0xff] }
 0x4de   : > { %11602 = vmatprep.mubr.msk.f32.mxu0 %vm884_vm1, %v14714_v38  ;;  %17269 = vst [vmem:[#allocation31_spill] sm:$0xff] %v14730_v20  ;;  %v14734_v38 = vld [vmem:[#allocation2 + $0xb2] sm:$0xff] }
 0x4df   : > { %17270 = vst [vmem:[#allocation32_spill] sm:$0xff] %v14734_v38 }
 0x4e1   : > { %11603 = vmatmul.mubr.msk.f32.gmra.mrb[16].mxu0 %vm884_vm1, %v14718_v32  ;;  %v14738_v32 = vld [vmem:[#allocation2 + $0xc2] sm:$0xff] }
 0x4e2   : > { %11605 = vmatprep.mubr.msk.f32.mxu0 %vm884_vm1, %v14722_v35  ;;  %17271 = vst [vmem:[#allocation33_spill] sm:$0xff] %v14738_v32  ;;  %v14742_v35 = vld [vmem:[#allocation2 + $0xca] sm:$0xff] }
 0x4e3   : > { %17272 = vst [vmem:[#allocation34_spill] sm:$0xff] %v14742_v35 }
 0x4e5   : > { %11606 = vmatmul.mubr.msk.f32.gmra.mrb[18].mxu0 %vm884_vm1, %v14726_v46  ;;  %v14746_v46 = vld [vmem:[#allocation2 + $0xda] sm:$0xff] }
 0x4e6   : > { %11608 = vmatprep.mubr.msk.f32.mxu0 %vm884_vm1, %v14730_v20  ;;  %17273 = vst [vmem:[#allocation35_spill] sm:$0xff] %v14746_v46  ;;  %v14750_v20 = vld [vmem:[#allocation2 + $0xe2] sm:$0xff] }
 0x4e7   : > { %17274 = vst [vmem:[#allocation36_spill] sm:$0xff] %v14750_v20 }
 0x4e9   : > { %11609 = vmatmul.mubr.msk.f32.gmra.mrb[20].mxu0 %vm884_vm1, %v14734_v38  ;;  %v14754_v38 = vld [vmem:[#allocation2 + $0xf2] sm:$0xff] }
 0x4ea   : > { %11611 = vmatprep.mubr.msk.f32.mxu0 %vm884_vm1, %v14738_v32  ;;  %17275 = vst [vmem:[#allocation37_spill] sm:$0xff] %v14754_v38  ;;  %v14758_v32 = vld [vmem:[#allocation2 + $0xfa] sm:$0xff] }
 0x4eb   : > { %17276 = vst [vmem:[#allocation38_spill] sm:$0xff] %v14758_v32 }
 0x4ed   : > { %11612 = vmatmul.mubr.msk.f32.gmra.mrb[22].mxu0 %vm884_vm1, %v14742_v35  ;;  %v14762_v35 = vld [vmem:[#allocation2 + $0x10a] sm:$0xff] }
 0x4ee   : > { %11614 = vmatprep.mubr.msk.f32.mxu0 %vm884_vm1, %v14746_v46  ;;  %17277 = vst [vmem:[#allocation39_spill] sm:$0xff] %v14762_v35  ;;  %v14766_v46 = vld [vmem:[#allocation2 + $0x112] sm:$0xff] }
 0x4ef   : > { %17278 = vst [vmem:[#allocation40_spill] sm:$0xff] %v14766_v46 }
 0x4f1   : > { %11615 = vmatmul.mubr.msk.f32.gmra.mrb[24].mxu0 %vm884_vm1, %v14750_v20  ;;  %v14770_v20 = vld [vmem:[#allocation2 + $0x122] sm:$0xff] }
 0x4f2   : > { %11617 = vmatprep.mubr.msk.f32.mxu0 %vm884_vm1, %v14754_v38  ;;  %17279 = vst [vmem:[#allocation41_spill] sm:$0xff] %v14770_v20  ;;  %v14774_v38 = vld [vmem:[#allocation2 + $0x12a] sm:$0xff] }
 0x4f3   : > { %17280 = vst [vmem:[#allocation42_spill] sm:$0xff] %v14774_v38 }
 0x4f5   : > { %11618 = vmatmul.mubr.msk.f32.gmra.mrb[26].mxu0 %vm884_vm1, %v14758_v32  ;;  %v14778_v32 = vld [vmem:[#allocation2 + $0x13a] sm:$0xff] }
 0x4f6   : > { %11620 = vmatprep.mubr.msk.f32.mxu0 %vm884_vm1, %v14762_v35  ;;  %17281 = vst [vmem:[#allocation43_spill] sm:$0xff] %v14778_v32  ;;  %v14782_v35 = vld [vmem:[#allocation2 + $0x142] sm:$0xff] }
 0x4f9   : > { %11621 = vmatmul.mubr.msk.f32.gmra.mrb[28].mxu0 %vm884_vm1, %v14766_v46  ;;  %v14786_v46 = vld [vmem:[#allocation2 + $0x152] sm:$0xff] }
 0x4fa   : > { %11623 = vmatprep.mubr.msk.f32.mxu0 %vm884_vm1, %v14770_v20  ;;  %17282 = vst [vmem:[#allocation44_spill] sm:$0xff] %v14786_v46  ;;  %v14790_v20 = vld [vmem:[#allocation2 + $0x15a] sm:$0xff] }
 0x4fd   : > { %11624 = vmatmul.mubr.msk.f32.gmra.mrb[30].mxu0 %vm884_vm1, %v14774_v38  ;;  %v14794_v38 = vld [vmem:[#allocation2 + $0x16a] sm:$0xff] }
 0x4fe   : > { %11626 = vmatprep.mubr.msk.f32.mxu0 %vm884_vm1, %v14778_v32  ;;  %v14798_v32 = vld [vmem:[#allocation2 + $0x172] sm:$0xff] }
 0x501   : > { %11627 = vmatmul.mubr.msk.f32.gmra.mrb[32].mxu0 %vm884_vm1, %v14782_v35 }
 0x502   : > { %11629 = vmatprep.mubr.msk.f32.mxu0 %vm884_vm1, %v14786_v46  ;;  %v10278_v46 = vld [vmem:[%s17060_s6 + $0x14] sm:$0xf] }
 0x505   : > { %11630 = vmatmul.mubr.msk.f32.gmra.mrb[34].mxu0 %vm884_vm1, %v14790_v20 }
 0x506   : > { %11632 = vmatprep.mubr.msk.f32.mxu0 %vm884_vm1, %v14794_v38 }
 0x509   : > { %11633 = vmatmul.mubr.msk.f32.gmra.mrb[36].mxu0 %vm884_vm1, %v14798_v32 }
 0x50a   : > { %11637 = vmatprep.mubr.msk.f32.mxu0 %vm884_vm1, %v14547_v47  ;;  %v14872_v47 = vld [vmem:[#allocation2 + $0x188] sm:$0xff] }
 0x50d   : > { %11638 = vmatmul.mubr.msk.f32.vlgmr.msra.gmra.mrb[6].mxu0 %vm884_vm1, %v14555_v11  ;;  %v10312_v11 = vld [vmem:[%s17060_s6 + $0x18] sm:$0xf] }
 0x50e   : > { %11686 = vmatpush3.msk.msra.mxu0 %vm959_vm3, %v14675_v60  ;;  %11640 = vmatprep.mubr.msk.f32.mxu0 %vm884_vm1, %v14559_v49  ;;  %v14868_v60 = vld [vmem:[#allocation2 + $0x180] sm:$0xff] }
 0x50f   : > { %11735 = vmatprep.subr.msk.mxu0 %vm959_vm3, %v10278_v46 }
 0x511   : > { %11641 = vmatmul.mubr.msk.f32.gmra.mrb[8].mxu0 %vm884_vm1, %v14563_v27 }
 0x512   : > { %11643 = vmatprep.mubr.msk.f32.mxu0 %vm884_vm1, %v14567_v5 }
 0x515   : > { %11644 = vmatmul.mubr.msk.f32.gmra.mrb[10].mxu0 %vm884_vm1, %v14571_v21 }
 0x516   : > { %11646 = vmatprep.mubr.msk.f32.mxu0 %vm884_vm1, %v14575_v26 }
 0x519   : > { %11647 = vmatmul.mubr.msk.f32.gmra.mrb[12].mxu0 %vm884_vm1, %v14579_v44 }
 0x51a   : > { %11649 = vmatprep.mubr.msk.f32.mxu0 %vm884_vm1, %v14583_v39 }
 0x51d   : > { %11650 = vmatmul.mubr.msk.f32.gmra.mrb[14].mxu0 %vm884_vm1, %v14587_v42 }
 0x51e   : > { %11652 = vmatprep.mubr.msk.f32.mxu0 %vm884_vm1, %v14591_v25 }
 0x521   : > { %11653 = vmatmul.mubr.msk.f32.gmra.mrb[16].mxu0 %vm884_vm1, %v14595_v19 }
 0x522   : > { %11655 = vmatprep.mubr.msk.f32.mxu0 %vm884_vm1, %v14599_v56 }
 0x525   : > { %11656 = vmatmul.mubr.msk.f32.gmra.mrb[18].mxu0 %vm884_vm1, %v14603_v43 }
 0x526   : > { %11658 = vmatprep.mubr.msk.f32.mxu0 %vm884_vm1, %v14607_v18 }
 0x529   : > { %11659 = vmatmul.mubr.msk.f32.gmra.mrb[20].mxu0 %vm884_vm1, %v14611_v53 }
 0x52a   : > { %11661 = vmatprep.mubr.msk.f32.mxu0 %vm884_vm1, %v14615_v58 }
 0x52d   : > { %11662 = vmatmul.mubr.msk.f32.gmra.mrb[22].mxu0 %vm884_vm1, %v14619_v59 }
 0x52e   : > { %11664 = vmatprep.mubr.msk.f32.mxu0 %vm884_vm1, %v14623_v6 }
 0x531   : > { %11665 = vmatmul.mubr.msk.f32.gmra.mrb[24].mxu0 %vm884_vm1, %v14627_v31 }
 0x532   : > { %11667 = vmatprep.mubr.msk.f32.mxu0 %vm884_vm1, %v14631_v30 }
 0x535   : > { %11668 = vmatmul.mubr.msk.f32.gmra.mrb[26].mxu0 %vm884_vm1, %v14635_v48 }
 0x536   : > { %11670 = vmatprep.mubr.msk.f32.mxu0 %vm884_vm1, %v14639_v45 }
 0x539   : > { %11671 = vmatmul.mubr.msk.f32.gmra.mrb[28].mxu0 %vm884_vm1, %v14643_v29 }
 0x53a   : > { %11673 = vmatprep.mubr.msk.f32.mxu0 %vm884_vm1, %v14647_v1 }
 0x53d   : > { %11674 = vmatmul.mubr.msk.f32.gmra.mrb[30].mxu0 %vm884_vm1, %v14651_v28 }
 0x53e   : > { %11676 = vmatprep.mubr.msk.f32.mxu0 %vm884_vm1, %v14655_v16 }
 0x541   : > { %11677 = vmatmul.mubr.msk.f32.gmra.mrb[32].mxu0 %vm884_vm1, %v14659_v63 }
 0x542   : > { %11679 = vmatprep.mubr.msk.f32.mxu0 %vm884_vm1, %v14663_v36 }
 0x545   : > { %11680 = vmatmul.mubr.msk.f32.gmra.mrb[34].mxu0 %vm884_vm1, %v14667_v24 }
 0x546   : > { %11682 = vmatprep.mubr.msk.f32.mxu0 %vm884_vm1, %v14868_v60 }
 0x549   : > { %11683 = vmatmul.mubr.msk.f32.gmra.mrb[36].mxu0 %vm884_vm1, %v14872_v47 }
 0x54a   : > { %11687 = vmatprep.mubr.msk.f32.mxu0 %vm884_vm1, %v14281_v2  ;;  %v17283_v2 = vld [vmem:[#allocation9_spill] sm:$0xff] }
 0x54d   : > { %11688 = vmatmul.mubr.msk.f32.vlgmr.msra.gmra.mrb[6].mxu0 %vm884_vm1, %v14290_v55  ;;  %v17284_v55 = vld [vmem:[#allocation6_spill] sm:$0xff] }
 0x54e   : > { %11736 = vmatpush3.msk.msra.mxu0 %vm959_vm3, %v10278_v46  ;;  %11690 = vmatprep.mubr.msk.f32.mxu0 %vm884_vm1, %v14299_v15  ;;  %v17285_v15 = vld [vmem:[#allocation7_spill] sm:$0xff]  ;;  %v17310_v46 = vld [vmem:[#allocation42_spill] sm:$0xff] }
 0x54f   : > { %11785 = vmatprep.subr.msk.mxu0 %vm959_vm3, %v10312_v11 }
 0x551   : > { %11691 = vmatmul.mubr.msk.f32.gmra.mrb[8].mxu0 %vm884_vm1, %v14305_v23  ;;  %v17286_v23 = vld [vmem:[#allocation8_spill] sm:$0xff] }
 0x552   : > { %11693 = vmatprep.mubr.msk.f32.mxu0 %vm884_vm1, %v14311_v9  ;;  %v17287_v9 = vld [vmem:[#allocation19_spill] sm:$0xff] }
 0x555   : > { %11694 = vmatmul.mubr.msk.f32.gmra.mrb[10].mxu0 %vm884_vm1, %v14317_v51  ;;  %v10346_v51 = vld [vmem:[%s17060_s6 + $0x1c] sm:$0xf] }
 0x556   : > { %11696 = vmatprep.mubr.msk.f32.mxu0 %vm884_vm1, %v14323_v8  ;;  %v17288_v8 = vld [vmem:[#allocation20_spill] sm:$0xff] }
 0x559   : > { %11697 = vmatmul.mubr.msk.f32.gmra.mrb[12].mxu0 %vm884_vm1, %v14328_v3  ;;  %v17289_v3 = vld [vmem:[#allocation21_spill] sm:$0xff] }
 0x55a   : > { %11699 = vmatprep.mubr.msk.f32.mxu0 %vm884_vm1, %v14392_v61  ;;  %v17291_v61 = vld [vmem:[#allocation23_spill] sm:$0xff] }
 0x55d   : > { %11700 = vmatmul.mubr.msk.f32.gmra.mrb[14].mxu0 %vm884_vm1, %v14396_v33  ;;  %v17292_v33 = vld [vmem:[#allocation24_spill] sm:$0xff] }
 0x55e   : > { %11702 = vmatprep.mubr.msk.f32.mxu0 %vm884_vm1, %v14403_v62  ;;  %v17293_v62 = vld [vmem:[#allocation25_spill] sm:$0xff] }
 0x561   : > { %11703 = vmatmul.mubr.msk.f32.gmra.mrb[16].mxu0 %vm884_vm1, %v14409_v37  ;;  %v17294_v37 = vld [vmem:[#allocation26_spill] sm:$0xff] }
 0x562   : > { %11705 = vmatprep.mubr.msk.f32.mxu0 %vm884_vm1, %v14415_v34  ;;  %v17295_v34 = vld [vmem:[#allocation27_spill] sm:$0xff] }
 0x565   : > { %11706 = vmatmul.mubr.msk.f32.gmra.mrb[18].mxu0 %vm884_vm1, %v14420_v50  ;;  %v17296_v50 = vld [vmem:[#allocation28_spill] sm:$0xff] }
 0x566   : > { %11708 = vmatprep.mubr.msk.f32.mxu0 %vm884_vm1, %v14425_v7  ;;  %v17297_v7 = vld [vmem:[#allocation29_spill] sm:$0xff] }
 0x569   : > { %11709 = vmatmul.mubr.msk.f32.gmra.mrb[20].mxu0 %vm884_vm1, %v14430_v4  ;;  %v17298_v4 = vld [vmem:[#allocation30_spill] sm:$0xff] }
 0x56a   : > { %11711 = vmatprep.mubr.msk.f32.mxu0 %vm884_vm1, %v14435_v14  ;;  %v17299_v14 = vld [vmem:[#allocation31_spill] sm:$0xff] }
 0x56d   : > { %11712 = vmatmul.mubr.msk.f32.gmra.mrb[22].mxu0 %vm884_vm1, %v14440_v57  ;;  %v17300_v57 = vld [vmem:[#allocation32_spill] sm:$0xff] }
 0x56e   : > { %11714 = vmatprep.mubr.msk.f32.mxu0 %vm884_vm1, %v14446_v12  ;;  %v17301_v12 = vld [vmem:[#allocation33_spill] sm:$0xff] }
 0x571   : > { %11715 = vmatmul.mubr.msk.f32.gmra.mrb[24].mxu0 %vm884_vm1, %v14452_v0  ;;  %v17302_v0 = vld [vmem:[#allocation34_spill] sm:$0xff] }
 0x572   : > { %11717 = vmatprep.mubr.msk.f32.mxu0 %vm884_vm1, %v14458_v54  ;;  %v17303_v54 = vld [vmem:[#allocation35_spill] sm:$0xff] }
 0x575   : > { %11718 = vmatmul.mubr.msk.f32.gmra.mrb[26].mxu0 %vm884_vm1, %v14471_v40  ;;  %v17304_v40 = vld [vmem:[#allocation36_spill] sm:$0xff] }
 0x576   : > { %11720 = vmatprep.mubr.msk.f32.mxu0 %vm884_vm1, %v14475_v17  ;;  %v17305_v17 = vld [vmem:[#allocation37_spill] sm:$0xff] }
 0x579   : > { %11721 = vmatmul.mubr.msk.f32.gmra.mrb[28].mxu0 %vm884_vm1, %v14481_v41  ;;  %v17306_v41 = vld [vmem:[#allocation38_spill] sm:$0xff] }
 0x57a   : > { %11723 = vmatprep.mubr.msk.f32.mxu0 %vm884_vm1, %v14486_v52  ;;  %v17307_v52 = vld [vmem:[#allocation39_spill] sm:$0xff] }
 0x57d   : > { %11724 = vmatmul.mubr.msk.f32.gmra.mrb[30].mxu0 %vm884_vm1, %v14491_v22  ;;  %v17308_v22 = vld [vmem:[#allocation40_spill] sm:$0xff] }
 0x57e   : > { %11726 = vmatprep.mubr.msk.f32.mxu0 %vm884_vm1, %v14497_v10  ;;  %v17309_v10 = vld [vmem:[#allocation41_spill] sm:$0xff] }
 0x581   : > { %11727 = vmatmul.mubr.msk.f32.gmra.mrb[32].mxu0 %vm884_vm1, %v14345_v13  ;;  %v17290_v13 = vld [vmem:[#allocation22_spill] sm:$0xff] }
 0x582   : > { %11729 = vmatprep.mubr.msk.f32.mxu0 %vm884_vm1, %v17283_v2  ;;  %v17312_v2 = vld [vmem:[#allocation44_spill] sm:$0xff] }
 0x585   : > { %11730 = vmatmul.mubr.msk.f32.gmra.mrb[34].mxu0 %vm884_vm1, %v17284_v55  ;;  %v15010_v55 = vld [vmem:[#allocation2 + $0x182] sm:$0xff] }
 0x586   : > { %11732 = vmatprep.mubr.msk.f32.mxu0 %vm884_vm1, %v17285_v15  ;;  %v15014_v15 = vld [vmem:[#allocation2 + $0x18a] sm:$0xff] }
 0x589   : > { %11733 = vmatmul.mubr.msk.f32.gmra.mrb[36].mxu0 %vm884_vm1, %v17286_v23  ;;  %v10380_v23 = vld [vmem:[%s17060_s6 + $0x20] sm:$0xf] }
 0x58a   : > { %11737 = vmatprep.mubr.msk.f32.mxu0 %vm884_vm1, %v17287_v9  ;;  %v4430_v9 = vld [vmem:[#allocation2 + $0x181] sm:$0xff] }
 0x58d   : > { %11738 = vmatmul.mubr.msk.f32.vlgmr.msra.gmra.mrb[6].mxu0 %vm884_vm1, %v17288_v8  ;;  %v4431_v8 = vld [vmem:[#allocation2 + $0x189] sm:$0xff] }
 0x58e   : > { %11786 = vmatpush3.msk.msra.mxu0 %vm959_vm3, %v10312_v11  ;;  %11740 = vmatprep.mubr.msk.f32.mxu0 %vm884_vm1, %v17289_v3  ;;  %v17311_v11 = vld [vmem:[#allocation43_spill] sm:$0xff] }
 0x58f   : > { %11835 = vmatprep.subr.msk.mxu0 %vm959_vm3, %v10346_v51 }
 0x591   : > { %11741 = vmatmul.mubr.msk.f32.gmra.mrb[8].mxu0 %vm884_vm1, %v17290_v13 }
 0x592   : > { %11743 = vmatprep.mubr.msk.f32.mxu0 %vm884_vm1, %v17291_v61 }
 0x595   : > { %11744 = vmatmul.mubr.msk.f32.gmra.mrb[10].mxu0 %vm884_vm1, %v17292_v33 }
 0x596   : > { %11746 = vmatprep.mubr.msk.f32.mxu0 %vm884_vm1, %v17293_v62 }
 0x599   : > { %11747 = vmatmul.mubr.msk.f32.gmra.mrb[12].mxu0 %vm884_vm1, %v17294_v37 }
 0x59a   : > { %11749 = vmatprep.mubr.msk.f32.mxu0 %vm884_vm1, %v17295_v34 }
 0x59d   : > { %11750 = vmatmul.mubr.msk.f32.gmra.mrb[14].mxu0 %vm884_vm1, %v17296_v50 }
 0x59e   : > { %11752 = vmatprep.mubr.msk.f32.mxu0 %vm884_vm1, %v17297_v7 }
 0x5a1   : > { %11753 = vmatmul.mubr.msk.f32.gmra.mrb[16].mxu0 %vm884_vm1, %v17298_v4 }
 0x5a2   : > { %11755 = vmatprep.mubr.msk.f32.mxu0 %vm884_vm1, %v17299_v14 }
 0x5a5   : > { %11756 = vmatmul.mubr.msk.f32.gmra.mrb[18].mxu0 %vm884_vm1, %v17300_v57 }
 0x5a6   : > { %11758 = vmatprep.mubr.msk.f32.mxu0 %vm884_vm1, %v17301_v12 }
 0x5a9   : > { %11759 = vmatmul.mubr.msk.f32.gmra.mrb[20].mxu0 %vm884_vm1, %v17302_v0 }
 0x5aa   : > { %11761 = vmatprep.mubr.msk.f32.mxu0 %vm884_vm1, %v17303_v54 }
 0x5ad   : > { %11762 = vmatmul.mubr.msk.f32.gmra.mrb[22].mxu0 %vm884_vm1, %v17304_v40 }
 0x5ae   : > { %11764 = vmatprep.mubr.msk.f32.mxu0 %vm884_vm1, %v17305_v17 }
 0x5b1   : > { %11765 = vmatmul.mubr.msk.f32.gmra.mrb[24].mxu0 %vm884_vm1, %v17306_v41 }
 0x5b2   : > { %11767 = vmatprep.mubr.msk.f32.mxu0 %vm884_vm1, %v17307_v52 }
 0x5b5   : > { %11768 = vmatmul.mubr.msk.f32.gmra.mrb[26].mxu0 %vm884_vm1, %v17308_v22 }
 0x5b6   : > { %11770 = vmatprep.mubr.msk.f32.mxu0 %vm884_vm1, %v17309_v10 }
 0x5b9   : > { %11771 = vmatmul.mubr.msk.f32.gmra.mrb[28].mxu0 %vm884_vm1, %v17310_v46 }
 0x5ba   : > { %11773 = vmatprep.mubr.msk.f32.mxu0 %vm884_vm1, %v17311_v11 }
 0x5bd   : > { %11774 = vmatmul.mubr.msk.f32.gmra.mrb[30].mxu0 %vm884_vm1, %v14782_v35 }
 0x5be   : > { %11776 = vmatprep.mubr.msk.f32.mxu0 %vm884_vm1, %v17312_v2 }
 0x5c1   : > { %11777 = vmatmul.mubr.msk.f32.gmra.mrb[32].mxu0 %vm884_vm1, %v14790_v20 }
 0x5c2   : > { %11779 = vmatprep.mubr.msk.f32.mxu0 %vm884_vm1, %v14794_v38 }
 0x5c5   : > { %11780 = vmatmul.mubr.msk.f32.gmra.mrb[34].mxu0 %vm884_vm1, %v14798_v32 }
 0x5c6   : > { %11782 = vmatprep.mubr.msk.f32.mxu0 %vm884_vm1, %v15010_v55 }
 0x5c9   : > { %11783 = vmatmul.mubr.msk.f32.gmra.mrb[36].mxu0 %vm884_vm1, %v15014_v15 }
 0x5ca   : > { %11787 = vmatprep.mubr.msk.f32.mxu0 %vm884_vm1, %v14559_v49  ;;  %v4412_v49 = vld [vmem:[#allocation2 + $0xa9] sm:$0xff] }
 0x5cd   : > { %11788 = vmatmul.mubr.msk.f32.vlgmr.msra.gmra.mrb[6].mxu0 %vm884_vm1, %v14563_v27  ;;  %v4413_v27 = vld [vmem:[#allocation2 + $0xb1] sm:$0xff] }
 0x5ce   : > { %11836 = vmatpush3.msk.msra.mxu0 %vm959_vm3, %v10346_v51  ;;  %11790 = vmatprep.mubr.msk.f32.mxu0 %vm884_vm1, %v14567_v5  ;;  %v4414_v5 = vld [vmem:[#allocation2 + $0xc1] sm:$0xff]  ;;  %v4432_v51 = vld [vmem:[#allocation2 + $0x199] sm:$0xff] }
 0x5cf   : > { %11885 = vmatprep.subr.msk.mxu0 %vm959_vm3, %v10380_v23 }
 0x5d1   : > { %11791 = vmatmul.mubr.msk.f32.gmra.mrb[8].mxu0 %vm884_vm1, %v14571_v21  ;;  %v4415_v21 = vld [vmem:[#allocation2 + $0xc9] sm:$0xff] }
 0x5d2   : > { %11793 = vmatprep.mubr.msk.f32.mxu0 %vm884_vm1, %v14575_v26  ;;  %v4416_v26 = vld [vmem:[#allocation2 + $0xd9] sm:$0xff] }
 0x5d5   : > { %11794 = vmatmul.mubr.msk.f32.gmra.mrb[10].mxu0 %vm884_vm1, %v14579_v44  ;;  %v4417_v44 = vld [vmem:[#allocation2 + $0xe1] sm:$0xff] }
 0x5d6   : > { %11796 = vmatprep.mubr.msk.f32.mxu0 %vm884_vm1, %v14583_v39  ;;  %v4418_v39 = vld [vmem:[#allocation2 + $0xf1] sm:$0xff] }
 0x5d9   : > { %11797 = vmatmul.mubr.msk.f32.gmra.mrb[12].mxu0 %vm884_vm1, %v14587_v42  ;;  %v4419_v42 = vld [vmem:[#allocation2 + $0xf9] sm:$0xff] }
 0x5da   : > { %11799 = vmatprep.mubr.msk.f32.mxu0 %vm884_vm1, %v14591_v25  ;;  %v4420_v25 = vld [vmem:[#allocation2 + $0x109] sm:$0xff] }
 0x5dd   : > { %11800 = vmatmul.mubr.msk.f32.gmra.mrb[14].mxu0 %vm884_vm1, %v14595_v19  ;;  %v17313_v19 = vld [vmem:[#allocation10_spill] sm:$0xff] }
 0x5de   : > { %11802 = vmatprep.mubr.msk.f32.mxu0 %vm884_vm1, %v14599_v56  ;;  %v17314_v56 = vld [vmem:[#allocation11_spill] sm:$0xff] }
 0x5e1   : > { %11803 = vmatmul.mubr.msk.f32.gmra.mrb[16].mxu0 %vm884_vm1, %v14603_v43  ;;  %v17315_v43 = vld [vmem:[#allocation12_spill] sm:$0xff] }
 0x5e2   : > { %11805 = vmatprep.mubr.msk.f32.mxu0 %vm884_vm1, %v14607_v18  ;;  %v17316_v18 = vld [vmem:[#allocation13_spill] sm:$0xff] }
 0x5e5   : > { %11806 = vmatmul.mubr.msk.f32.gmra.mrb[18].mxu0 %vm884_vm1, %v14611_v53  ;;  %v17317_v53 = vld [vmem:[#allocation14_spill] sm:$0xff] }
 0x5e6   : > { %11808 = vmatprep.mubr.msk.f32.mxu0 %vm884_vm1, %v14615_v58  ;;  %v17318_v58 = vld [vmem:[#allocation15_spill] sm:$0xff] }
 0x5e9   : > { %11809 = vmatmul.mubr.msk.f32.gmra.mrb[20].mxu0 %vm884_vm1, %v14619_v59  ;;  %v17319_v59 = vld [vmem:[#allocation16_spill] sm:$0xff] }
 0x5ea   : > { %11811 = vmatprep.mubr.msk.f32.mxu0 %vm884_vm1, %v14623_v6  ;;  %v4042_v6 = vld [vmem:[#allocation2 + $0x198] sm:$0xff] }
 0x5ed   : > { %11812 = vmatmul.mubr.msk.f32.gmra.mrb[22].mxu0 %vm884_vm1, %v14627_v31  ;;  %v4402_v31 = vld [vmem:[#allocation2 + $0x31] sm:$0xff] }
 0x5ee   : > { %11814 = vmatprep.mubr.msk.f32.mxu0 %vm884_vm1, %v14631_v30  ;;  %v4043_v30 = vld [vmem:[#allocation2 + $0x1a0] sm:$0xff] }
 0x5f1   : > { %11815 = vmatmul.mubr.msk.f32.gmra.mrb[24].mxu0 %vm884_vm1, %v14635_v48  ;;  %v4403_v48 = vld [vmem:[#allocation2 + $0x39] sm:$0xff] }
 0x5f2   : > { %11817 = vmatprep.mubr.msk.f32.mxu0 %vm884_vm1, %v14639_v45  ;;  %v4411_v45 = vld [vmem:[#allocation2 + $0x99] sm:$0xff] }
 0x5f5   : > { %11818 = vmatmul.mubr.msk.f32.gmra.mrb[26].mxu0 %vm884_vm1, %v14643_v29  ;;  %v4410_v29 = vld [vmem:[#allocation2 + $0x91] sm:$0xff] }
 0x5f6   : > { %11820 = vmatprep.mubr.msk.f32.mxu0 %vm884_vm1, %v14647_v1  ;;  %v4409_v1 = vld [vmem:[#allocation2 + $0x81] sm:$0xff] }
 0x5f9   : > { %11821 = vmatmul.mubr.msk.f32.gmra.mrb[28].mxu0 %vm884_vm1, %v14651_v28  ;;  %v4408_v28 = vld [vmem:[#allocation2 + $0x79] sm:$0xff] }
 0x5fa   : > { %11823 = vmatprep.mubr.msk.f32.mxu0 %vm884_vm1, %v14655_v16  ;;  %v4407_v16 = vld [vmem:[#allocation2 + $0x69] sm:$0xff] }
 0x5fd   : > { %11824 = vmatmul.mubr.msk.f32.gmra.mrb[30].mxu0 %vm884_vm1, %v14659_v63  ;;  %v4406_v63 = vld [vmem:[#allocation2 + $0x61] sm:$0xff] }
 0x5fe   : > { %11826 = vmatprep.mubr.msk.f32.mxu0 %vm884_vm1, %v14663_v36  ;;  %v4404_v36 = vld [vmem:[#allocation2 + $0x49] sm:$0xff] }
 0x601   : > { %11827 = vmatmul.mubr.msk.f32.gmra.mrb[32].mxu0 %vm884_vm1, %v14667_v24  ;;  %v4405_v24 = vld [vmem:[#allocation2 + $0x51] sm:$0xff] }
 0x602   : > { %11829 = vmatprep.mubr.msk.f32.mxu0 %vm884_vm1, %v14868_v60  ;;  %v17320_v60 = vld [vmem:[#allocation17_spill] sm:$0xff] }
 0x605   : > { %11830 = vmatmul.mubr.msk.f32.gmra.mrb[34].mxu0 %vm884_vm1, %v14872_v47  ;;  %v17321_v47 = vld [vmem:[#allocation18_spill] sm:$0xff] }
 0x606   : > { %11832 = vmatprep.mubr.msk.f32.mxu0 %vm884_vm1, %v4042_v6 }
 0x609   : > { %11833 = vmatmul.mubr.msk.f32.gmra.mrb[36].mxu0 %vm884_vm1, %v4043_v30 }
 0x60a   : > { %11837 = vmatprep.mubr.msk.f32.mxu0 %vm884_vm1, %v4402_v31 }
 0x60d   : > { %11838 = vmatmul.mubr.msk.f32.vlgmr.msra.gmra.mrb[6].mxu0 %vm884_vm1, %v4403_v48 }
 0x60e   : > { %11886 = vmatpush3.msk.msra.mxu0 %vm959_vm3, %v10380_v23  ;;  %11840 = vmatprep.mubr.msk.f32.mxu0 %vm884_vm1, %v4404_v36  ;;  %v4433_v23 = vld [vmem:[#allocation2 + $0x1a1] sm:$0xff] }
 0x611   : > { %11841 = vmatmul.mubr.msk.f32.gmra.mrb[8].mxu0 %vm884_vm1, %v4405_v24 }
 0x612   : > { %11843 = vmatprep.mubr.msk.f32.mxu0 %vm884_vm1, %v4406_v63 }
 0x615   : > { %11844 = vmatmul.mubr.msk.f32.gmra.mrb[10].mxu0 %vm884_vm1, %v4407_v16 }
 0x616   : > { %11846 = vmatprep.mubr.msk.f32.mxu0 %vm884_vm1, %v4408_v28 }
 0x619   : > { %11847 = vmatmul.mubr.msk.f32.gmra.mrb[12].mxu0 %vm884_vm1, %v4409_v1 }
 0x61a   : > { %11849 = vmatprep.mubr.msk.f32.mxu0 %vm884_vm1, %v4410_v29 }
 0x61d   : > { %11850 = vmatmul.mubr.msk.f32.gmra.mrb[14].mxu0 %vm884_vm1, %v4411_v45 }
 0x61e   : > { %11852 = vmatprep.mubr.msk.f32.mxu0 %vm884_vm1, %v4412_v49 }
 0x621   : > { %11853 = vmatmul.mubr.msk.f32.gmra.mrb[16].mxu0 %vm884_vm1, %v4413_v27 }
 0x622   : > { %11855 = vmatprep.mubr.msk.f32.mxu0 %vm884_vm1, %v4414_v5 }
 0x625   : > { %11856 = vmatmul.mubr.msk.f32.gmra.mrb[18].mxu0 %vm884_vm1, %v4415_v21 }
 0x626   : > { %11858 = vmatprep.mubr.msk.f32.mxu0 %vm884_vm1, %v4416_v26 }
 0x629   : > { %11859 = vmatmul.mubr.msk.f32.gmra.mrb[20].mxu0 %vm884_vm1, %v4417_v44 }
 0x62a   : > { %11861 = vmatprep.mubr.msk.f32.mxu0 %vm884_vm1, %v4418_v39 }
 0x62d   : > { %11862 = vmatmul.mubr.msk.f32.gmra.mrb[22].mxu0 %vm884_vm1, %v4419_v42 }
 0x62e   : > { %11864 = vmatprep.mubr.msk.f32.mxu0 %vm884_vm1, %v4420_v25 }
 0x631   : > { %11865 = vmatmul.mubr.msk.f32.gmra.mrb[24].mxu0 %vm884_vm1, %v17313_v19 }
 0x632   : > { %11867 = vmatprep.mubr.msk.f32.mxu0 %vm884_vm1, %v17314_v56 }
 0x635   : > { %11868 = vmatmul.mubr.msk.f32.gmra.mrb[26].mxu0 %vm884_vm1, %v17315_v43 }
 0x636   : > { %11870 = vmatprep.mubr.msk.f32.mxu0 %vm884_vm1, %v17316_v18 }
 0x639   : > { %11871 = vmatmul.mubr.msk.f32.gmra.mrb[28].mxu0 %vm884_vm1, %v17317_v53 }
 0x63a   : > { %11873 = vmatprep.mubr.msk.f32.mxu0 %vm884_vm1, %v17318_v58 }
 0x63d   : > { %11874 = vmatmul.mubr.msk.f32.gmra.mrb[30].mxu0 %vm884_vm1, %v17319_v59 }
 0x63e   : > { %11876 = vmatprep.mubr.msk.f32.mxu0 %vm884_vm1, %v17320_v60 }
 0x641   : > { %11877 = vmatmul.mubr.msk.f32.gmra.mrb[32].mxu0 %vm884_vm1, %v17321_v47 }
 0x642   : > { %11879 = vmatprep.mubr.msk.f32.mxu0 %vm884_vm1, %v4430_v9 }
 0x645   : > { %11880 = vmatmul.mubr.msk.f32.gmra.mrb[34].mxu0 %vm884_vm1, %v4431_v8 }
 0x646   : > { %11882 = vmatprep.mubr.msk.f32.mxu0 %vm884_vm1, %v4432_v51 }
 0x649   : > { %11883 = vmatmul.mubr.msk.f32.gmra.mrb[36].mxu0 %vm884_vm1, %v4433_v23 }
 0x64a   : > { %11887 = vmatprep.mubr.msk.f32.mxu0 %vm884_vm1, %v17289_v3  ;;  %v4822_v3 = vld [vmem:[#allocation2 + $0x19a] sm:$0xff] }
 0x64d   : > { %11888 = vmatmul.mubr.msk.f32.vlgmr.msra.gmra.mrb[6].mxu0 %vm884_vm1, %v17290_v13 }
 0x64e   : > { %11890 = vmatprep.mubr.msk.f32.mxu0 %vm884_vm1, %v17291_v61 }
 0x651   : > { %11891 = vmatmul.mubr.msk.f32.gmra.mrb[8].mxu0 %vm884_vm1, %v17292_v33 }
 0x652   : > { %11893 = vmatprep.mubr.msk.f32.mxu0 %vm884_vm1, %v17293_v62 }
 0x655   : > { %11894 = vmatmul.mubr.msk.f32.gmra.mrb[10].mxu0 %vm884_vm1, %v17294_v37 }
 0x656   : > { %11896 = vmatprep.mubr.msk.f32.mxu0 %vm884_vm1, %v17295_v34 }
 0x659   : > { %11897 = vmatmul.mubr.msk.f32.gmra.mrb[12].mxu0 %vm884_vm1, %v17296_v50 }
 0x65a   : > { %11899 = vmatprep.mubr.msk.f32.mxu0 %vm884_vm1, %v17297_v7 }
 0x65d   : > { %11900 = vmatmul.mubr.msk.f32.gmra.mrb[14].mxu0 %vm884_vm1, %v17298_v4 }
 0x65e   : > { %11902 = vmatprep.mubr.msk.f32.mxu0 %vm884_vm1, %v17299_v14 }
 0x661   : > { %11903 = vmatmul.mubr.msk.f32.gmra.mrb[16].mxu0 %vm884_vm1, %v17300_v57 }
 0x662   : > { %11905 = vmatprep.mubr.msk.f32.mxu0 %vm884_vm1, %v17301_v12 }
 0x665   : > { %11906 = vmatmul.mubr.msk.f32.gmra.mrb[18].mxu0 %vm884_vm1, %v17302_v0 }
 0x666   : > { %11908 = vmatprep.mubr.msk.f32.mxu0 %vm884_vm1, %v17303_v54 }
 0x669   : > { %11909 = vmatmul.mubr.msk.f32.gmra.mrb[20].mxu0 %vm884_vm1, %v17304_v40 }
 0x66a   : > { %11911 = vmatprep.mubr.msk.f32.mxu0 %vm884_vm1, %v17305_v17 }
 0x66d   : > { %11912 = vmatmul.mubr.msk.f32.gmra.mrb[22].mxu0 %vm884_vm1, %v17306_v41 }
 0x66e   : > { %11914 = vmatprep.mubr.msk.f32.mxu0 %vm884_vm1, %v17307_v52 }
 0x671   : > { %11915 = vmatmul.mubr.msk.f32.gmra.mrb[24].mxu0 %vm884_vm1, %v17308_v22 }
 0x672   : > { %11917 = vmatprep.mubr.msk.f32.mxu0 %vm884_vm1, %v17309_v10 }
 0x675   : > { %11918 = vmatmul.mubr.msk.f32.gmra.mrb[26].mxu0 %vm884_vm1, %v17310_v46 }
 0x676   : > { %11920 = vmatprep.mubr.msk.f32.mxu0 %vm884_vm1, %v17311_v11 }
 0x679   : > { %11921 = vmatmul.mubr.msk.f32.gmra.mrb[28].mxu0 %vm884_vm1, %v14782_v35  ;;  %v4823_v35 = vld [vmem:[#allocation2 + $0x1a2] sm:$0xff] }
 0x67a   : > { %11923 = vmatprep.mubr.msk.f32.mxu0 %vm884_vm1, %v17312_v2 }
 0x67d   : > { %11924 = vmatmul.mubr.msk.f32.gmra.mrb[30].mxu0 %vm884_vm1, %v14790_v20  ;;  %v15192_v20 = vld [vmem:[%s17062_s8] sm:$0xff] }
 0x67e   : > { %11926 = vmatprep.mubr.msk.f32.mxu0 %vm884_vm1, %v14794_v38  ;;  %11936 = vmatpush3.msra.mxu1 %v15192_v20  ;;  %v17322_v38 = vmov 0.0  }
 0x67f   : > { %11940 = vmatprep.subr.mxu1 %v17322_v38 }
 0x681   : > { %11927 = vmatmul.mubr.msk.f32.gmra.mrb[32].mxu0 %vm884_vm1, %v14798_v32  ;;  %v15199_v32 = vld [vmem:[%s17061_s7] ss:$0 sm:$0xff] }
 0x682   : > { %11929 = vmatprep.mubr.msk.f32.mxu0 %vm884_vm1, %v15010_v55 }
 0x685   : > { %11930 = vmatmul.mubr.msk.f32.gmra.mrb[34].mxu0 %vm884_vm1, %v15014_v15 }
 0x686   : > { %11932 = vmatprep.mubr.msk.f32.mxu0 %vm884_vm1, %v4822_v3 }
 0x689   : > { %11933 = vmatmul.mubr.msk.f32.gmra.mrb[36].mxu0 %vm884_vm1, %v4823_v35 }
 0x720   : > { %v11889_v13 = vpop.f32.mrb[6].mxu0 }
 0x721   : > { %v15202_v61 = vadd.f32 %v11889_v13, %v15199_v32  ;;  %v4991_v33 = vpop.f32.mrb[7].mxu0 }
 0x722   : > { %v15205_v62 = vadd.f32 %v15199_v32, %v4991_v33 }
 0x723   : > { %v5222_v37 = vsel %vm644_vm6, %v15202_v61, 0.0 }
 0x724   : > { %v5221_v34 = vsel %vm644_vm6, %v15205_v62, 0.0  ;;  %v11892_v50 = vpop.f32.mrb[8].mxu0 }
 0x725   : > { %v5001_v7 = vpop.f32.mrb[9].mxu0  ;;  %v15212_v4 = vadd.f32 %v11892_v50, %v15199_v32  ;;  %v5223_v57 = vadd.f32 %v5222_v37, %v5221_v34 }
 0x726   : > { %v15215_v14 = vadd.f32 %v15199_v32, %v5001_v7 }
 0x727   : > { %v5226_v17 = vsel %vm644_vm6, %v15212_v4, 0.0 }
 0x728   : > { %v5224_v12 = vsel %vm644_vm6, %v15215_v14, 0.0  ;;  %v11895_v0 = vpop.f32.mrb[10].mxu0 }
 0x729   : > { %v5225_v54 = vadd.f32 %v5224_v12, %v5223_v57  ;;  %v5011_v40 = vpop.f32.mrb[11].mxu0  ;;  %v15222_v41 = vadd.f32 %v11895_v0, %v15199_v32 }
 0x72a   : > { %v15225_v52 = vadd.f32 %v15199_v32, %v5011_v40 }
 0x72b   : > { %v5227_v22 = vadd.f32 %v5226_v17, %v5225_v54  ;;  %v5230_v55 = vsel %vm644_vm6, %v15222_v41, 0.0 }
 0x72c   : > { %v5228_v10 = vsel %vm644_vm6, %v15225_v52, 0.0  ;;  %v11898_v46 = vpop.f32.mrb[12].mxu0 }
 0x72d   : > { %v5229_v11 = vadd.f32 %v5228_v10, %v5227_v22  ;;  %v5021_v2 = vpop.f32.mrb[13].mxu0  ;;  %v15232_v15 = vadd.f32 %v11898_v46, %v15199_v32 }
 0x72e   : > { %v15235_v6 = vadd.f32 %v15199_v32, %v5021_v2 }
 0x72f   : > { %v5231_v30 = vadd.f32 %v5230_v55, %v5229_v11  ;;  %v5234_v63 = vsel %vm644_vm6, %v15232_v15, 0.0 }
 0x730   : > { %v5232_v31 = vsel %vm644_vm6, %v15235_v6, 0.0  ;;  %v11901_v48 = vpop.f32.mrb[14].mxu0 }
 0x731   : > { %v5233_v36 = vadd.f32 %v5232_v31, %v5231_v30  ;;  %v5031_v24 = vpop.f32.mrb[15].mxu0  ;;  %v15242_v16 = vadd.f32 %v11901_v48, %v15199_v32 }
 0x732   : > { %v15245_v28 = vadd.f32 %v15199_v32, %v5031_v24 }
 0x733   : > { %v5235_v1 = vadd.f32 %v5234_v63, %v5233_v36  ;;  %v5238_v5 = vsel %vm644_vm6, %v15242_v16, 0.0 }
 0x734   : > { %v5236_v29 = vsel %vm644_vm6, %v15245_v28, 0.0  ;;  %v11904_v45 = vpop.f32.mrb[16].mxu0 }
 0x735   : > { %v5237_v49 = vadd.f32 %v5236_v29, %v5235_v1  ;;  %v5041_v27 = vpop.f32.mrb[17].mxu0  ;;  %v15252_v21 = vadd.f32 %v11904_v45, %v15199_v32 }
 0x736   : > { %v15255_v26 = vadd.f32 %v15199_v32, %v5041_v27 }
 0x737   : > { %v5239_v44 = vadd.f32 %v5238_v5, %v5237_v49  ;;  %v5242_v56 = vsel %vm644_vm6, %v15252_v21, 0.0 }
 0x738   : > { %v5240_v39 = vsel %vm644_vm6, %v15255_v26, 0.0  ;;  %v11907_v42 = vpop.f32.mrb[18].mxu0 }
 0x739   : > { %v5241_v25 = vadd.f32 %v5240_v39, %v5239_v44  ;;  %v5051_v19 = vpop.f32.mrb[19].mxu0  ;;  %v15262_v43 = vadd.f32 %v11907_v42, %v15199_v32 }
 0x73a   : > { %v15265_v18 = vadd.f32 %v15199_v32, %v5051_v19 }
 0x73b   : > { %v5243_v53 = vadd.f32 %v5242_v56, %v5241_v25  ;;  %v5246_v9 = vsel %vm644_vm6, %v15262_v43, 0.0 }
 0x73c   : > { %v5244_v58 = vsel %vm644_vm6, %v15265_v18, 0.0  ;;  %v11910_v59 = vpop.f32.mrb[20].mxu0 }
 0x73d   : > { %v5245_v60 = vadd.f32 %v5244_v58, %v5243_v53  ;;  %v5061_v47 = vpop.f32.mrb[21].mxu0  ;;  %v15272_v51 = vadd.f32 %v11910_v59, %v15199_v32 }
 0x73e   : > { %v15275_v8 = vadd.f32 %v15199_v32, %v5061_v47 }
 0x73f   : > { %v5247_v23 = vadd.f32 %v5246_v9, %v5245_v60  ;;  %v5250_v37 = vsel %vm644_vm6, %v15272_v51, 0.0 }
 0x740   : > { %v5248_v3 = vsel %vm644_vm6, %v15275_v8, 0.0  ;;  %v11913_v35 = vpop.f32.mrb[22].mxu0 }
 0x741   : > { %v5249_v13 = vadd.f32 %v5248_v3, %v5247_v23  ;;  %v5071_v33 = vpop.f32.mrb[23].mxu0  ;;  %v15282_v34 = vadd.f32 %v11913_v35, %v15199_v32 }
 0x742   : > { %v15285_v50 = vadd.f32 %v15199_v32, %v5071_v33 }
 0x743   : > { %v5251_v7 = vadd.f32 %v5250_v37, %v5249_v13  ;;  %v5254_v40 = vsel %vm644_vm6, %v15282_v34, 0.0 }
 0x744   : > { %v5252_v57 = vsel %vm644_vm6, %v15285_v50, 0.0  ;;  %v11916_v12 = vpop.f32.mrb[24].mxu0 }
 0x745   : > { %v5253_v0 = vadd.f32 %v5252_v57, %v5251_v7  ;;  %v5081_v54 = vpop.f32.mrb[25].mxu0  ;;  %v15292_v17 = vadd.f32 %v11916_v12, %v15199_v32 }
 0x746   : > { %v15295_v22 = vadd.f32 %v15199_v32, %v5081_v54 }
 0x747   : > { %v5255_v10 = vadd.f32 %v5254_v40, %v5253_v0  ;;  %v5258_v30 = vsel %vm644_vm6, %v15292_v17, 0.0 }
 0x748   : > { %v5256_v46 = vsel %vm644_vm6, %v15295_v22, 0.0  ;;  %v11919_v11 = vpop.f32.mrb[26].mxu0 }
 0x749   : > { %v5257_v2 = vadd.f32 %v5256_v46, %v5255_v10  ;;  %v5091_v55 = vpop.f32.mrb[27].mxu0  ;;  %v15302_v31 = vadd.f32 %v11919_v11, %v15199_v32 }
 0x74a   : > { %v15305_v48 = vadd.f32 %v15199_v32, %v5091_v55 }
 0x74b   : > { %v5259_v36 = vadd.f32 %v5258_v30, %v5257_v2  ;;  %v5262_v45 = vsel %vm644_vm6, %v15302_v31, 0.0 }
 0x74c   : > { %v5260_v24 = vsel %vm644_vm6, %v15305_v48, 0.0  ;;  %v11922_v63 = vpop.f32.mrb[28].mxu0 }
 0x74d   : > { %v5261_v1 = vadd.f32 %v5260_v24, %v5259_v36  ;;  %v5101_v29 = vpop.f32.mrb[29].mxu0  ;;  %v15312_v49 = vadd.f32 %v11922_v63, %v15199_v32 }
 0x74e   : > { %v15315_v27 = vadd.f32 %v15199_v32, %v5101_v29 }
 0x74f   : > { %v5263_v5 = vadd.f32 %v5262_v45, %v5261_v1  ;;  %v5266_v19 = vsel %vm644_vm6, %v15312_v49, 0.0 }
 0x750   : > { %v5264_v44 = vsel %vm644_vm6, %v15315_v27, 0.0  ;;  %v11925_v39 = vpop.f32.mrb[30].mxu0 }
 0x751   : > { %v5265_v42 = vadd.f32 %v5264_v44, %v5263_v5  ;;  %v5111_v25 = vpop.f32.mrb[31].mxu0  ;;  %v15322_v56 = vadd.f32 %v11925_v39, %v15199_v32 }
 0x752   : > { %v15325_v53 = vadd.f32 %v15199_v32, %v5111_v25 }
 0x753   : > { %v5267_v58 = vadd.f32 %v5266_v19, %v5265_v42  ;;  %v5270_v23 = vsel %vm644_vm6, %v15322_v56, 0.0 }
 0x754   : > { %v5268_v59 = vsel %vm644_vm6, %v15325_v53, 0.0  ;;  %v11928_v60 = vpop.f32.mrb[32].mxu0 }
 0x755   : > { %v5269_v47 = vadd.f32 %v5268_v59, %v5267_v58  ;;  %v5121_v9 = vpop.f32.mrb[33].mxu0  ;;  %v15332_v3 = vadd.f32 %v11928_v60, %v15199_v32 }
 0x756   : > { %v15335_v35 = vadd.f32 %v15199_v32, %v5121_v9 }
 0x757   : > { %v5271_v13 = vadd.f32 %v5270_v23, %v5269_v47  ;;  %v5274_v12 = vsel %vm644_vm6, %v15332_v3, 0.0  ;;  %v17323_v23 = vld [vmem:[#allocation5_spill] sm:$0xff] }
 0x758   : > { %v5272_v33 = vsel %vm644_vm6, %v15335_v35, 0.0  ;;  %v11931_v37 = vpop.f32.mrb[34].mxu0 }
 0x759   : > { %v5273_v7 = vadd.f32 %v5272_v33, %v5271_v13  ;;  %v5131_v57 = vpop.f32.mrb[35].mxu0  ;;  %v15342_v0 = vadd.f32 %v11931_v37, %v15199_v32 }
 0x75a   : > { %v15345_v54 = vadd.f32 %v15199_v32, %v5131_v57 }
 0x75b   : > { %v5275_v40 = vadd.f32 %v5274_v12, %v5273_v7  ;;  %v5278_v55 = vsel %vm644_vm6, %v15342_v0, 0.0 }
 0x75c   : > { %v5276_v10 = vsel %vm644_vm6, %v15345_v54, 0.0  ;;  %v11934_v46 = vpop.f32.mrb[36].mxu0 }
 0x75d   : > { %v5277_v11 = vadd.f32 %v5276_v10, %v5275_v40  ;;  %v5141_v2 = vpop.f32.mrb[37].mxu0  ;;  %v15352_v30 = vadd.f32 %v11934_v46, %v15199_v32 }
 0x75e   : > { %v15355_v36 = vadd.f32 %v15199_v32, %v5141_v2  ;;  %v15364_v32 = vld [vmem:[%s17063_s9] sm:$0x3] }
 0x75f   : > { %v5279_v24 = vadd.f32 %v5278_v55, %v5277_v11  ;;  %v5282_v29 = vsel %vm644_vm6, %v15352_v30, 0.0 }
 0x760   : > { %v5280_v63 = vsel %vm644_vm6, %v15355_v36, 0.0 }
 0x761   : > { %v5281_v1 = vadd.f32 %v5280_v63, %v5279_v24 }
 0x763   : > { %v5283_v45 = vadd.f32 %v5282_v29, %v5281_v1 }
 0x765   : > { %v5284_v5 = vrot.slane %v5283_v45, 4 }
 0x767   : > { %v5285_v44 = vadd.f32 %v5284_v5, %v5283_v45 }
 0x769   : > { %v5286_v39 = vrot.slane %v5285_v44, 2 }
 0x76b   : > { %v5287_v42 = vadd.f32 %v5286_v39, %v5285_v44 }
 0x76d   : > { %v5288_v25 = vrot.slane %v5287_v42, 1 }
 0x76f   : > { %v5289_v19 = vadd.f32 %v5288_v25, %v5287_v42 }
 0x771   : > { %v5290_v58 = vmul.f32 0.00390625, %v5289_v19 }
 0x773   : > { %11938 = vmatmul.mubr.msk.f32.vlgmr.msra.gmra.mrb[6].mxu1 %vm644_vm6, %v5290_v58 }
 0x774   : > { %11941 = vmatpush3.msk.msra.mxu1 %vm1038_vm4, %v15364_v32  ;;  %11942 = vmatprep.mubr.msk.f32.mxu1 %vm13393_vm0, %v17322_v38 }
 0x775   : > { %11945 = vmatprep.subr.mxu1 %v17322_v38 }
 0x846   : > { %v5361_v59 = vpop.f32.mrb[6].mxu1 }
 0x847   : > { %v11939_v60 = vpop.f32.mrb[7].mxu1  ;;  %11943 = vmatmul.mubr.msk.f32.vlgmr.msra.gmra.mrb[8].mxu1 %vm1034_vm5, %v5361_v59 }
 0x848   : > { %11946 = vmatpush3.msra.mxu1 %v15192_v20  ;;  %11947 = vmatprep.mubr.msk.f32.mxu1 %vm13393_vm0, %v17322_v38 }
 0x849   : > { %11950 = vmatprep.subr.mxu1 %v17322_v38 }
 0x91a   : > { %v5438_v47 = vpop.f32.mrb[8].mxu1 }
 0x91b   : > { %v11944_v9 = vpop.f32.mrb[9].mxu1  ;;  %v15378_v13 = vrot.slane %v5438_v47, %v17323_v23 }
 0x91d   : > { %v15382_v33 = vsub.f32 %v15205_v62, %v15378_v13  ;;  %v15386_v37 = vsub.f32 %v15202_v61, %v15378_v13  ;;  %v15390_v20 = vsub.f32 %v15215_v14, %v15378_v13  ;;  %v15394_v7 = vsub.f32 %v15212_v4, %v15378_v13 }
 0x91e   : > { %v15402_v62 = vsub.f32 %v15225_v52, %v15378_v13  ;;  %v15408_v14 = vsub.f32 %v15222_v41, %v15378_v13  ;;  %v15416_v11 = vsub.f32 %v15235_v6, %v15378_v13  ;;  %v15423_v41 = vsub.f32 %v15232_v15, %v15378_v13 }
 0x91f   : > { %v5478_v57 = vmul.f32 %v15382_v33, %v15382_v33  ;;  %v5479_v12 = vmul.f32 %v15386_v37, %v15386_v37  ;;  %v5480_v61 = vmul.f32 %v15390_v20, %v15390_v20  ;;  %v5481_v4 = vmul.f32 %v15394_v7, %v15394_v7 }
 0x920   : > { %v5482_v52 = vmul.f32 %v15402_v62, %v15402_v62  ;;  %v5483_v24 = vmul.f32 %v15408_v14, %v15408_v14  ;;  %v15430_v6 = vsub.f32 %v15245_v28, %v15378_v13  ;;  %v5484_v29 = vmul.f32 %v15416_v11, %v15416_v11 }
 0x921   : > { %v5510_v40 = vsel %vm644_vm6, %v5478_v57, 0.0  ;;  %v5511_v10 = vsel %vm644_vm6, %v5479_v12, 0.0  ;;  %v5513_v2 = vsel %vm644_vm6, %v5480_v61, 0.0  ;;  %v5515_v63 = vsel %vm644_vm6, %v5481_v4, 0.0 }
 0x922   : > { %v5512_v46 = vadd.f32 %v5511_v10, %v5510_v40  ;;  %v5517_v45 = vsel %vm644_vm6, %v5482_v52, 0.0  ;;  %v15437_v15 = vsub.f32 %v15242_v16, %v15378_v13  ;;  %v5485_v44 = vmul.f32 %v15423_v41, %v15423_v41 }
 0x923   : > { %v5519_v39 = vsel %vm644_vm6, %v5483_v24, 0.0  ;;  %v15444_v28 = vsub.f32 %v15255_v26, %v15378_v13  ;;  %v5486_v25 = vmul.f32 %v15430_v6, %v15430_v6  ;;  %v5521_v19 = vsel %vm644_vm6, %v5484_v29, 0.0 }
 0x924   : > { %v5514_v55 = vadd.f32 %v5513_v2, %v5512_v46  ;;  %v15451_v16 = vsub.f32 %v15252_v21, %v15378_v13  ;;  %v5487_v59 = vmul.f32 %v15437_v15, %v15437_v15  ;;  %v5523_v60 = vsel %vm644_vm6, %v5485_v44, 0.0 }
 0x925   : > { %v15458_v26 = vsub.f32 %v15265_v18, %v15378_v13  ;;  %v5488_v9 = vmul.f32 %v15444_v28, %v15444_v28  ;;  %v5525_v57 = vsel %vm644_vm6, %v5486_v25, 0.0  ;;  %v15465_v21 = vsub.f32 %v15262_v43, %v15378_v13 }
 0x926   : > { %v5516_v1 = vadd.f32 %v5515_v63, %v5514_v55  ;;  %v5489_v61 = vmul.f32 %v15451_v16, %v15451_v16  ;;  %v5527_v4 = vsel %vm644_vm6, %v5487_v59, 0.0  ;;  %v15472_v18 = vsub.f32 %v15275_v8, %v15378_v13 }
 0x927   : > { %v5490_v10 = vmul.f32 %v15458_v26, %v15458_v26  ;;  %v5529_v46 = vsel %vm644_vm6, %v5488_v9, 0.0  ;;  %v15479_v43 = vsub.f32 %v15272_v51, %v15378_v13  ;;  %v5491_v2 = vmul.f32 %v15465_v21, %v15465_v21 }
 0x928   : > { %v5518_v5 = vadd.f32 %v5517_v45, %v5516_v1  ;;  %v5531_v55 = vsel %vm644_vm6, %v5489_v61, 0.0  ;;  %v15486_v8 = vsub.f32 %v15285_v50, %v15378_v13  ;;  %v5492_v63 = vmul.f32 %v15472_v18, %v15472_v18 }
 0x929   : > { %v5533_v1 = vsel %vm644_vm6, %v5490_v10, 0.0  ;;  %v15493_v51 = vsub.f32 %v15282_v34, %v15378_v13  ;;  %v5493_v45 = vmul.f32 %v15479_v43, %v15479_v43  ;;  %v15500_v50 = vsub.f32 %v15295_v22, %v15378_v13 }
 0x92a   : > { %v5520_v42 = vadd.f32 %v5519_v39, %v5518_v5  ;;  %v5535_v5 = vsel %vm644_vm6, %v5491_v2, 0.0  ;;  %v5494_v39 = vmul.f32 %v15486_v8, %v15486_v8  ;;  %v15507_v34 = vsub.f32 %v15292_v17, %v15378_v13 }
 0x92b   : > { %v15514_v22 = vsub.f32 %v15305_v48, %v15378_v13  ;;  %v15521_v17 = vsub.f32 %v15302_v31, %v15378_v13  ;;  %v15528_v48 = vsub.f32 %v15315_v27, %v15378_v13  ;;  %v15535_v31 = vsub.f32 %v15312_v49, %v15378_v13 }
 0x92c   : > { %v5522_v58 = vadd.f32 %v5521_v19, %v5520_v42  ;;  %v5537_v42 = vsel %vm644_vm6, %v5492_v63, 0.0  ;;  %v5495_v19 = vmul.f32 %v15493_v51, %v15493_v51  ;;  %v15542_v27 = vsub.f32 %v15325_v53, %v15378_v13 }
 0x92d   : > { %v15549_v49 = vsub.f32 %v15322_v56, %v15378_v13  ;;  %v15556_v53 = vsub.f32 %v15335_v35, %v15378_v13  ;;  %v15563_v56 = vsub.f32 %v15332_v3, %v15378_v13  ;;  %v15570_v35 = vsub.f32 %v15345_v54, %v15378_v13 }
 0x92e   : > { %v5524_v47 = vadd.f32 %v5523_v60, %v5522_v58  ;;  %v5539_v58 = vsel %vm644_vm6, %v5493_v45, 0.0  ;;  %v5496_v60 = vmul.f32 %v15500_v50, %v15500_v50  ;;  %v15577_v3 = vsub.f32 %v15342_v0, %v15378_v13 }
 0x92f   : > { %v15584_v54 = vsub.f32 %v15355_v36, %v15378_v13  ;;  %v15591_v0 = vsub.f32 %v15352_v30, %v15378_v13 }
 0x930   : > { %v5526_v12 = vadd.f32 %v5525_v57, %v5524_v47  ;;  %v5541_v47 = vsel %vm644_vm6, %v5494_v39, 0.0  ;;  %v5497_v57 = vmul.f32 %v15507_v34, %v15507_v34 }
 0x931   : > { %v5508_v36 = vmul.f32 %v15584_v54, %v15584_v54 }
 0x932   : > { %v5528_v40 = vadd.f32 %v5527_v4, %v5526_v12  ;;  %v5543_v12 = vsel %vm644_vm6, %v5495_v19, 0.0  ;;  %v5498_v4 = vmul.f32 %v15514_v22, %v15514_v22 }
 0x933   : > { %v5569_v30 = vsel %vm644_vm6, %v5508_v36, 0.0  ;;  %v17326_v36 = vld [vmem:[#allocation4_spill] sm:$0xff] }
 0x934   : > { %v5530_v52 = vadd.f32 %v5529_v46, %v5528_v40  ;;  %v5545_v40 = vsel %vm644_vm6, %v5496_v60, 0.0  ;;  %v5499_v46 = vmul.f32 %v15521_v17, %v15521_v17 }
 0x936   : > { %v5532_v24 = vadd.f32 %v5531_v55, %v5530_v52  ;;  %v5547_v52 = vsel %vm644_vm6, %v5497_v57, 0.0  ;;  %v5500_v55 = vmul.f32 %v15528_v48, %v15528_v48 }
 0x938   : > { %v5534_v29 = vadd.f32 %v5533_v1, %v5532_v24  ;;  %v5549_v24 = vsel %vm644_vm6, %v5498_v4, 0.0  ;;  %v5501_v1 = vmul.f32 %v15535_v31, %v15535_v31 }
 0x93a   : > { %v5536_v44 = vadd.f32 %v5535_v5, %v5534_v29  ;;  %v5551_v29 = vsel %vm644_vm6, %v5499_v46, 0.0  ;;  %v5502_v5 = vmul.f32 %v15542_v27, %v15542_v27 }
 0x93c   : > { %v5538_v25 = vadd.f32 %v5537_v42, %v5536_v44  ;;  %v5553_v44 = vsel %vm644_vm6, %v5500_v55, 0.0  ;;  %v5503_v42 = vmul.f32 %v15549_v49, %v15549_v49  ;;  %v5509_v55 = vmul.f32 %v15591_v0, %v15591_v0 }
 0x93e   : > { %v5540_v59 = vadd.f32 %v5539_v58, %v5538_v25  ;;  %v5555_v25 = vsel %vm644_vm6, %v5501_v1, 0.0  ;;  %v5504_v58 = vmul.f32 %v15556_v53, %v15556_v53  ;;  %v5571_v1 = vsel %vm644_vm6, %v5509_v55, 0.0 }
 0x940   : > { %v5542_v9 = vadd.f32 %v5541_v47, %v5540_v59  ;;  %v5557_v59 = vsel %vm644_vm6, %v5502_v5, 0.0  ;;  %v5505_v47 = vmul.f32 %v15563_v56, %v15563_v56 }
 0x942   : > { %v5544_v61 = vadd.f32 %v5543_v12, %v5542_v9  ;;  %v5559_v9 = vsel %vm644_vm6, %v5503_v42, 0.0  ;;  %v5506_v12 = vmul.f32 %v15570_v35, %v15570_v35 }
 0x944   : > { %v5546_v10 = vadd.f32 %v5545_v40, %v5544_v61  ;;  %v5561_v61 = vsel %vm644_vm6, %v5504_v58, 0.0  ;;  %v5507_v40 = vmul.f32 %v15577_v3, %v15577_v3 }
 0x946   : > { %v5548_v2 = vadd.f32 %v5547_v52, %v5546_v10  ;;  %v5563_v10 = vsel %vm644_vm6, %v5505_v47, 0.0  ;;  %v5565_v52 = vsel %vm644_vm6, %v5506_v12, 0.0  ;;  %v10455_v12 = vld [vmem:[%s17066_s12 + $0x8] sm:$0xff] }
 0x947   : > { %11955 = vmatprep.subr.mxu0 %v10455_v12 }
 0x948   : > { %v5550_v63 = vadd.f32 %v5549_v24, %v5548_v2  ;;  %v5567_v24 = vsel %vm644_vm6, %v5507_v40, 0.0  ;;  %11956 = vmatpush3.msra.mxu0 %v10455_v12 }
 0x94a   : > { %v5552_v45 = vadd.f32 %v5551_v29, %v5550_v63 }
 0x94c   : > { %v5554_v39 = vadd.f32 %v5553_v44, %v5552_v45 }
 0x94e   : > { %v5556_v19 = vadd.f32 %v5555_v25, %v5554_v39 }
 0x950   : > { %v5558_v60 = vadd.f32 %v5557_v59, %v5556_v19 }
 0x952   : > { %v5560_v57 = vadd.f32 %v5559_v9, %v5558_v60 }
 0x954   : > { %v5562_v4 = vadd.f32 %v5561_v61, %v5560_v57  ;;  %v734_v57 = vld [vmem:[%s17069_s15] sm:$0x1] }
 0x955   : > { %v15619_v61 = vld [vmem:[%s17066_s12] sm:$0xff] }
 0x956   : > { %v5564_v46 = vadd.f32 %v5563_v10, %v5562_v4  ;;  %17324 = vst [vmem:[#allocation9_spill] sm:$0xff] %v15619_v61  ;;  %v17325_v4 = vld [vmem:[#allocation3_spill] sm:$0xff]  ;;  %v813_v10 = vld [vmem:[%s17071_s17] sm:$0x1] }
 0x957   : > { %v806_v40 = vadd.f32 %v17325_v4, %v734_v57  ;;  %v10422_v4 = vld [vmem:[%s17065_s11] ss:$0 sm:$0xff] }
 0x958   : > { %v5566_v2 = vadd.f32 %v5565_v52, %v5564_v46  ;;  %v881_v52 = vadd.f32 %v17326_v36, %v813_v10 }
 0x959   : > { %v5841_v46 = vadd.f32 1.0, %v806_v40 }
 0x95a   : > { %v5568_v63 = vadd.f32 %v5567_v24, %v5566_v2 }
 0x95b   : > { %v15631_v24 = vrot.slane %v5841_v46, %v17323_v23 }
 0x95c   : > { %v5570_v13 = vadd.f32 %v5569_v30, %v5568_v63  ;;  %v15634_v63 = vrot.slane %v881_v52, %v17323_v23 }
 0x95e   : > { %v5572_v29 = vadd.f32 %v5571_v1, %v5570_v13 }
 0x960   : > { %v5573_v45 = vrot.slane %v5572_v29, 4 }
 0x962   : > { %v5574_v5 = vadd.f32 %v5573_v45, %v5572_v29 }
 0x964   : > { %v5575_v44 = vrot.slane %v5574_v5, 2 }
 0x966   : > { %v5576_v39 = vadd.f32 %v5575_v44, %v5574_v5 }
 0x968   : > { %v5577_v42 = vrot.slane %v5576_v39, 1 }
 0x96a   : > { %v5578_v25 = vadd.f32 %v5577_v42, %v5576_v39 }
 0x96c   : > { %v5579_v19 = vmul.f32 0.00390625, %v5578_v25 }
 0x96e   : > { %11948 = vmatmul.mubr.msk.f32.vlgmr.msra.gmra.mrb[10].mxu1 %vm644_vm6, %v5579_v19 }
 0x96f   : > { %11951 = vmatpush3.msk.msra.mxu1 %vm1038_vm4, %v15364_v32  ;;  %11952 = vmatprep.mubr.msk.f32.mxu1 %vm13393_vm0, %v17322_v38  ;;  %v6203_v38 = vld [vmem:[#allocation2 + $0x1] sm:$0xff]  ;;  %v6204_v32 = vld [vmem:[#allocation2 + $0x9] sm:$0xff] }
 0x970   : > { %12467 = vmatprep.subr.mxu1 %v10455_v12  ;;  %11957 = vmatprep.mubr.msk.f32.mxu0 %vm644_vm6, %v6203_v38 }
 0x971   : > { %11958 = vmatmul.mubr.msk.f32.vlgmr.msra.gmra.mrb[38].mxu0 %vm644_vm6, %v6204_v32 }
 0xa41   : > { %v5649_v58 = vpop.f32.mrb[10].mxu1 }
 0xa42   : > { %v11949_v59 = vpop.f32.mrb[11].mxu1  ;;  %11953 = vmatmul.mubr.msk.f32.vlgmr.msra.gmra.mrb[12].mxu1 %vm1034_vm5, %v5649_v58 }
 0xa43   : > { %12468 = vmatpush3.msra.mxu1 %v10455_v12 }
 0xa44   : > { %12005 = vmatprep.subr.mxu1 %v15619_v61 }
 0xb15   : > { %v5722_v60 = vpop.f32.mrb[12].mxu1 }
 0xb16   : > { %v5723_v47 = vadd.f32 1e-05, %v5722_v60  ;;  %v11954_v9 = vpop.f32.mrb[13].mxu1 }
 0xb18   : > { %13222 = vrsqrt.f32 %v5723_v47 }
 0xb22   : > { %v13223_v2 = vpop.eup %13222 }
 0xb23   : > { %v5730_v55 = vrot.slane %v13223_v2, %v17323_v23 }
 0xb25   : > { %v5731_v30 = vmul.f32 %v5730_v55, %v15382_v33  ;;  %v5732_v13 = vmul.f32 %v5730_v55, %v15386_v37  ;;  %v5733_v1 = vmul.f32 %v5730_v55, %v15390_v20  ;;  %v5734_v29 = vmul.f32 %v5730_v55, %v15394_v7 }
 0xb26   : > { %v5735_v45 = vmul.f32 %v5730_v55, %v15402_v62  ;;  %v5736_v5 = vmul.f32 %v5730_v55, %v15408_v14  ;;  %v5737_v44 = vmul.f32 %v5730_v55, %v15416_v11  ;;  %v5738_v39 = vmul.f32 %v5730_v55, %v15423_v41 }
 0xb27   : > { %v5739_v42 = vmul.f32 %v5730_v55, %v15430_v6  ;;  %v5740_v23 = vmul.f32 %v5730_v55, %v15437_v15  ;;  %v5741_v33 = vmul.f32 %v5730_v55, %v15444_v28  ;;  %v5742_v37 = vmul.f32 %v5730_v55, %v15451_v16  ;;  %v10421_v28 = vld [vmem:[%s17064_s10] ss:$0 sm:$0xff] }
 0xb28   : > { %v5743_v20 = vmul.f32 %v5730_v55, %v15458_v26  ;;  %v5744_v7 = vmul.f32 %v5730_v55, %v15465_v21  ;;  %v5745_v62 = vmul.f32 %v5730_v55, %v15472_v18  ;;  %v5746_v14 = vmul.f32 %v5730_v55, %v15479_v43 }
 0xb29   : > { %v5747_v11 = vmul.f32 %v5730_v55, %v15486_v8  ;;  %v5748_v41 = vmul.f32 %v5730_v55, %v15493_v51  ;;  %v5749_v6 = vmul.f32 %v5730_v55, %v15500_v50  ;;  %v5750_v15 = vmul.f32 %v5730_v55, %v15507_v34 }
 0xb2a   : > { %v5751_v16 = vmul.f32 %v5730_v55, %v15514_v22  ;;  %v5752_v26 = vmul.f32 %v5730_v55, %v15521_v17  ;;  %v5753_v21 = vmul.f32 %v5730_v55, %v15528_v48  ;;  %v5754_v18 = vmul.f32 %v5730_v55, %v15535_v31 }
 0xb2b   : > { %v5755_v43 = vmul.f32 %v5730_v55, %v15542_v27  ;;  %v5756_v8 = vmul.f32 %v5730_v55, %v15549_v49  ;;  %v5757_v51 = vmul.f32 %v5730_v55, %v15556_v53  ;;  %v5758_v50 = vmul.f32 %v5730_v55, %v15563_v56 }
 0xb2c   : > { %v5759_v34 = vmul.f32 %v5730_v55, %v15570_v35  ;;  %v5760_v25 = vmul.f32 %v5730_v55, %v15577_v3  ;;  %v5761_v22 = vmul.f32 %v5730_v55, %v15584_v54  ;;  %v5762_v17 = vmul.f32 %v5730_v55, %v15591_v0 }
 0xb2d   : > { %v5770_v19 = vmul.f32 %v10421_v28, %v5731_v30  ;;  %v5771_v48 = vmul.f32 %v10421_v28, %v5732_v13  ;;  %v5772_v58 = vmul.f32 %v10421_v28, %v5733_v1  ;;  %v5773_v31 = vmul.f32 %v10421_v28, %v5734_v29 }
 0xb2e   : > { %v5774_v59 = vmul.f32 %v10421_v28, %v5735_v45  ;;  %v5775_v27 = vmul.f32 %v10421_v28, %v5736_v5  ;;  %v5776_v60 = vmul.f32 %v10421_v28, %v5737_v44  ;;  %v5777_v49 = vmul.f32 %v10421_v28, %v5738_v39 }
 0xb2f   : > { %v5778_v47 = vmul.f32 %v10421_v28, %v5739_v42  ;;  %v5779_v53 = vmul.f32 %v10421_v28, %v5740_v23  ;;  %v5780_v9 = vmul.f32 %v10421_v28, %v5741_v33  ;;  %v5781_v56 = vmul.f32 %v10421_v28, %v5742_v37 }
 0xb30   : > { %v5782_v57 = vmul.f32 %v10421_v28, %v5743_v20  ;;  %v5783_v35 = vmul.f32 %v10421_v28, %v5744_v7  ;;  %v5784_v12 = vmul.f32 %v10421_v28, %v5745_v62  ;;  %v5785_v3 = vmul.f32 %v10421_v28, %v5746_v14 }
 0xb31   : > { %v5786_v38 = vmul.f32 %v10421_v28, %v5747_v11  ;;  %v5787_v54 = vmul.f32 %v10421_v28, %v5748_v41  ;;  %v5788_v32 = vmul.f32 %v10421_v28, %v5749_v6  ;;  %v5789_v0 = vmul.f32 %v10421_v28, %v5750_v15 }
 0xb32   : > { %v5790_v40 = vmul.f32 %v10421_v28, %v5751_v16  ;;  %v5791_v10 = vmul.f32 %v10421_v28, %v5752_v26  ;;  %v5792_v46 = vmul.f32 %v10421_v28, %v5753_v21  ;;  %v5793_v36 = vmul.f32 %v10421_v28, %v5754_v18 }
 0xb33   : > { %v5794_v52 = vmul.f32 %v10421_v28, %v5755_v43  ;;  %v5795_v2 = vmul.f32 %v10421_v28, %v5756_v8  ;;  %v5796_v55 = vmul.f32 %v10421_v28, %v5757_v51  ;;  %v5797_v30 = vmul.f32 %v10421_v28, %v5758_v50 }
 0xb34   : > { %v5798_v13 = vmul.f32 %v10421_v28, %v5759_v34  ;;  %v5799_v1 = vmul.f32 %v10421_v28, %v5760_v25  ;;  %v5800_v29 = vmul.f32 %v10421_v28, %v5761_v22  ;;  %v5801_v45 = vmul.f32 %v10421_v28, %v5762_v17 }
 0xb35   : > { %v5809_v5 = vadd.f32 %v10422_v4, %v5770_v19  ;;  %v5810_v44 = vadd.f32 %v10422_v4, %v5771_v48  ;;  %v5811_v39 = vadd.f32 %v10422_v4, %v5772_v58  ;;  %v5812_v42 = vadd.f32 %v10422_v4, %v5773_v31 }
 0xb36   : > { %v5813_v23 = vadd.f32 %v10422_v4, %v5774_v59  ;;  %v5814_v33 = vadd.f32 %v10422_v4, %v5775_v27  ;;  %v5815_v37 = vadd.f32 %v10422_v4, %v5776_v60  ;;  %v5816_v20 = vadd.f32 %v10422_v4, %v5777_v49 }
 0xb37   : > { %v5817_v7 = vadd.f32 %v10422_v4, %v5778_v47  ;;  %v5818_v62 = vadd.f32 %v10422_v4, %v5779_v53  ;;  %v5819_v14 = vadd.f32 %v10422_v4, %v5780_v9  ;;  %v5820_v11 = vadd.f32 %v10422_v4, %v5781_v56 }
 0xb38   : > { %v5821_v41 = vadd.f32 %v10422_v4, %v5782_v57  ;;  %v5822_v6 = vadd.f32 %v10422_v4, %v5783_v35  ;;  %v5823_v15 = vadd.f32 %v10422_v4, %v5784_v12  ;;  %v5824_v16 = vadd.f32 %v10422_v4, %v5785_v3 }
 0xb39   : > { %v5825_v26 = vadd.f32 %v10422_v4, %v5786_v38  ;;  %v5826_v21 = vadd.f32 %v10422_v4, %v5787_v54  ;;  %v5827_v18 = vadd.f32 %v10422_v4, %v5788_v32  ;;  %v5828_v28 = vadd.f32 %v10422_v4, %v5789_v0 }
 0xb3a   : > { %v5829_v43 = vadd.f32 %v10422_v4, %v5790_v40  ;;  %v5830_v8 = vadd.f32 %v10422_v4, %v5791_v10  ;;  %v5831_v51 = vadd.f32 %v10422_v4, %v5792_v46  ;;  %v5832_v50 = vadd.f32 %v10422_v4, %v5793_v36 }
 0xb3b   : > { %v5833_v34 = vadd.f32 %v10422_v4, %v5794_v52  ;;  %v5834_v25 = vadd.f32 %v10422_v4, %v5795_v2  ;;  %v5835_v22 = vadd.f32 %v10422_v4, %v5796_v55  ;;  %v5836_v17 = vadd.f32 %v10422_v4, %v5797_v30 }
 0xb3c   : > { %v5837_v19 = vadd.f32 %v10422_v4, %v5798_v13  ;;  %v5838_v48 = vadd.f32 %v10422_v4, %v5799_v1  ;;  %v5839_v58 = vadd.f32 %v10422_v4, %v5800_v29  ;;  %v5840_v31 = vadd.f32 %v10422_v4, %v5801_v45 }
 0xb3d   : > { %v5846_v59 = vmul.f32 %v15631_v24, %v5809_v5  ;;  %v5847_v27 = vmul.f32 %v15631_v24, %v5810_v44  ;;  %v5848_v60 = vmul.f32 %v15631_v24, %v5811_v39  ;;  %v5849_v49 = vmul.f32 %v15631_v24, %v5812_v42 }
 0xb3e   : > { %v5850_v47 = vmul.f32 %v15631_v24, %v5813_v23  ;;  %v5851_v53 = vmul.f32 %v15631_v24, %v5814_v33  ;;  %v5852_v9 = vmul.f32 %v15631_v24, %v5815_v37  ;;  %v5853_v56 = vmul.f32 %v15631_v24, %v5816_v20 }
 0xb3f   : > { %v5854_v57 = vmul.f32 %v15631_v24, %v5817_v7  ;;  %v5855_v35 = vmul.f32 %v15631_v24, %v5818_v62  ;;  %v5856_v12 = vmul.f32 %v15631_v24, %v5819_v14  ;;  %v5857_v3 = vmul.f32 %v15631_v24, %v5820_v11 }
 0xb40   : > { %v5858_v38 = vmul.f32 %v15631_v24, %v5821_v41  ;;  %v5859_v54 = vmul.f32 %v15631_v24, %v5822_v6  ;;  %v5860_v32 = vmul.f32 %v15631_v24, %v5823_v15  ;;  %v5861_v0 = vmul.f32 %v15631_v24, %v5824_v16 }
 0xb41   : > { %v5862_v4 = vmul.f32 %v15631_v24, %v5825_v26  ;;  %v5863_v40 = vmul.f32 %v15631_v24, %v5826_v21  ;;  %v5864_v10 = vmul.f32 %v15631_v24, %v5827_v18  ;;  %v5865_v46 = vmul.f32 %v15631_v24, %v5828_v28 }
 0xb42   : > { %v5866_v36 = vmul.f32 %v15631_v24, %v5829_v43  ;;  %v5867_v52 = vmul.f32 %v15631_v24, %v5830_v8  ;;  %v5868_v2 = vmul.f32 %v15631_v24, %v5831_v51  ;;  %v5869_v55 = vmul.f32 %v15631_v24, %v5832_v50 }
 0xb43   : > { %v5870_v30 = vmul.f32 %v15631_v24, %v5833_v34  ;;  %v5871_v13 = vmul.f32 %v15631_v24, %v5834_v25  ;;  %v5872_v1 = vmul.f32 %v15631_v24, %v5835_v22  ;;  %v5873_v29 = vmul.f32 %v15631_v24, %v5836_v17 }
 0xb44   : > { %v5874_v45 = vmul.f32 %v15631_v24, %v5837_v19  ;;  %v5875_v5 = vmul.f32 %v15631_v24, %v5838_v48  ;;  %v5876_v44 = vmul.f32 %v15631_v24, %v5839_v58  ;;  %v5877_v39 = vmul.f32 %v15631_v24, %v5840_v31 }
 0xb45   : > { %v15707_v42 = vadd.f32 %v15634_v63, %v5846_v59  ;;  %v15710_v23 = vadd.f32 %v15634_v63, %v5847_v27  ;;  %v15713_v33 = vadd.f32 %v15634_v63, %v5848_v60  ;;  %v15716_v37 = vadd.f32 %v15634_v63, %v5849_v49 }
 0xb46   : > { %v15719_v20 = vadd.f32 %v15634_v63, %v5850_v47  ;;  %v15722_v7 = vadd.f32 %v15634_v63, %v5851_v53  ;;  %v15725_v24 = vadd.f32 %v15634_v63, %v5852_v9  ;;  %v15728_v62 = vadd.f32 %v15634_v63, %v5853_v56 }
 0xb47   : > { %v15731_v14 = vadd.f32 %v15634_v63, %v5854_v57  ;;  %v15734_v11 = vadd.f32 %v15634_v63, %v5855_v35  ;;  %v15737_v41 = vadd.f32 %v15634_v63, %v5856_v12  ;;  %v15740_v6 = vadd.f32 %v15634_v63, %v5857_v3 }
 0xb48   : > { %v15743_v15 = vadd.f32 %v15634_v63, %v5858_v38  ;;  %v15746_v16 = vadd.f32 %v15634_v63, %v5859_v54  ;;  %v15749_v26 = vadd.f32 %v15634_v63, %v5860_v32  ;;  %v15752_v21 = vadd.f32 %v15634_v63, %v5861_v0 }
 0xb49   : > { %v15755_v18 = vadd.f32 %v15634_v63, %v5862_v4  ;;  %v15758_v28 = vadd.f32 %v15634_v63, %v5863_v40  ;;  %v15761_v43 = vadd.f32 %v15634_v63, %v5864_v10  ;;  %v15764_v8 = vadd.f32 %v15634_v63, %v5865_v46 }
 0xb4a   : > { %v15767_v51 = vadd.f32 %v15634_v63, %v5866_v36  ;;  %v15770_v50 = vadd.f32 %v15634_v63, %v5867_v52  ;;  %v15773_v34 = vadd.f32 %v15634_v63, %v5868_v2  ;;  %v15776_v25 = vadd.f32 %v15634_v63, %v5869_v55 }
 0xb4b   : > { %v15779_v22 = vadd.f32 %v15634_v63, %v5870_v30  ;;  %v15782_v17 = vadd.f32 %v15634_v63, %v5871_v13  ;;  %v15785_v19 = vadd.f32 %v15634_v63, %v5872_v1  ;;  %v15788_v48 = vadd.f32 %v15634_v63, %v5873_v29 }
 0xb4c   : > { %v15791_v58 = vadd.f32 %v15634_v63, %v5874_v45  ;;  %v15794_v31 = vadd.f32 %v15634_v63, %v5875_v5  ;;  %v15797_v59 = vadd.f32 %v15634_v63, %v5876_v44  ;;  %v15800_v27 = vadd.f32 %v15634_v63, %v5877_v39 }
 0xb4d   : > { %v10423_v60 = vmul.f32 -1.442695, %v15707_v42  ;;  %v10424_v49 = vmul.f32 -1.442695, %v15710_v23  ;;  %v10425_v47 = vmul.f32 -1.442695, %v15713_v33 }
 0xb4e   : > { %17327 = vst [vmem:[#allocation6_spill] sm:$0xff] %v15797_v59  ;;  %17328 = vst [vmem:[#allocation7_spill] sm:$0xff] %v15800_v27  ;;  %v10426_v53 = vmul.f32 -1.442695, %v15716_v37  ;;  %v10427_v9 = vmul.f32 -1.442695, %v15719_v20 }
 0xb4f   : > { %13224 = vpow2.f32 %v10423_v60  ;;  %v10428_v56 = vmul.f32 -1.442695, %v15722_v7  ;;  %v10429_v57 = vmul.f32 -1.442695, %v15725_v24  ;;  %v10430_v63 = vmul.f32 -1.442695, %v15728_v62 }
 0xb50   : > { %13226 = vpow2.f32 %v10424_v49  ;;  %v10431_v35 = vmul.f32 -1.442695, %v15731_v14  ;;  %v10432_v12 = vmul.f32 -1.442695, %v15734_v11  ;;  %v10433_v3 = vmul.f32 -1.442695, %v15737_v41 }
 0xb51   : > { %13228 = vpow2.f32 %v10425_v47  ;;  %v10434_v38 = vmul.f32 -1.442695, %v15740_v6  ;;  %v10435_v54 = vmul.f32 -1.442695, %v15743_v15  ;;  %v10436_v32 = vmul.f32 -1.442695, %v15746_v16 }
 0xb52   : > { %13230 = vpow2.f32 %v10426_v53  ;;  %v10437_v4 = vmul.f32 -1.442695, %v15749_v26  ;;  %v10438_v10 = vmul.f32 -1.442695, %v15752_v21  ;;  %v10439_v36 = vmul.f32 -1.442695, %v15755_v18 }
 0xb53   : > { %13232 = vpow2.f32 %v10427_v9  ;;  %v10440_v2 = vmul.f32 -1.442695, %v15758_v28  ;;  %v10441_v30 = vmul.f32 -1.442695, %v15761_v43  ;;  %v10442_v1 = vmul.f32 -1.442695, %v15764_v8 }
 0xb54   : > { %13234 = vpow2.f32 %v10428_v56  ;;  %v10443_v45 = vmul.f32 -1.442695, %v15767_v51  ;;  %v10444_v44 = vmul.f32 -1.442695, %v15770_v50  ;;  %v10445_v60 = vmul.f32 -1.442695, %v15773_v34 }
 0xb55   : > { %13236 = vpow2.f32 %v10429_v57  ;;  %v10446_v47 = vmul.f32 -1.442695, %v15776_v25  ;;  %v10447_v9 = vmul.f32 -1.442695, %v15779_v22  ;;  %v10448_v57 = vmul.f32 -1.442695, %v15782_v17 }
 0xb56   : > { %13238 = vpow2.f32 %v10430_v63 }
 0xb57   : > { %13240 = vpow2.f32 %v10431_v35  ;;  %v10449_v35 = vmul.f32 -1.442695, %v15785_v19 }
 0xb58   : > { %13242 = vpow2.f32 %v10432_v12 }
 0xb59   : > { %v13225_v0 = vpop.eup %13224  ;;  %13244 = vpow2.f32 %v10433_v3  ;;  %v10450_v3 = vmul.f32 -1.442695, %v15788_v48 }
 0xb5a   : > { %v13227_v40 = vpop.eup %13226  ;;  %13246 = vpow2.f32 %v10434_v38 }
 0xb5b   : > { %v13229_v46 = vpop.eup %13228  ;;  %13248 = vpow2.f32 %v10435_v54  ;;  %v10451_v54 = vmul.f32 -1.442695, %v15791_v58 }
 0xb5c   : > { %v13231_v52 = vpop.eup %13230  ;;  %13250 = vpow2.f32 %v10436_v32 }
 0xb5d   : > { %v13233_v55 = vpop.eup %13232  ;;  %13252 = vpow2.f32 %v10437_v4  ;;  %v10452_v4 = vmul.f32 -1.442695, %v15794_v31  ;;  %v6013_v61 = vadd.f32 1.0, %v13231_v52 }
 0xb5e   : > { %v13235_v13 = vpop.eup %13234  ;;  %13254 = vpow2.f32 %v10438_v10 }
 0xb5f   : > { %v13237_v29 = vpop.eup %13236  ;;  %13256 = vpow2.f32 %v10439_v36  ;;  %v10453_v36 = vmul.f32 -1.442695, %v15797_v59  ;;  %v6014_v59 = vadd.f32 1.0, %v13233_v55 }
 0xb60   : > { %v13239_v5 = vpop.eup %13238  ;;  %13258 = vpow2.f32 %v10440_v2 }
 0xb61   : > { %v13241_v39 = vpop.eup %13240  ;;  %13260 = vpow2.f32 %v10441_v30  ;;  %v10454_v30 = vmul.f32 -1.442695, %v15800_v27  ;;  %v6015_v27 = vadd.f32 1.0, %v13235_v13 }
 0xb62   : > { %v13243_v49 = vpop.eup %13242  ;;  %13262 = vpow2.f32 %v10442_v1 }
 0xb63   : > { %v13245_v53 = vpop.eup %13244  ;;  %13264 = vpow2.f32 %v10443_v45  ;;  %v6010_v45 = vadd.f32 1.0, %v13225_v0  ;;  %v6016_v0 = vadd.f32 1.0, %v13237_v29  ;;  %v6019_v55 = vadd.f32 1.0, %v13243_v49 }
 0xb64   : > { %v13247_v56 = vpop.eup %13246  ;;  %13266 = vpow2.f32 %v10444_v44  ;;  %v6020_v13 = vadd.f32 1.0, %v13245_v53 }
 0xb65   : > { %v13249_v63 = vpop.eup %13248  ;;  %13268 = vpow2.f32 %v10445_v60  ;;  %v6011_v60 = vadd.f32 1.0, %v13227_v40  ;;  %v6021_v29 = vadd.f32 1.0, %v13247_v56 }
 0xb66   : > { %v13251_v12 = vpop.eup %13250  ;;  %13270 = vpow2.f32 %v10446_v47 }
 0xb67   : > { %v13253_v38 = vpop.eup %13252  ;;  %13272 = vpow2.f32 %v10447_v9  ;;  %v6012_v9 = vadd.f32 1.0, %v13229_v46 }
 0xb68   : > { %v13255_v32 = vpop.eup %13254  ;;  %13274 = vpow2.f32 %v10448_v57 }
 0xb69   : > { %v13257_v10 = vpop.eup %13256  ;;  %13276 = vpow2.f32 %v10449_v35  ;;  %v6025_v49 = vadd.f32 1.0, %v13255_v32 }
 0xb6a   : > { %v13259_v2 = vpop.eup %13258  ;;  %13278 = vpow2.f32 %v10450_v3  ;;  %v6026_v56 = vadd.f32 1.0, %v13257_v10 }
 0xb6b   : > { %v13261_v1 = vpop.eup %13260  ;;  %13280 = vpow2.f32 %v10451_v54 }
 0xb6c   : > { %v13263_v44 = vpop.eup %13262  ;;  %13282 = vpow2.f32 %v10452_v4  ;;  %v6017_v4 = vadd.f32 1.0, %v13239_v5  ;;  %v6022_v5 = vadd.f32 1.0, %v13249_v63  ;;  %v6028_v32 = vadd.f32 1.0, %v13261_v1 }
 0xb6d   : > { %v13265_v47 = vpop.eup %13264  ;;  %13284 = vpow2.f32 %v10453_v36  ;;  %v6018_v36 = vadd.f32 1.0, %v13241_v39  ;;  %v6023_v39 = vadd.f32 1.0, %v13251_v12  ;;  %v6029_v10 = vadd.f32 1.0, %v13263_v44 }
 0xb6e   : > { %v15834_v57 = vpop.eup %13266  ;;  %13286 = vpow2.f32 %v10454_v30 }
 0xb6f   : > { %v15836_v35 = vpop.eup %13268  ;;  %13288 = vrcp.f32 %v6010_v45 }
 0xb70   : > { %v15838_v3 = vpop.eup %13270  ;;  %13290 = vrcp.f32 %v6011_v60 }
 0xb71   : > { %v15840_v54 = vpop.eup %13272  ;;  %13292 = vrcp.f32 %v6012_v9  ;;  %v6024_v9 = vadd.f32 1.0, %v13253_v38 }
 0xb72   : > { %v15842_v40 = vpop.eup %13274  ;;  %13294 = vrcp.f32 %v6013_v61 }
 0xb73   : > { %v15844_v46 = vpop.eup %13276  ;;  %13296 = vrcp.f32 %v6014_v59 }
 0xb74   : > { %v15846_v52 = vpop.eup %13278  ;;  %13298 = vrcp.f32 %v6015_v27 }
 0xb75   : > { %v15848_v30 = vpop.eup %13280  ;;  %13300 = vrcp.f32 %v6016_v0 }
 0xb76   : > { %v15850_v45 = vpop.eup %13282  ;;  %13302 = vrcp.f32 %v6017_v4 }
 0xb77   : > { %v15852_v60 = vpop.eup %13284  ;;  %13304 = vrcp.f32 %v6018_v36  ;;  %v6027_v36 = vadd.f32 1.0, %v13259_v2 }
 0xb78   : > { %v15854_v61 = vpop.eup %13286  ;;  %13306 = vrcp.f32 %v6019_v55  ;;  %v6030_v55 = vadd.f32 1.0, %v13265_v47  ;;  %v6032_v47 = vadd.f32 1.0, %v15836_v35  ;;  %v6034_v35 = vadd.f32 1.0, %v15840_v54 }
 0xb79   : > { %v13289_v59 = vpop.eup %13288  ;;  %13308 = vrcp.f32 %v6020_v13  ;;  %v6031_v13 = vadd.f32 1.0, %v15834_v57  ;;  %v6033_v57 = vadd.f32 1.0, %v15838_v3  ;;  %v6035_v3 = vadd.f32 1.0, %v15842_v40 }
 0xb7a   : > { %v13291_v27 = vpop.eup %13290  ;;  %13310 = vrcp.f32 %v6021_v29  ;;  %v15857_v53 = vmul.f32 %v13289_v59, %v15707_v42 }
 0xb7b   : > { %v13293_v0 = vpop.eup %13292  ;;  %13312 = vrcp.f32 %v6022_v5  ;;  %v15860_v4 = vmul.f32 %v13291_v27, %v15710_v23 }
 0xb7c   : > { %v13295_v63 = vpop.eup %13294  ;;  %13314 = vrcp.f32 %v6023_v39  ;;  %v15863_v12 = vmul.f32 %v13293_v0, %v15713_v33  ;;  %6138 = vst.msk [vmem:[#allocation2 + $0x19] sm:$0xff] %vm644_vm6, %v15857_v53 }
 0xb7d   : > { %v13297_v38 = vpop.eup %13296  ;;  %13316 = vrcp.f32 %v6024_v9  ;;  %v15868_v42 = vmul.f32 %v13295_v63, %v15716_v37  ;;  %6139 = vst.msk [vmem:[#allocation2 + $0x21] sm:$0xff] %vm644_vm6, %v15860_v4 }
 0xb7e   : > { %v13299_v23 = vpop.eup %13298  ;;  %13318 = vrcp.f32 %v6025_v49  ;;  %v15873_v2 = vmul.f32 %v13297_v38, %v15719_v20  ;;  %6140 = vst.msk [vmem:[#allocation2 + $0x31] sm:$0xff] %vm644_vm6, %v15863_v12  ;;  %v6037_v49 = vadd.f32 1.0, %v15846_v52  ;;  %v6040_v38 = vadd.f32 1.0, %v15852_v60 }
 0xb7f   : > { %v13301_v33 = vpop.eup %13300  ;;  %13320 = vrcp.f32 %v6026_v56  ;;  %v15878_v1 = vmul.f32 %v13299_v23, %v15722_v7  ;;  %6141 = vst.msk [vmem:[#allocation2 + $0x39] sm:$0xff] %vm644_vm6, %v15868_v42 }
 0xb80   : > { %v13303_v37 = vpop.eup %13302  ;;  %13322 = vrcp.f32 %v6027_v36  ;;  %v15884_v44 = vmul.f32 %v13301_v33, %v15725_v24  ;;  %6142 = vst.msk [vmem:[#allocation2 + $0x49] sm:$0xff] %vm644_vm6, %v15873_v2 }
 0xb81   : > { %v13305_v20 = vpop.eup %13304  ;;  %13324 = vrcp.f32 %v6028_v32  ;;  %v15890_v7 = vmul.f32 %v13303_v37, %v15728_v62  ;;  %6143 = vst.msk [vmem:[#allocation2 + $0x51] sm:$0xff] %vm644_vm6, %v15878_v1  ;;  %v6041_v32 = vadd.f32 1.0, %v15854_v61 }
 0xb82   : > { %v13307_v29 = vpop.eup %13306  ;;  %13326 = vrcp.f32 %v6029_v10  ;;  %v15896_v24 = vmul.f32 %v13305_v20, %v15731_v14  ;;  %6144 = vst.msk [vmem:[#allocation2 + $0x61] sm:$0xff] %vm644_vm6, %v15884_v44 }
 0xb83   : > { %v13309_v5 = vpop.eup %13308  ;;  %13328 = vrcp.f32 %v6030_v55  ;;  %v15902_v62 = vmul.f32 %v13307_v29, %v15734_v11  ;;  %6145 = vst.msk [vmem:[#allocation2 + $0x69] sm:$0xff] %vm644_vm6, %v15890_v7  ;;  %v6205_v39 = vld [vmem:[#allocation2 + $0x19] sm:$0xff]  ;;  %v6036_v11 = vadd.f32 1.0, %v15844_v46  ;;  %v6038_v46 = vadd.f32 1.0, %v15848_v30 }
 0xb84   : > { %v13311_v59 = vpop.eup %13310  ;;  %13330 = vrcp.f32 %v6031_v13  ;;  %v15908_v14 = vmul.f32 %v13309_v5, %v15737_v41  ;;  %6146 = vst.msk [vmem:[#allocation2 + $0x79] sm:$0xff] %vm644_vm6, %v15896_v24  ;;  %11960 = vmatprep.mubr.msk.f32.mxu0 %vm644_vm6, %v6205_v39  ;;  %v6206_v54 = vld [vmem:[#allocation2 + $0x21] sm:$0xff] }
 0xb85   : > { %v13313_v9 = vpop.eup %13312  ;;  %13332 = vrcp.f32 %v6032_v47  ;;  %v15915_v27 = vmul.f32 %v13311_v59, %v15740_v6  ;;  %6147 = vst.msk [vmem:[#allocation2 + $0x81] sm:$0xff] %vm644_vm6, %v15902_v62  ;;  %11961 = vmatmul.mubr.msk.f32.gmra.mrb[40].mxu0 %vm644_vm6, %v6206_v54  ;;  %v15920_v41 = vld [vmem:[#allocation2 + $0x31] sm:$0xff] }
 0xb86   : > { %17329 = vst [vmem:[#allocation8_spill] sm:$0xff] %v15920_v41  ;;  %v13315_v40 = vpop.eup %13314  ;;  %13334 = vrcp.f32 %v6033_v57  ;;  %v15924_v0 = vmul.f32 %v13313_v9, %v15743_v15  ;;  %6148 = vst.msk [vmem:[#allocation2 + $0x91] sm:$0xff] %vm644_vm6, %v15908_v14  ;;  %11963 = vmatprep.mubr.msk.f32.mxu0 %vm644_vm6, %v15920_v41  ;;  %v6039_v15 = vadd.f32 1.0, %v15850_v45  ;;  %v15942_v36 = vld [vmem:[#allocation2 + $0x39] sm:$0xff] }
 0xb87   : > { %v13317_v6 = vpop.eup %13316  ;;  %13336 = vrcp.f32 %v6034_v35  ;;  %v15932_v56 = vmul.f32 %v13315_v40, %v15746_v16  ;;  %6149 = vst.msk [vmem:[#allocation2 + $0x99] sm:$0xff] %vm644_vm6, %v15915_v27  ;;  %17330 = vst [vmem:[#allocation19_spill] sm:$0xff] %v15942_v36  ;;  %v10520_v40 = vld [vmem:[%s17066_s12 + $0x10] sm:$0xff] }
 0xb88   : > { %v13319_v52 = vpop.eup %13318  ;;  %13338 = vrcp.f32 %v6035_v3  ;;  %v15938_v63 = vmul.f32 %v13317_v6, %v15749_v26  ;;  %6150 = vst.msk [vmem:[#allocation2 + $0xa9] sm:$0xff] %vm644_vm6, %v15924_v0  ;;  %v15952_v26 = vld [vmem:[#allocation2 + $0x49] sm:$0xff] }
 0xb89   : > { %v13321_v30 = vpop.eup %13320  ;;  %13340 = vrcp.f32 %v6036_v11  ;;  %v15946_v16 = vmul.f32 %v13319_v52, %v15752_v21  ;;  %6151 = vst.msk [vmem:[#allocation2 + $0xb1] sm:$0xff] %vm644_vm6, %v15932_v56  ;;  %11964 = vmatmul.mubr.msk.f32.gmra.mrb[42].mxu0 %vm644_vm6, %v15942_v36  ;;  %17331 = vst [vmem:[#allocation20_spill] sm:$0xff] %v15952_v26  ;;  %v17345_v52 = vld [vmem:[#allocation6_spill] sm:$0xff] }
 0xb8a   : > { %v13323_v45 = vpop.eup %13322  ;;  %13342 = vrcp.f32 %v6037_v49  ;;  %v15956_v23 = vmul.f32 %v13321_v30, %v15755_v18  ;;  %6152 = vst.msk [vmem:[#allocation2 + $0xc1] sm:$0xff] %vm644_vm6, %v15938_v63  ;;  %11966 = vmatprep.mubr.msk.f32.mxu0 %vm644_vm6, %v15952_v26  ;;  %v15972_v18 = vld [vmem:[#allocation2 + $0x51] sm:$0xff]  ;;  %v17347_v30 = vld [vmem:[#allocation9_spill] sm:$0xff] }
 0xb8b   : > { %v13325_v21 = vpop.eup %13324  ;;  %13344 = vrcp.f32 %v6038_v46  ;;  %v15963_v60 = vmul.f32 %v13323_v45, %v15758_v28  ;;  %6153 = vst.msk [vmem:[#allocation2 + $0xc9] sm:$0xff] %vm644_vm6, %v15946_v16  ;;  %17332 = vst [vmem:[#allocation21_spill] sm:$0xff] %v15972_v18  ;;  %v15981_v28 = vld [vmem:[#allocation2 + $0x61] sm:$0xff] }
 0xb8c   : > { %v13327_v10 = vpop.eup %13326  ;;  %13346 = vrcp.f32 %v6039_v15  ;;  %v15968_v61 = vmul.f32 %v13325_v21, %v15761_v43  ;;  %6154 = vst.msk [vmem:[#allocation2 + $0xd9] sm:$0xff] %vm644_vm6, %v15956_v23  ;;  %17333 = vst [vmem:[#allocation22_spill] sm:$0xff] %v15981_v28  ;;  %v6879_v36 = vld [vmem:[#allocation2 + $0x2] sm:$0xff] }
 0xb8d   : > { %v13329_v33 = vpop.eup %13328  ;;  %13348 = vrcp.f32 %v6040_v38  ;;  %v15975_v55 = vmul.f32 %v13327_v10, %v15764_v8  ;;  %6155 = vst.msk [vmem:[#allocation2 + $0xe1] sm:$0xff] %vm644_vm6, %v15963_v60  ;;  %11967 = vmatmul.mubr.msk.f32.gmra.mrb[44].mxu0 %vm644_vm6, %v15972_v18  ;;  %v16039_v9 = vld [vmem:[#allocation2 + $0x91] sm:$0xff] }
 0xb8e   : > { %v13331_v43 = vpop.eup %13330  ;;  %13350 = vrcp.f32 %v6041_v32  ;;  %v15984_v37 = vmul.f32 %v13329_v33, %v15767_v51  ;;  %6156 = vst.msk [vmem:[#allocation2 + $0xf1] sm:$0xff] %vm644_vm6, %v15968_v61  ;;  %11969 = vmatprep.mubr.msk.f32.mxu0 %vm644_vm6, %v15981_v28  ;;  %v16000_v51 = vld [vmem:[#allocation2 + $0x69] sm:$0xff]  ;;  %17340 = vst [vmem:[#allocation29_spill] sm:$0xff] %v16039_v9 }
 0xb8f   : > { %v13333_v8 = vpop.eup %13332  ;;  %v15991_v13 = vmul.f32 %v13331_v43, %v15770_v50  ;;  %6157 = vst.msk [vmem:[#allocation2 + $0xf9] sm:$0xff] %vm644_vm6, %v15975_v55  ;;  %17334 = vst [vmem:[#allocation23_spill] sm:$0xff] %v16000_v51  ;;  %v16009_v50 = vld [vmem:[#allocation2 + $0x79] sm:$0xff]  ;;  %v17349_v38 = vld [vmem:[#allocation7_spill] sm:$0xff] }
 0xb90   : > { %v13335_v20 = vpop.eup %13334  ;;  %v15996_v47 = vmul.f32 %v13333_v8, %v15773_v34  ;;  %6158 = vst.msk [vmem:[#allocation2 + $0x109] sm:$0xff] %vm644_vm6, %v15984_v37  ;;  %17335 = vst [vmem:[#allocation24_spill] sm:$0xff] %v16009_v50  ;;  %v16081_v32 = vld [vmem:[#allocation2 + $0xa9] sm:$0xff]  ;;  %v16097_v33 = vld [vmem:[#allocation2 + $0xb1] sm:$0xff] }
 0xb91   : > { %v13337_v29 = vpop.eup %13336  ;;  %v16003_v57 = vmul.f32 %v13335_v20, %v15776_v25  ;;  %6159 = vst.msk [vmem:[#allocation2 + $0x111] sm:$0xff] %vm644_vm6, %v15991_v13  ;;  %11970 = vmatmul.mubr.msk.f32.gmra.mrb[46].mxu0 %vm644_vm6, %v16000_v51  ;;  %17351 = vst [vmem:[#allocation37_spill] sm:$0xff] %v16081_v32  ;;  %v16101_v43 = vld [vmem:[#allocation2 + $0xc1] sm:$0xff] }
 0xb92   : > { %v13339_v5 = vpop.eup %13338  ;;  %v16012_v34 = vmul.f32 %v13337_v29, %v15779_v22  ;;  %6160 = vst.msk [vmem:[#allocation2 + $0x121] sm:$0xff] %vm644_vm6, %v15996_v47  ;;  %11972 = vmatprep.mubr.msk.f32.mxu0 %vm644_vm6, %v16009_v50  ;;  %v16028_v22 = vld [vmem:[#allocation2 + $0x81] sm:$0xff]  ;;  %17354 = vst [vmem:[#allocation40_spill] sm:$0xff] %v16097_v33  ;;  %v16113_v29 = vld [vmem:[#allocation2 + $0xc9] sm:$0xff] }
 0xb93   : > { %v13341_v25 = vpop.eup %13340  ;;  %v16019_v35 = vmul.f32 %v13339_v5, %v15782_v17  ;;  %6161 = vst.msk [vmem:[#allocation2 + $0x129] sm:$0xff] %vm644_vm6, %v16003_v57  ;;  %17337 = vst [vmem:[#allocation26_spill] sm:$0xff] %v16028_v22  ;;  %v16117_v5 = vld [vmem:[#allocation2 + $0xd9] sm:$0xff] }
 0xb94   : > { %v13343_v39 = vpop.eup %13342  ;;  %v16024_v59 = vmul.f32 %v13341_v25, %v15785_v19  ;;  %6162 = vst.msk [vmem:[#allocation2 + $0x139] sm:$0xff] %vm644_vm6, %v16012_v34  ;;  %17355 = vst [vmem:[#allocation41_spill] sm:$0xff] %v16101_v43 }
 0xb95   : > { %v13345_v3 = vpop.eup %13344  ;;  %v16031_v54 = vmul.f32 %v13343_v39, %v15788_v48  ;;  %6163 = vst.msk [vmem:[#allocation2 + $0x141] sm:$0xff] %vm644_vm6, %v16019_v35  ;;  %v16035_v17 = vld [vmem:[#allocation2 + $0xf1] sm:$0xff]  ;;  %11973 = vmatmul.mubr.msk.f32.gmra.mrb[48].mxu0 %vm644_vm6, %v16028_v22  ;;  %17358 = vst [vmem:[#allocation44_spill] sm:$0xff] %v16113_v29 }
 0xb96   : > { %17336 = vst [vmem:[#allocation25_spill] sm:$0xff] %v16024_v59  ;;  %17339 = vst [vmem:[#allocation28_spill] sm:$0xff] %v16035_v17  ;;  %v13347_v19 = vpop.eup %13346  ;;  %v16042_v11 = vmul.f32 %v13345_v3, %v15791_v58  ;;  %11987 = vmatprep.mubr.msk.f32.mxu1 %vm644_vm6, %v16035_v17  ;;  %v16048_v48 = vld [vmem:[#allocation2 + $0xf9] sm:$0xff]  ;;  %11975 = vmatprep.mubr.msk.f32.mxu0 %vm644_vm6, %v16039_v9  ;;  %v16129_v3 = vld [vmem:[#allocation2 + $0xe1] sm:$0xff] }
 0xb97   : > { %17338 = vst [vmem:[#allocation27_spill] sm:$0xff] %v16031_v54  ;;  %6164 = vst.msk [vmem:[#allocation2 + $0x151] sm:$0xff] %vm644_vm6, %v16024_v59  ;;  %v13349_v49 = vpop.eup %13348  ;;  %v16056_v6 = vmul.f32 %v13347_v19, %v15794_v31  ;;  %11988 = vmatmul.mubr.msk.f32.vlgmr.msra.gmra.mrb[14].mxu1 %vm644_vm6, %v16048_v48  ;;  %v16062_v58 = vld [vmem:[#allocation2 + $0x109] sm:$0xff]  ;;  %v16072_v31 = vld [vmem:[#allocation2 + $0x99] sm:$0xff] }
 0xb98   : > { %17341 = vst [vmem:[#allocation30_spill] sm:$0xff] %v16042_v11  ;;  %17342 = vst [vmem:[#allocation31_spill] sm:$0xff] %v16048_v48  ;;  %v13351_v46 = vpop.eup %13350  ;;  %v16065_v15 = vmul.f32 %v13349_v49, %v17345_v52  ;;  %12006 = vmatpush3.msra.mxu1 %v17347_v30  ;;  %11990 = vmatprep.mubr.msk.f32.mxu1 %vm644_vm6, %v16062_v58  ;;  %v16085_v21 = vld [vmem:[#allocation2 + $0x111] sm:$0xff]  ;;  %v6171_v30 = vld [vmem:[#allocation2 + $0x8] sm:$0xff] }
 0xb99   : > { %17343 = vst [vmem:[#allocation32_spill] sm:$0xff] %v16056_v6  ;;  %6165 = vst.msk [vmem:[#allocation2 + $0x159] sm:$0xff] %vm644_vm6, %v16031_v54  ;;  %v16075_v45 = vmul.f32 %v13351_v46, %v17349_v38  ;;  %11976 = vmatmul.mubr.msk.f32.gmra.mrb[50].mxu0 %vm644_vm6, %v16072_v31  ;;  %12055 = vmatprep.subr.mxu1 %v10520_v40  ;;  %v16093_v10 = vld [vmem:[#allocation2 + $0x121] sm:$0xff]  ;;  %v16149_v38 = vld [vmem:[%s17066_s12 + $0x18] sm:$0xff] }
 0xb9a   : > { %17344 = vst [vmem:[#allocation33_spill] sm:$0xff] %v16062_v58  ;;  %17346 = vst [vmem:[#allocation34_spill] sm:$0xff] %v16065_v15  ;;  %11978 = vmatprep.mubr.msk.f32.mxu0 %vm644_vm6, %v16081_v32  ;;  %v16103_v8 = vld [vmem:[#allocation2 + $0x129] sm:$0xff]  ;;  %v6170_v46 = vld [vmem:[#allocation2] sm:$0xff] }
 0xb9b   : > { %6166 = vst.msk [vmem:[#allocation2 + $0x169] sm:$0xff] %vm644_vm6, %v16042_v11  ;;  %17348 = vst [vmem:[#allocation35_spill] sm:$0xff] %v16072_v31  ;;  %11991 = vmatmul.mubr.msk.f32.gmra.mrb[16].mxu1 %vm644_vm6, %v16085_v21  ;;  %v16109_v20 = vld [vmem:[#allocation2 + $0x139] sm:$0xff]  ;;  %v16201_v58 = vld [vmem:[#allocation2 + $0xa8] sm:$0xff]  ;;  %v16285_v11 = vpop.f32.mrb[38].mxu0 }
 0xb9c   : > { %17350 = vst [vmem:[#allocation36_spill] sm:$0xff] %v16075_v45  ;;  %6167 = vst.msk [vmem:[#allocation2 + $0x171] sm:$0xff] %vm644_vm6, %v16056_v6  ;;  %11993 = vmatprep.mubr.msk.f32.mxu1 %vm644_vm6, %v16093_v10  ;;  %v16119_v25 = vld [vmem:[#allocation2 + $0x141] sm:$0xff]  ;;  %v16205_v48 = vld [vmem:[#allocation2 + $0xb0] sm:$0xff] }
 0xb9d   : > { %6168 = vst.msk [vmem:[#allocation2 + $0x181] sm:$0xff] %vm644_vm6, %v16065_v15  ;;  %17352 = vst [vmem:[#allocation38_spill] sm:$0xff] %v16085_v21  ;;  %11979 = vmatmul.mubr.msk.f32.gmra.mrb[52].mxu0 %vm644_vm6, %v16097_v33  ;;  %v16197_v21 = vld [vmem:[#allocation2 + $0x98] sm:$0xff]  ;;  %v16209_v17 = vld [vmem:[#allocation2 + $0xc0] sm:$0xff] }
 0xb9e   : > { %6169 = vst.msk [vmem:[#allocation2 + $0x189] sm:$0xff] %vm644_vm6, %v16075_v45  ;;  %17353 = vst [vmem:[#allocation39_spill] sm:$0xff] %v16093_v10  ;;  %11981 = vmatprep.mubr.msk.f32.mxu0 %vm644_vm6, %v16101_v43  ;;  %v16125_v39 = vld [vmem:[#allocation2 + $0x151] sm:$0xff]  ;;  %v16233_v32 = vld [vmem:[#allocation2 + $0x108] sm:$0xff] }
 0xb9f   : > { %17356 = vst [vmem:[#allocation42_spill] sm:$0xff] %v16103_v8  ;;  %11994 = vmatmul.mubr.msk.f32.gmra.mrb[18].mxu1 %vm644_vm6, %v16103_v8  ;;  %17357 = vst [vmem:[#allocation43_spill] sm:$0xff] %v16109_v20  ;;  %v16189_v8 = vld [vmem:[#allocation2 + $0x80] sm:$0xff]  ;;  %v16193_v10 = vld [vmem:[#allocation2 + $0x90] sm:$0xff] }
 0xba0   : > { %11996 = vmatprep.mubr.msk.f32.mxu1 %vm644_vm6, %v16109_v20  ;;  %17359 = vst [vmem:[#allocation10_spill] sm:$0xff] %v16117_v5  ;;  %17360 = vst [vmem:[#allocation11_spill] sm:$0xff] %v16119_v25  ;;  %v16133_v19 = vld [vmem:[#allocation2 + $0x159] sm:$0xff]  ;;  %v16225_v43 = vld [vmem:[#allocation2 + $0xf0] sm:$0xff] }
 0xba1   : > { %11982 = vmatmul.mubr.msk.f32.gmra.mrb[54].mxu0 %vm644_vm6, %v16113_v29  ;;  %17361 = vst [vmem:[#allocation12_spill] sm:$0xff] %v16125_v39  ;;  %17362 = vst [vmem:[#allocation13_spill] sm:$0xff] %v16129_v3  ;;  %v16185_v20 = vld [vmem:[#allocation2 + $0x78] sm:$0xff]  ;;  %v16221_v29 = vld [vmem:[#allocation2 + $0xe0] sm:$0xff] }
 0xba2   : > { %11984 = vmatprep.mubr.msk.f32.mxu0 %vm644_vm6, %v16117_v5  ;;  %17363 = vst [vmem:[#allocation14_spill] sm:$0xff] %v16133_v19  ;;  %v16137_v49 = vld [vmem:[#allocation2 + $0x169] sm:$0xff]  ;;  %v16217_v5 = vld [vmem:[#allocation2 + $0xd8] sm:$0xff]  ;;  %v16241_v9 = vld [vmem:[#allocation2 + $0x120] sm:$0xff] }
 0xba3   : > { %11997 = vmatmul.mubr.msk.f32.gmra.mrb[20].mxu1 %vm644_vm6, %v16119_v25  ;;  %17364 = vst [vmem:[#allocation15_spill] sm:$0xff] %v16137_v49  ;;  %v16141_v52 = vld [vmem:[#allocation2 + $0x171] sm:$0xff]  ;;  %v16181_v25 = vld [vmem:[#allocation2 + $0x68] sm:$0xff]  ;;  %17367 = vst [vmem:[#allocation18_spill] sm:$0xff] %v16241_v9 }
 0xba4   : > { %11999 = vmatprep.mubr.msk.f32.mxu1 %vm644_vm6, %v16125_v39  ;;  %17365 = vst [vmem:[#allocation16_spill] sm:$0xff] %v16141_v52  ;;  %v16177_v39 = vld [vmem:[#allocation2 + $0x60] sm:$0xff]  ;;  %v16229_v33 = vld [vmem:[#allocation2 + $0xf8] sm:$0xff]  ;;  %v16237_v31 = vld [vmem:[#allocation2 + $0x110] sm:$0xff] }
 0xba5   : > { %11985 = vmatmul.mubr.msk.f32.gmra.mrb[56].mxu0 %vm644_vm6, %v16129_v3  ;;  %v16213_v3 = vld [vmem:[#allocation2 + $0xc8] sm:$0xff]  ;;  %17366 = vst [vmem:[#allocation17_spill] sm:$0xff] %v16229_v33  ;;  %v16249_v50 = vld [vmem:[#allocation2 + $0x138] sm:$0xff]  ;;  %v16253_v51 = vld [vmem:[#allocation2 + $0x140] sm:$0xff] }
 0xba6   : > { %v16245_v22 = vld [vmem:[#allocation2 + $0x128] sm:$0xff]  ;;  %v16257_v28 = vld [vmem:[#allocation2 + $0x150] sm:$0xff]  ;;  %v16261_v18 = vld [vmem:[#allocation2 + $0x158] sm:$0xff]  ;;  %17369 = vst [vmem:[#allocation3_spill] sm:$0xff] %v16285_v11 }
 0xba7   : > { %12000 = vmatmul.mubr.msk.f32.gmra.mrb[22].mxu1 %vm644_vm6, %v16133_v19  ;;  %v16152_v19 = vld [vmem:[#allocation2 + $0x18] sm:$0xff]  ;;  %17368 = vst [vmem:[#allocation5_spill] sm:$0xff] %v16261_v18  ;;  %v16265_v26 = vld [vmem:[#allocation2 + $0x168] sm:$0xff]  ;;  %v16269_v41 = vld [vmem:[#allocation2 + $0x170] sm:$0xff] }
 0xba8   : > { %12002 = vmatprep.mubr.msk.f32.mxu1 %vm644_vm6, %v16137_v49  ;;  %v16157_v49 = vld [vmem:[#allocation2 + $0x20] sm:$0xff]  ;;  %v6880_v45 = vld [vmem:[#allocation2 + $0xa] sm:$0xff]  ;;  %v16294_v59 = vld [vmem:[#allocation2 + $0x32] sm:$0xff] }
 0xba9   : > { %v16277_v15 = vld [vmem:[%s17066_s12 + $0x20] sm:$0xff]  ;;  %17371 = vst [vmem:[#allocation6_spill] sm:$0xff] %v16294_v59 }
 0xbaa   : > { %v16280_v6 = vld [vmem:[#allocation2 + $0x1a] sm:$0xff]  ;;  %v16290_v54 = vld [vmem:[#allocation2 + $0x22] sm:$0xff] }
 0xbab   : > { %12003 = vmatmul.mubr.msk.f32.gmra.mrb[24].mxu1 %vm644_vm6, %v16141_v52  ;;  %v16165_v52 = vld [vmem:[#allocation2 + $0x38] sm:$0xff]  ;;  %v16310_v11 = vld [vmem:[#allocation2 + $0x62] sm:$0xff] }
 0xbac   : > { %12007 = vmatprep.mubr.msk.f32.mxu1 %vm644_vm6, %v6170_v46  ;;  %v16161_v46 = vld [vmem:[#allocation2 + $0x30] sm:$0xff]  ;;  %17375 = vst [vmem:[#allocation46_spill] sm:$0xff] %v16310_v11 }
 0xbaf   : > { %12008 = vmatmul.mubr.msk.f32.vlgmr.msra.gmra.mrb[26].mxu1 %vm644_vm6, %v6171_v30  ;;  %v16173_v30 = vld [vmem:[#allocation2 + $0x50] sm:$0xff] }
 0xbb0   : > { %12056 = vmatpush3.msra.mxu1 %v10520_v40  ;;  %12010 = vmatprep.mubr.msk.f32.mxu1 %vm644_vm6, %v16152_v19  ;;  %v16169_v40 = vld [vmem:[#allocation2 + $0x48] sm:$0xff] }
 0xbb1   : > { %12105 = vmatprep.subr.mxu1 %v16149_v38 }
 0xbb3   : > { %12011 = vmatmul.mubr.msk.f32.gmra.mrb[28].mxu1 %vm644_vm6, %v16157_v49 }
 0xbb4   : > { %12013 = vmatprep.mubr.msk.f32.mxu1 %vm644_vm6, %v16161_v46 }
 0xbb7   : > { %12014 = vmatmul.mubr.msk.f32.gmra.mrb[30].mxu1 %vm644_vm6, %v16165_v52 }
 0xbb8   : > { %12016 = vmatprep.mubr.msk.f32.mxu1 %vm644_vm6, %v16169_v40 }
 0xbbb   : > { %12017 = vmatmul.mubr.msk.f32.gmra.mrb[32].mxu1 %vm644_vm6, %v16173_v30 }
 0xbbc   : > { %12019 = vmatprep.mubr.msk.f32.mxu1 %vm644_vm6, %v16177_v39 }
 0xbbf   : > { %12020 = vmatmul.mubr.msk.f32.gmra.mrb[34].mxu1 %vm644_vm6, %v16181_v25 }
 0xbc0   : > { %12022 = vmatprep.mubr.msk.f32.mxu1 %vm644_vm6, %v16185_v20 }
 0xbc3   : > { %12023 = vmatmul.mubr.msk.f32.gmra.mrb[36].mxu1 %vm644_vm6, %v16189_v8 }
 0xbc4   : > { %12025 = vmatprep.mubr.msk.f32.mxu1 %vm644_vm6, %v16193_v10 }
 0xbc7   : > { %12026 = vmatmul.mubr.msk.f32.gmra.mrb[38].mxu1 %vm644_vm6, %v16197_v21 }
 0xbc8   : > { %12028 = vmatprep.mubr.msk.f32.mxu1 %vm644_vm6, %v16201_v58 }
 0xbcb   : > { %12029 = vmatmul.mubr.msk.f32.gmra.mrb[40].mxu1 %vm644_vm6, %v16205_v48 }
 0xbcc   : > { %12031 = vmatprep.mubr.msk.f32.mxu1 %vm644_vm6, %v16209_v17 }
 0xbcf   : > { %12032 = vmatmul.mubr.msk.f32.gmra.mrb[42].mxu1 %vm644_vm6, %v16213_v3 }
 0xbd0   : > { %12034 = vmatprep.mubr.msk.f32.mxu1 %vm644_vm6, %v16217_v5 }
 0xbd3   : > { %12035 = vmatmul.mubr.msk.f32.gmra.mrb[44].mxu1 %vm644_vm6, %v16221_v29 }
 0xbd4   : > { %12037 = vmatprep.mubr.msk.f32.mxu1 %vm644_vm6, %v16225_v43 }
 0xbd7   : > { %12038 = vmatmul.mubr.msk.f32.gmra.mrb[14].mxu1 %vm644_vm6, %v16229_v33 }
 0xbd8   : > { %12040 = vmatprep.mubr.msk.f32.mxu1 %vm644_vm6, %v16233_v32 }
 0xbdb   : > { %12041 = vmatmul.mubr.msk.f32.gmra.mrb[16].mxu1 %vm644_vm6, %v16237_v31 }
 0xbdc   : > { %12043 = vmatprep.mubr.msk.f32.mxu1 %vm644_vm6, %v16241_v9 }
 0xbdf   : > { %12044 = vmatmul.mubr.msk.f32.gmra.mrb[18].mxu1 %vm644_vm6, %v16245_v22 }
 0xbe0   : > { %12046 = vmatprep.mubr.msk.f32.mxu1 %vm644_vm6, %v16249_v50 }
 0xbe3   : > { %12047 = vmatmul.mubr.msk.f32.gmra.mrb[20].mxu1 %vm644_vm6, %v16253_v51 }
 0xbe4   : > { %12049 = vmatprep.mubr.msk.f32.mxu1 %vm644_vm6, %v16257_v28 }
 0xbe7   : > { %12050 = vmatmul.mubr.msk.f32.gmra.mrb[22].mxu1 %vm644_vm6, %v16261_v18 }
 0xbe8   : > { %12052 = vmatprep.mubr.msk.f32.mxu1 %vm644_vm6, %v16265_v26 }
 0xbeb   : > { %12053 = vmatmul.mubr.msk.f32.gmra.mrb[24].mxu1 %vm644_vm6, %v16269_v41 }
 0xbec   : > { %12057 = vmatprep.mubr.msk.f32.mxu1 %vm644_vm6, %v6879_v36  ;;  %v16288_v36 = vpop.f32.mrb[39].mxu0 }
 0xbed   : > { %17370 = vst [vmem:[#allocation4_spill] sm:$0xff] %v16288_v36  ;;  %v16306_v36 = vld [vmem:[#allocation2 + $0x52] sm:$0xff] }
 0xbee   : > { %17374 = vst [vmem:[#allocation45_spill] sm:$0xff] %v16306_v36 }
 0xbef   : > { %12058 = vmatmul.mubr.msk.f32.vlgmr.msra.gmra.mrb[26].mxu1 %vm644_vm6, %v6880_v45  ;;  %v16298_v45 = vld [vmem:[#allocation2 + $0x3a] sm:$0xff] }
 0xbf0   : > { %12106 = vmatpush3.msra.mxu1 %v16149_v38  ;;  %12060 = vmatprep.mubr.msk.f32.mxu1 %vm644_vm6, %v16280_v6  ;;  %17372 = vst [vmem:[#allocation9_spill] sm:$0xff] %v16298_v45  ;;  %v16302_v38 = vld [vmem:[#allocation2 + $0x4a] sm:$0xff] }
 0xbf1   : > { %12155 = vmatprep.subr.mxu1 %v16277_v15  ;;  %17373 = vst [vmem:[#allocation7_spill] sm:$0xff] %v16302_v38 }
 0xbf3   : > { %12061 = vmatmul.mubr.msk.f32.gmra.mrb[28].mxu1 %vm644_vm6, %v16290_v54 }
 0xbf4   : > { %12063 = vmatprep.mubr.msk.f32.mxu1 %vm644_vm6, %v16294_v59  ;;  %v16314_v59 = vld [vmem:[#allocation2 + $0x6a] sm:$0xff] }
 0xbf5   : > { %17376 = vst [vmem:[#allocation47_spill] sm:$0xff] %v16314_v59 }
 0xbf7   : > { %12064 = vmatmul.mubr.msk.f32.gmra.mrb[30].mxu1 %vm644_vm6, %v16298_v45  ;;  %v16318_v45 = vld [vmem:[#allocation2 + $0x7a] sm:$0xff] }
 0xbf8   : > { %12066 = vmatprep.mubr.msk.f32.mxu1 %vm644_vm6, %v16302_v38  ;;  %17377 = vst [vmem:[#allocation48_spill] sm:$0xff] %v16318_v45  ;;  %v16322_v38 = vld [vmem:[#allocation2 + $0x82] sm:$0xff] }
 0xbf9   : > { %17378 = vst [vmem:[#allocation49_spill] sm:$0xff] %v16322_v38 }
 0xbfb   : > { %12067 = vmatmul.mubr.msk.f32.gmra.mrb[32].mxu1 %vm644_vm6, %v16306_v36  ;;  %v16326_v36 = vld [vmem:[#allocation2 + $0x92] sm:$0xff] }
 0xbfc   : > { %12069 = vmatprep.mubr.msk.f32.mxu1 %vm644_vm6, %v16310_v11  ;;  %17379 = vst [vmem:[#allocation50_spill] sm:$0xff] %v16326_v36  ;;  %v16330_v11 = vld [vmem:[#allocation2 + $0x9a] sm:$0xff] }
 0xbfd   : > { %17380 = vst [vmem:[#allocation51_spill] sm:$0xff] %v16330_v11 }
 0xbff   : > { %12070 = vmatmul.mubr.msk.f32.gmra.mrb[34].mxu1 %vm644_vm6, %v16314_v59  ;;  %v16334_v59 = vld [vmem:[#allocation2 + $0xaa] sm:$0xff] }
 0xc00   : > { %12072 = vmatprep.mubr.msk.f32.mxu1 %vm644_vm6, %v16318_v45  ;;  %17381 = vst [vmem:[#allocation52_spill] sm:$0xff] %v16334_v59  ;;  %v16338_v45 = vld [vmem:[#allocation2 + $0xb2] sm:$0xff] }
 0xc01   : > { %17382 = vst [vmem:[#allocation53_spill] sm:$0xff] %v16338_v45 }
 0xc03   : > { %12073 = vmatmul.mubr.msk.f32.gmra.mrb[36].mxu1 %vm644_vm6, %v16322_v38  ;;  %v16342_v38 = vld [vmem:[#allocation2 + $0xc2] sm:$0xff] }
 0xc04   : > { %12075 = vmatprep.mubr.msk.f32.mxu1 %vm644_vm6, %v16326_v36  ;;  %17383 = vst [vmem:[#allocation54_spill] sm:$0xff] %v16342_v38  ;;  %v16346_v36 = vld [vmem:[#allocation2 + $0xca] sm:$0xff] }
 0xc05   : > { %17384 = vst [vmem:[#allocation55_spill] sm:$0xff] %v16346_v36 }
 0xc07   : > { %12076 = vmatmul.mubr.msk.f32.gmra.mrb[38].mxu1 %vm644_vm6, %v16330_v11  ;;  %v16350_v11 = vld [vmem:[#allocation2 + $0xda] sm:$0xff] }
 0xc08   : > { %12078 = vmatprep.mubr.msk.f32.mxu1 %vm644_vm6, %v16334_v59  ;;  %17385 = vst [vmem:[#allocation56_spill] sm:$0xff] %v16350_v11  ;;  %v16354_v59 = vld [vmem:[#allocation2 + $0xe2] sm:$0xff] }
 0xc09   : > { %17386 = vst [vmem:[#allocation57_spill] sm:$0xff] %v16354_v59 }
 0xc0b   : > { %12079 = vmatmul.mubr.msk.f32.gmra.mrb[40].mxu1 %vm644_vm6, %v16338_v45  ;;  %v16358_v45 = vld [vmem:[#allocation2 + $0xf2] sm:$0xff] }
 0xc0c   : > { %12081 = vmatprep.mubr.msk.f32.mxu1 %vm644_vm6, %v16342_v38  ;;  %17387 = vst [vmem:[#allocation58_spill] sm:$0xff] %v16358_v45  ;;  %v16362_v38 = vld [vmem:[#allocation2 + $0xfa] sm:$0xff] }
 0xc0d   : > { %17388 = vst [vmem:[#allocation59_spill] sm:$0xff] %v16362_v38 }
 0xc0f   : > { %12082 = vmatmul.mubr.msk.f32.gmra.mrb[42].mxu1 %vm644_vm6, %v16346_v36  ;;  %v16366_v36 = vld [vmem:[#allocation2 + $0x10a] sm:$0xff] }
 0xc10   : > { %12084 = vmatprep.mubr.msk.f32.mxu1 %vm644_vm6, %v16350_v11  ;;  %17389 = vst [vmem:[#allocation60_spill] sm:$0xff] %v16366_v36  ;;  %v16370_v11 = vld [vmem:[#allocation2 + $0x112] sm:$0xff] }
 0xc11   : > { %17390 = vst [vmem:[#allocation61_spill] sm:$0xff] %v16370_v11 }
 0xc13   : > { %12085 = vmatmul.mubr.msk.f32.gmra.mrb[44].mxu1 %vm644_vm6, %v16354_v59  ;;  %v16374_v59 = vld [vmem:[#allocation2 + $0x122] sm:$0xff] }
 0xc14   : > { %12087 = vmatprep.mubr.msk.f32.mxu1 %vm644_vm6, %v16358_v45  ;;  %17391 = vst [vmem:[#allocation62_spill] sm:$0xff] %v16374_v59  ;;  %v16378_v45 = vld [vmem:[#allocation2 + $0x12a] sm:$0xff] }
 0xc15   : > { %17392 = vst [vmem:[#allocation63_spill] sm:$0xff] %v16378_v45 }
 0xc17   : > { %12088 = vmatmul.mubr.msk.f32.gmra.mrb[14].mxu1 %vm644_vm6, %v16362_v38  ;;  %v16382_v38 = vld [vmem:[#allocation2 + $0x13a] sm:$0xff] }
 0xc18   : > { %12090 = vmatprep.mubr.msk.f32.mxu1 %vm644_vm6, %v16366_v36  ;;  %17393 = vst [vmem:[#allocation64_spill] sm:$0xff] %v16382_v38  ;;  %v16386_v36 = vld [vmem:[#allocation2 + $0x142] sm:$0xff] }
 0xc1b   : > { %12091 = vmatmul.mubr.msk.f32.gmra.mrb[16].mxu1 %vm644_vm6, %v16370_v11  ;;  %v16390_v11 = vld [vmem:[#allocation2 + $0x152] sm:$0xff] }
 0xc1c   : > { %12093 = vmatprep.mubr.msk.f32.mxu1 %vm644_vm6, %v16374_v59  ;;  %17394 = vst [vmem:[#allocation65_spill] sm:$0xff] %v16390_v11  ;;  %v16394_v59 = vld [vmem:[#allocation2 + $0x15a] sm:$0xff] }
 0xc1f   : > { %12094 = vmatmul.mubr.msk.f32.gmra.mrb[18].mxu1 %vm644_vm6, %v16378_v45  ;;  %v16398_v45 = vld [vmem:[#allocation2 + $0x16a] sm:$0xff] }
 0xc20   : > { %12096 = vmatprep.mubr.msk.f32.mxu1 %vm644_vm6, %v16382_v38  ;;  %v16402_v38 = vld [vmem:[#allocation2 + $0x172] sm:$0xff] }
 0xc23   : > { %12097 = vmatmul.mubr.msk.f32.gmra.mrb[20].mxu1 %vm644_vm6, %v16386_v36 }
 0xc24   : > { %12099 = vmatprep.mubr.msk.f32.mxu1 %vm644_vm6, %v16390_v11  ;;  %v10619_v11 = vld [vmem:[%s17066_s12 + $0x28] sm:$0xff] }
 0xc27   : > { %12100 = vmatmul.mubr.msk.f32.gmra.mrb[22].mxu1 %vm644_vm6, %v16394_v59 }
 0xc28   : > { %12102 = vmatprep.mubr.msk.f32.mxu1 %vm644_vm6, %v16398_v45 }
 0xc2b   : > { %12103 = vmatmul.mubr.msk.f32.gmra.mrb[24].mxu1 %vm644_vm6, %v16402_v38 }
 0xc2c   : > { %12107 = vmatprep.mubr.msk.f32.mxu1 %vm644_vm6, %v16152_v19 }
 0xc2f   : > { %12108 = vmatmul.mubr.msk.f32.vlgmr.msra.gmra.mrb[26].mxu1 %vm644_vm6, %v16157_v49 }
 0xc30   : > { %12156 = vmatpush3.msra.mxu1 %v16277_v15  ;;  %12110 = vmatprep.mubr.msk.f32.mxu1 %vm644_vm6, %v16161_v46 }
 0xc31   : > { %12205 = vmatprep.subr.mxu1 %v10619_v11 }
 0xc33   : > { %12111 = vmatmul.mubr.msk.f32.gmra.mrb[28].mxu1 %vm644_vm6, %v16165_v52 }
 0xc34   : > { %12113 = vmatprep.mubr.msk.f32.mxu1 %vm644_vm6, %v16169_v40 }
 0xc37   : > { %12114 = vmatmul.mubr.msk.f32.gmra.mrb[30].mxu1 %vm644_vm6, %v16173_v30 }
 0xc38   : > { %12116 = vmatprep.mubr.msk.f32.mxu1 %vm644_vm6, %v16177_v39 }
 0xc3b   : > { %12117 = vmatmul.mubr.msk.f32.gmra.mrb[32].mxu1 %vm644_vm6, %v16181_v25 }
 0xc3c   : > { %12119 = vmatprep.mubr.msk.f32.mxu1 %vm644_vm6, %v16185_v20 }
 0xc3f   : > { %12120 = vmatmul.mubr.msk.f32.gmra.mrb[34].mxu1 %vm644_vm6, %v16189_v8 }
 0xc40   : > { %12122 = vmatprep.mubr.msk.f32.mxu1 %vm644_vm6, %v16193_v10 }
 0xc43   : > { %12123 = vmatmul.mubr.msk.f32.gmra.mrb[36].mxu1 %vm644_vm6, %v16197_v21 }
 0xc44   : > { %12125 = vmatprep.mubr.msk.f32.mxu1 %vm644_vm6, %v16201_v58 }
 0xc47   : > { %12126 = vmatmul.mubr.msk.f32.gmra.mrb[38].mxu1 %vm644_vm6, %v16205_v48 }
 0xc48   : > { %12128 = vmatprep.mubr.msk.f32.mxu1 %vm644_vm6, %v16209_v17 }
 0xc4b   : > { %12129 = vmatmul.mubr.msk.f32.gmra.mrb[40].mxu1 %vm644_vm6, %v16213_v3 }
 0xc4c   : > { %12131 = vmatprep.mubr.msk.f32.mxu1 %vm644_vm6, %v16217_v5 }
 0xc4f   : > { %12132 = vmatmul.mubr.msk.f32.gmra.mrb[42].mxu1 %vm644_vm6, %v16221_v29 }
 0xc50   : > { %12134 = vmatprep.mubr.msk.f32.mxu1 %vm644_vm6, %v16225_v43 }
 0xc53   : > { %12135 = vmatmul.mubr.msk.f32.gmra.mrb[44].mxu1 %vm644_vm6, %v16229_v33 }
 0xc54   : > { %12137 = vmatprep.mubr.msk.f32.mxu1 %vm644_vm6, %v16233_v32 }
 0xc57   : > { %12138 = vmatmul.mubr.msk.f32.gmra.mrb[14].mxu1 %vm644_vm6, %v16237_v31 }
 0xc58   : > { %12140 = vmatprep.mubr.msk.f32.mxu1 %vm644_vm6, %v16241_v9  ;;  %v16456_v15 = vpop.f32.mrb[40].mxu0 }
 0xc59   : > { %17395 = vst [vmem:[#allocation66_spill] sm:$0xff] %v16456_v15  ;;  %v16458_v19 = vpop.f32.mrb[41].mxu0 }
 0xc5a   : > { %17396 = vst [vmem:[#allocation67_spill] sm:$0xff] %v16458_v19 }
 0xc5b   : > { %12141 = vmatmul.mubr.msk.f32.gmra.mrb[16].mxu1 %vm644_vm6, %v16245_v22 }
 0xc5c   : > { %12143 = vmatprep.mubr.msk.f32.mxu1 %vm644_vm6, %v16249_v50  ;;  %v16464_v49 = vpop.f32.mrb[42].mxu0 }
 0xc5d   : > { %17397 = vst [vmem:[#allocation68_spill] sm:$0xff] %v16464_v49  ;;  %v16466_v33 = vpop.f32.mrb[43].mxu0 }
 0xc5e   : > { %17398 = vst [vmem:[#allocation69_spill] sm:$0xff] %v16466_v33  ;;  %v16486_v33 = vld [vmem:[#allocation2 + $0x180] sm:$0xff] }
 0xc5f   : > { %12144 = vmatmul.mubr.msk.f32.gmra.mrb[18].mxu1 %vm644_vm6, %v16253_v51  ;;  %17403 = vst [vmem:[#allocation74_spill] sm:$0xff] %v16486_v33 }
 0xc60   : > { %12146 = vmatprep.mubr.msk.f32.mxu1 %vm644_vm6, %v16257_v28  ;;  %v16472_v9 = vpop.f32.mrb[44].mxu0 }
 0xc61   : > { %17399 = vst [vmem:[#allocation70_spill] sm:$0xff] %v16472_v9  ;;  %v16474_v15 = vpop.f32.mrb[45].mxu0 }
 0xc62   : > { %17400 = vst [vmem:[#allocation71_spill] sm:$0xff] %v16474_v15 }
 0xc63   : > { %12147 = vmatmul.mubr.msk.f32.gmra.mrb[20].mxu1 %vm644_vm6, %v16261_v18  ;;  %v16494_v18 = vld [vmem:[#allocation2 + $0x188] sm:$0xff] }
 0xc64   : > { %12149 = vmatprep.mubr.msk.f32.mxu1 %vm644_vm6, %v16265_v26  ;;  %v16480_v19 = vpop.f32.mrb[46].mxu0 }
 0xc65   : > { %17401 = vst [vmem:[#allocation72_spill] sm:$0xff] %v16480_v19  ;;  %v16482_v49 = vpop.f32.mrb[47].mxu0 }
 0xc66   : > { %17402 = vst [vmem:[#allocation73_spill] sm:$0xff] %v16482_v49 }
 0xc67   : > { %12150 = vmatmul.mubr.msk.f32.gmra.mrb[22].mxu1 %vm644_vm6, %v16269_v41 }
 0xc68   : > { %12152 = vmatprep.mubr.msk.f32.mxu1 %vm644_vm6, %v16486_v33  ;;  %v16490_v9 = vpop.f32.mrb[48].mxu0  ;;  %v10652_v33 = vld [vmem:[%s17066_s12 + $0x30] sm:$0xff] }
 0xc69   : > { %17404 = vst [vmem:[#allocation75_spill] sm:$0xff] %v16490_v9  ;;  %v16492_v15 = vpop.f32.mrb[49].mxu0 }
 0xc6a   : > { %17405 = vst [vmem:[#allocation76_spill] sm:$0xff] %v16492_v15 }
 0xc6b   : > { %12153 = vmatmul.mubr.msk.f32.gmra.mrb[24].mxu1 %vm644_vm6, %v16494_v18 }
 0xc6c   : > { %12157 = vmatprep.mubr.msk.f32.mxu1 %vm644_vm6, %v15857_v53  ;;  %v16500_v49 = vpop.f32.mrb[50].mxu0 }
 0xc6d   : > { %v16502_v19 = vpop.f32.mrb[51].mxu0 }
 0xc6e   : > { %17406 = vst [vmem:[#allocation77_spill] sm:$0xff] %v16502_v19 }
 0xc6f   : > { %12158 = vmatmul.mubr.msk.f32.vlgmr.msra.gmra.mrb[26].mxu1 %vm644_vm6, %v15860_v4 }
 0xc70   : > { %12206 = vmatpush3.msra.mxu1 %v10619_v11  ;;  %12160 = vmatprep.mubr.msk.f32.mxu1 %vm644_vm6, %v15863_v12  ;;  %v16511_v15 = vpop.f32.mrb[52].mxu0  ;;  %v17431_v11 = vld [vmem:[#allocation59_spill] sm:$0xff] }
 0xc71   : > { %v16513_v9 = vpop.f32.mrb[53].mxu0  ;;  %12255 = vmatprep.subr.mxu1 %v10652_v33 }
 0xc73   : > { %12161 = vmatmul.mubr.msk.f32.gmra.mrb[28].mxu1 %vm644_vm6, %v15868_v42  ;;  %v17408_v42 = vld [vmem:[#allocation25_spill] sm:$0xff] }
 0xc74   : > { %12163 = vmatprep.mubr.msk.f32.mxu1 %vm644_vm6, %v15873_v2  ;;  %v16519_v53 = vpop.f32.mrb[54].mxu0  ;;  %v17409_v2 = vld [vmem:[#allocation27_spill] sm:$0xff] }
 0xc75   : > { %v16521_v19 = vpop.f32.mrb[55].mxu0 }
 0xc77   : > { %12164 = vmatmul.mubr.msk.f32.gmra.mrb[30].mxu1 %vm644_vm6, %v15878_v1  ;;  %v17410_v1 = vld [vmem:[#allocation30_spill] sm:$0xff] }
 0xc78   : > { %12166 = vmatprep.mubr.msk.f32.mxu1 %vm644_vm6, %v15884_v44  ;;  %v16527_v4 = vpop.f32.mrb[56].mxu0  ;;  %v17411_v44 = vld [vmem:[#allocation32_spill] sm:$0xff] }
 0xc79   : > { %v16529_v12 = vpop.f32.mrb[57].mxu0 }
 0xc7a   : > { %17407 = vst [vmem:[#allocation78_spill] sm:$0xff] %v16529_v12  ;;  %v10718_v12 = vld [vmem:[%s17066_s12 + $0x40] sm:$0xff] }
 0xc7b   : > { %12167 = vmatmul.mubr.msk.f32.gmra.mrb[32].mxu1 %vm644_vm6, %v15890_v7  ;;  %v17412_v7 = vld [vmem:[#allocation34_spill] sm:$0xff] }
 0xc7c   : > { %12169 = vmatprep.mubr.msk.f32.mxu1 %vm644_vm6, %v15896_v24  ;;  %v17413_v24 = vld [vmem:[#allocation36_spill] sm:$0xff] }
 0xc7f   : > { %12170 = vmatmul.mubr.msk.f32.gmra.mrb[34].mxu1 %vm644_vm6, %v15902_v62  ;;  %v10685_v62 = vld [vmem:[%s17066_s12 + $0x38] sm:$0xff] }
 0xc80   : > { %12172 = vmatprep.mubr.msk.f32.mxu1 %vm644_vm6, %v15908_v14  ;;  %v17414_v14 = vld [vmem:[#allocation6_spill] sm:$0xff] }
 0xc83   : > { %12173 = vmatmul.mubr.msk.f32.gmra.mrb[36].mxu1 %vm644_vm6, %v15915_v27  ;;  %v17415_v27 = vld [vmem:[#allocation9_spill] sm:$0xff] }
 0xc84   : > { %12175 = vmatprep.mubr.msk.f32.mxu1 %vm644_vm6, %v15924_v0  ;;  %v17416_v0 = vld [vmem:[#allocation7_spill] sm:$0xff] }
 0xc87   : > { %12176 = vmatmul.mubr.msk.f32.gmra.mrb[38].mxu1 %vm644_vm6, %v15932_v56  ;;  %v17417_v56 = vld [vmem:[#allocation45_spill] sm:$0xff] }
 0xc88   : > { %12178 = vmatprep.mubr.msk.f32.mxu1 %vm644_vm6, %v15938_v63  ;;  %v17418_v63 = vld [vmem:[#allocation46_spill] sm:$0xff] }
 0xc8b   : > { %12179 = vmatmul.mubr.msk.f32.gmra.mrb[40].mxu1 %vm644_vm6, %v15946_v16  ;;  %v17419_v16 = vld [vmem:[#allocation47_spill] sm:$0xff] }
 0xc8c   : > { %12181 = vmatprep.mubr.msk.f32.mxu1 %vm644_vm6, %v15956_v23  ;;  %v17420_v23 = vld [vmem:[#allocation48_spill] sm:$0xff] }
 0xc8f   : > { %12182 = vmatmul.mubr.msk.f32.gmra.mrb[42].mxu1 %vm644_vm6, %v15963_v60  ;;  %v17421_v60 = vld [vmem:[#allocation49_spill] sm:$0xff] }
 0xc90   : > { %12184 = vmatprep.mubr.msk.f32.mxu1 %vm644_vm6, %v15968_v61  ;;  %v17422_v61 = vld [vmem:[#allocation50_spill] sm:$0xff] }
 0xc93   : > { %12185 = vmatmul.mubr.msk.f32.gmra.mrb[44].mxu1 %vm644_vm6, %v15975_v55  ;;  %v17423_v55 = vld [vmem:[#allocation51_spill] sm:$0xff] }
 0xc94   : > { %12187 = vmatprep.mubr.msk.f32.mxu1 %vm644_vm6, %v15984_v37  ;;  %v17424_v37 = vld [vmem:[#allocation52_spill] sm:$0xff] }
 0xc97   : > { %12188 = vmatmul.mubr.msk.f32.gmra.mrb[14].mxu1 %vm644_vm6, %v15991_v13  ;;  %v17425_v13 = vld [vmem:[#allocation53_spill] sm:$0xff] }
 0xc98   : > { %12190 = vmatprep.mubr.msk.f32.mxu1 %vm644_vm6, %v15996_v47  ;;  %v17426_v47 = vld [vmem:[#allocation54_spill] sm:$0xff] }
 0xc9b   : > { %12191 = vmatmul.mubr.msk.f32.gmra.mrb[16].mxu1 %vm644_vm6, %v16003_v57  ;;  %v17427_v57 = vld [vmem:[#allocation55_spill] sm:$0xff] }
 0xc9c   : > { %12193 = vmatprep.mubr.msk.f32.mxu1 %vm644_vm6, %v16012_v34  ;;  %v17428_v34 = vld [vmem:[#allocation56_spill] sm:$0xff] }
 0xc9f   : > { %12194 = vmatmul.mubr.msk.f32.gmra.mrb[18].mxu1 %vm644_vm6, %v16019_v35  ;;  %v17429_v35 = vld [vmem:[#allocation57_spill] sm:$0xff] }
 0xca0   : > { %12196 = vmatprep.mubr.msk.f32.mxu1 %vm644_vm6, %v17408_v42  ;;  %v17434_v42 = vld [vmem:[#allocation62_spill] sm:$0xff] }
 0xca3   : > { %12197 = vmatmul.mubr.msk.f32.gmra.mrb[20].mxu1 %vm644_vm6, %v17409_v2  ;;  %v17435_v2 = vld [vmem:[#allocation63_spill] sm:$0xff] }
 0xca4   : > { %12199 = vmatprep.mubr.msk.f32.mxu1 %vm644_vm6, %v17410_v1  ;;  %v17436_v1 = vld [vmem:[#allocation64_spill] sm:$0xff] }
 0xca7   : > { %12200 = vmatmul.mubr.msk.f32.gmra.mrb[22].mxu1 %vm644_vm6, %v17411_v44  ;;  %v17437_v44 = vld [vmem:[#allocation65_spill] sm:$0xff] }
 0xca8   : > { %12202 = vmatprep.mubr.msk.f32.mxu1 %vm644_vm6, %v17412_v7  ;;  %v16644_v7 = vld [vmem:[#allocation2 + $0x182] sm:$0xff] }
 0xcab   : > { %12203 = vmatmul.mubr.msk.f32.gmra.mrb[24].mxu1 %vm644_vm6, %v17413_v24  ;;  %v16648_v24 = vld [vmem:[#allocation2 + $0x18a] sm:$0xff] }
 0xcac   : > { %12207 = vmatprep.mubr.msk.f32.mxu1 %vm644_vm6, %v16280_v6  ;;  %v17432_v6 = vld [vmem:[#allocation60_spill] sm:$0xff] }
 0xcaf   : > { %12208 = vmatmul.mubr.msk.f32.vlgmr.msra.gmra.mrb[26].mxu1 %vm644_vm6, %v16290_v54  ;;  %v17430_v54 = vld [vmem:[#allocation58_spill] sm:$0xff] }
 0xcb0   : > { %12256 = vmatpush3.msra.mxu1 %v10652_v33  ;;  %12210 = vmatprep.mubr.msk.f32.mxu1 %vm644_vm6, %v17414_v14  ;;  %v17433_v33 = vld [vmem:[#allocation61_spill] sm:$0xff] }
 0xcb1   : > { %12305 = vmatprep.subr.mxu1 %v10685_v62 }
 0xcb3   : > { %12211 = vmatmul.mubr.msk.f32.gmra.mrb[28].mxu1 %vm644_vm6, %v17415_v27 }
 0xcb4   : > { %12213 = vmatprep.mubr.msk.f32.mxu1 %vm644_vm6, %v17416_v0 }
 0xcb7   : > { %12214 = vmatmul.mubr.msk.f32.gmra.mrb[30].mxu1 %vm644_vm6, %v17417_v56 }
 0xcb8   : > { %12216 = vmatprep.mubr.msk.f32.mxu1 %vm644_vm6, %v17418_v63 }
 0xcbb   : > { %12217 = vmatmul.mubr.msk.f32.gmra.mrb[32].mxu1 %vm644_vm6, %v17419_v16 }
 0xcbc   : > { %12219 = vmatprep.mubr.msk.f32.mxu1 %vm644_vm6, %v17420_v23 }
 0xcbf   : > { %12220 = vmatmul.mubr.msk.f32.gmra.mrb[34].mxu1 %vm644_vm6, %v17421_v60 }
 0xcc0   : > { %12222 = vmatprep.mubr.msk.f32.mxu1 %vm644_vm6, %v17422_v61 }
 0xcc3   : > { %12223 = vmatmul.mubr.msk.f32.gmra.mrb[36].mxu1 %vm644_vm6, %v17423_v55 }
 0xcc4   : > { %12225 = vmatprep.mubr.msk.f32.mxu1 %vm644_vm6, %v17424_v37 }
 0xcc7   : > { %12226 = vmatmul.mubr.msk.f32.gmra.mrb[38].mxu1 %vm644_vm6, %v17425_v13 }
 0xcc8   : > { %12228 = vmatprep.mubr.msk.f32.mxu1 %vm644_vm6, %v17426_v47 }
 0xccb   : > { %12229 = vmatmul.mubr.msk.f32.gmra.mrb[40].mxu1 %vm644_vm6, %v17427_v57 }
 0xccc   : > { %12231 = vmatprep.mubr.msk.f32.mxu1 %vm644_vm6, %v17428_v34 }
 0xccf   : > { %12232 = vmatmul.mubr.msk.f32.gmra.mrb[42].mxu1 %vm644_vm6, %v17429_v35 }
 0xcd0   : > { %12234 = vmatprep.mubr.msk.f32.mxu1 %vm644_vm6, %v17430_v54 }
 0xcd3   : > { %12235 = vmatmul.mubr.msk.f32.gmra.mrb[44].mxu1 %vm644_vm6, %v17431_v11 }
 0xcd4   : > { %12237 = vmatprep.mubr.msk.f32.mxu1 %vm644_vm6, %v17432_v6 }
 0xcd7   : > { %12238 = vmatmul.mubr.msk.f32.gmra.mrb[14].mxu1 %vm644_vm6, %v17433_v33 }
 0xcd8   : > { %12240 = vmatprep.mubr.msk.f32.mxu1 %vm644_vm6, %v17434_v42 }
 0xcdb   : > { %12241 = vmatmul.mubr.msk.f32.gmra.mrb[16].mxu1 %vm644_vm6, %v17435_v2 }
 0xcdc   : > { %12243 = vmatprep.mubr.msk.f32.mxu1 %vm644_vm6, %v17436_v1 }
 0xcdf   : > { %12244 = vmatmul.mubr.msk.f32.gmra.mrb[18].mxu1 %vm644_vm6, %v16386_v36 }
 0xce0   : > { %12246 = vmatprep.mubr.msk.f32.mxu1 %vm644_vm6, %v17437_v44 }
 0xce3   : > { %12247 = vmatmul.mubr.msk.f32.gmra.mrb[20].mxu1 %vm644_vm6, %v16394_v59 }
 0xce4   : > { %12249 = vmatprep.mubr.msk.f32.mxu1 %vm644_vm6, %v16398_v45 }
 0xce7   : > { %12250 = vmatmul.mubr.msk.f32.gmra.mrb[22].mxu1 %vm644_vm6, %v16402_v38 }
 0xce8   : > { %12252 = vmatprep.mubr.msk.f32.mxu1 %vm644_vm6, %v16644_v7 }
 0xceb   : > { %12253 = vmatmul.mubr.msk.f32.gmra.mrb[24].mxu1 %vm644_vm6, %v16648_v24 }
 0xcec   : > { %12257 = vmatprep.mubr.msk.f32.mxu1 %vm644_vm6, %v16161_v46  ;;  %v17458_v46 = vld [vmem:[#allocation28_spill] sm:$0xff] }
 0xcef   : > { %12258 = vmatmul.mubr.msk.f32.vlgmr.msra.gmra.mrb[26].mxu1 %vm644_vm6, %v16165_v52  ;;  %v17457_v52 = vld [vmem:[#allocation13_spill] sm:$0xff] }
 0xcf0   : > { %12306 = vmatpush3.msra.mxu1 %v10685_v62  ;;  %12260 = vmatprep.mubr.msk.f32.mxu1 %vm644_vm6, %v16169_v40  ;;  %v17459_v40 = vld [vmem:[#allocation31_spill] sm:$0xff] }
 0xcf1   : > { %12355 = vmatprep.subr.mxu1 %v10718_v12  ;;  %v17462_v62 = vld [vmem:[#allocation39_spill] sm:$0xff] }
 0xcf3   : > { %12261 = vmatmul.mubr.msk.f32.gmra.mrb[28].mxu1 %vm644_vm6, %v16173_v30  ;;  %v17460_v30 = vld [vmem:[#allocation33_spill] sm:$0xff] }
 0xcf4   : > { %12263 = vmatprep.mubr.msk.f32.mxu1 %vm644_vm6, %v16177_v39  ;;  %v17455_v39 = vld [vmem:[#allocation44_spill] sm:$0xff] }
 0xcf7   : > { %12264 = vmatmul.mubr.msk.f32.gmra.mrb[30].mxu1 %vm644_vm6, %v16181_v25  ;;  %v17454_v25 = vld [vmem:[#allocation41_spill] sm:$0xff] }
 0xcf8   : > { %12266 = vmatprep.mubr.msk.f32.mxu1 %vm644_vm6, %v16185_v20  ;;  %v17451_v20 = vld [vmem:[#allocation35_spill] sm:$0xff] }
 0xcfb   : > { %12267 = vmatmul.mubr.msk.f32.gmra.mrb[32].mxu1 %vm644_vm6, %v16189_v8  ;;  %v17450_v8 = vld [vmem:[#allocation29_spill] sm:$0xff] }
 0xcfc   : > { %12269 = vmatprep.mubr.msk.f32.mxu1 %vm644_vm6, %v16193_v10  ;;  %v17448_v10 = vld [vmem:[#allocation24_spill] sm:$0xff] }
 0xcff   : > { %12270 = vmatmul.mubr.msk.f32.gmra.mrb[34].mxu1 %vm644_vm6, %v16197_v21  ;;  %v17438_v21 = vld [vmem:[#allocation17_spill] sm:$0xff] }
 0xd00   : > { %12272 = vmatprep.mubr.msk.f32.mxu1 %vm644_vm6, %v16201_v58  ;;  %v17441_v58 = vld [vmem:[#allocation74_spill] sm:$0xff] }
 0xd03   : > { %12273 = vmatmul.mubr.msk.f32.gmra.mrb[36].mxu1 %vm644_vm6, %v16205_v48  ;;  %v17440_v48 = vld [vmem:[#allocation5_spill] sm:$0xff] }
 0xd04   : > { %12275 = vmatprep.mubr.msk.f32.mxu1 %vm644_vm6, %v16209_v17  ;;  %v17439_v17 = vld [vmem:[#allocation18_spill] sm:$0xff] }
 0xd07   : > { %12276 = vmatmul.mubr.msk.f32.gmra.mrb[38].mxu1 %vm644_vm6, %v16213_v3  ;;  %v17456_v3 = vld [vmem:[#allocation10_spill] sm:$0xff] }
 0xd08   : > { %12278 = vmatprep.mubr.msk.f32.mxu1 %vm644_vm6, %v16217_v5  ;;  %v17453_v5 = vld [vmem:[#allocation40_spill] sm:$0xff] }
 0xd0b   : > { %12279 = vmatmul.mubr.msk.f32.gmra.mrb[40].mxu1 %vm644_vm6, %v16221_v29  ;;  %v17452_v29 = vld [vmem:[#allocation37_spill] sm:$0xff] }
 0xd0c   : > { %12281 = vmatprep.mubr.msk.f32.mxu1 %vm644_vm6, %v16225_v43  ;;  %v17449_v43 = vld [vmem:[#allocation26_spill] sm:$0xff] }
 0xd0f   : > { %12282 = vmatmul.mubr.msk.f32.gmra.mrb[42].mxu1 %vm644_vm6, %v17438_v21  ;;  %v17463_v21 = vld [vmem:[#allocation42_spill] sm:$0xff] }
 0xd10   : > { %12284 = vmatprep.mubr.msk.f32.mxu1 %vm644_vm6, %v16233_v32  ;;  %v17447_v32 = vld [vmem:[#allocation23_spill] sm:$0xff] }
 0xd13   : > { %12285 = vmatmul.mubr.msk.f32.gmra.mrb[44].mxu1 %vm644_vm6, %v16237_v31  ;;  %v17446_v31 = vld [vmem:[#allocation22_spill] sm:$0xff] }
 0xd14   : > { %12287 = vmatprep.mubr.msk.f32.mxu1 %vm644_vm6, %v17439_v17  ;;  %v17464_v17 = vld [vmem:[#allocation43_spill] sm:$0xff] }
 0xd17   : > { %12288 = vmatmul.mubr.msk.f32.gmra.mrb[14].mxu1 %vm644_vm6, %v16245_v22  ;;  %v8425_v22 = vld [vmem:[#allocation2 + $0x198] sm:$0xff] }
 0xd18   : > { %12290 = vmatprep.mubr.msk.f32.mxu1 %vm644_vm6, %v16249_v50  ;;  %v17444_v50 = vld [vmem:[#allocation20_spill] sm:$0xff] }
 0xd1b   : > { %12291 = vmatmul.mubr.msk.f32.gmra.mrb[16].mxu1 %vm644_vm6, %v16253_v51  ;;  %v8426_v51 = vld [vmem:[#allocation2 + $0x1a0] sm:$0xff] }
 0xd1c   : > { %12293 = vmatprep.mubr.msk.f32.mxu1 %vm644_vm6, %v16257_v28  ;;  %v17442_v28 = vld [vmem:[#allocation8_spill] sm:$0xff] }
 0xd1f   : > { %12294 = vmatmul.mubr.msk.f32.gmra.mrb[18].mxu1 %vm644_vm6, %v17440_v48  ;;  %v17465_v48 = vld [vmem:[#allocation11_spill] sm:$0xff] }
 0xd20   : > { %12296 = vmatprep.mubr.msk.f32.mxu1 %vm644_vm6, %v16265_v26  ;;  %v9595_v26 = vld [vmem:[%s17072_s18] sm:$0xf] }
 0xd23   : > { %12297 = vmatmul.mubr.msk.f32.gmra.mrb[20].mxu1 %vm644_vm6, %v16269_v41  ;;  %v17443_v41 = vld [vmem:[#allocation19_spill] sm:$0xff] }
 0xd24   : > { %12299 = vmatprep.mubr.msk.f32.mxu1 %vm644_vm6, %v17441_v58  ;;  %v17466_v58 = vld [vmem:[#allocation12_spill] sm:$0xff] }
 0xd27   : > { %12300 = vmatmul.mubr.msk.f32.gmra.mrb[22].mxu1 %vm644_vm6, %v16494_v18  ;;  %v17445_v18 = vld [vmem:[#allocation21_spill] sm:$0xff] }
 0xd28   : > { %12302 = vmatprep.mubr.msk.f32.mxu1 %vm644_vm6, %v8425_v22  ;;  %v17467_v22 = vld [vmem:[#allocation14_spill] sm:$0xff] }
 0xd2b   : > { %12303 = vmatmul.mubr.msk.f32.gmra.mrb[24].mxu1 %vm644_vm6, %v8426_v51  ;;  %v17468_v51 = vld [vmem:[#allocation15_spill] sm:$0xff] }
 0xd2c   : > { %12307 = vmatprep.mubr.msk.f32.mxu1 %vm644_vm6, %v17442_v28  ;;  %v17469_v28 = vld [vmem:[#allocation16_spill] sm:$0xff] }
 0xd2f   : > { %12308 = vmatmul.mubr.msk.f32.vlgmr.msra.gmra.mrb[26].mxu1 %vm644_vm6, %v17443_v41  ;;  %v8810_v41 = vld [vmem:[#allocation2 + $0x181] sm:$0xff] }
 0xd30   : > { %12356 = vmatpush3.msra.mxu1 %v10718_v12  ;;  %12310 = vmatprep.mubr.msk.f32.mxu1 %vm644_vm6, %v17444_v50  ;;  %v17461_v12 = vld [vmem:[#allocation38_spill] sm:$0xff]  ;;  %v8812_v50 = vld [vmem:[#allocation2 + $0x199] sm:$0xff] }
 0xd31   : > { %12405 = vmatprep.subr.msk.mxu1 %vm959_vm3, %v9595_v26 }
 0xd33   : > { %12311 = vmatmul.mubr.msk.f32.gmra.mrb[28].mxu1 %vm644_vm6, %v17445_v18  ;;  %v8811_v18 = vld [vmem:[#allocation2 + $0x189] sm:$0xff] }
 0xd34   : > { %12313 = vmatprep.mubr.msk.f32.mxu1 %vm644_vm6, %v17446_v31  ;;  %v8813_v31 = vld [vmem:[#allocation2 + $0x1a1] sm:$0xff] }
 0xd37   : > { %12314 = vmatmul.mubr.msk.f32.gmra.mrb[30].mxu1 %vm644_vm6, %v17447_v32  ;;  %v13381_v32 = vld [vmem:[%s13548_s0 + $0xe8] sm:$0xff] }
 0xd38   : > { %12316 = vmatprep.mubr.msk.f32.mxu1 %vm644_vm6, %v17448_v10  ;;  %v13382_v10 = vld [vmem:[%s13548_s0 + $0xf0] sm:$0xff] }
 0xd3b   : > { %12317 = vmatmul.mubr.msk.f32.gmra.mrb[32].mxu1 %vm644_vm6, %v17449_v43  ;;  %v13383_v43 = vld [vmem:[%s13548_s0 + $0xf8] sm:$0xff] }
 0xd3c   : > { %12319 = vmatprep.mubr.msk.f32.mxu1 %vm644_vm6, %v17450_v8  ;;  %v16911_v8 = vld [vmem:[%s17067_s13] ss:$0 sm:$0xff] }
 0xd3f   : > { %12320 = vmatmul.mubr.msk.f32.gmra.mrb[34].mxu1 %vm644_vm6, %v17451_v20  ;;  %v17470_v20 = vld [vmem:[#allocation3_spill] sm:$0xff] }
 0xd40   : > { %12322 = vmatprep.mubr.msk.f32.mxu1 %vm644_vm6, %v17452_v29  ;;  %v12469_v29 = vadd.f32 %v17470_v20, %v16911_v8  ;;  %v17482_v20 = vld [vmem:[#allocation77_spill] sm:$0xff] }
 0xd43   : > { %12323 = vmatmul.mubr.msk.f32.gmra.mrb[36].mxu1 %vm644_vm6, %v17453_v5  ;;  %v17471_v5 = vld [vmem:[#allocation4_spill] sm:$0xff] }
 0xd44   : > { %12325 = vmatprep.mubr.msk.f32.mxu1 %vm644_vm6, %v17454_v25  ;;  %v12472_v25 = vadd.f32 %v16911_v8, %v17471_v5 }
 0xd47   : > { %12326 = vmatmul.mubr.msk.f32.gmra.mrb[38].mxu1 %vm644_vm6, %v17455_v39  ;;  %v17472_v39 = vld [vmem:[#allocation66_spill] sm:$0xff] }
 0xd48   : > { %12328 = vmatprep.mubr.msk.f32.mxu1 %vm644_vm6, %v17456_v3  ;;  %v12475_v3 = vadd.f32 %v17472_v39, %v16911_v8 }
 0xd4b   : > { %12329 = vmatmul.mubr.msk.f32.gmra.mrb[40].mxu1 %vm644_vm6, %v17457_v52  ;;  %v17473_v52 = vld [vmem:[#allocation67_spill] sm:$0xff] }
 0xd4c   : > { %12331 = vmatprep.mubr.msk.f32.mxu1 %vm644_vm6, %v17458_v46  ;;  %v12478_v46 = vadd.f32 %v16911_v8, %v17473_v52 }
 0xd4f   : > { %12332 = vmatmul.mubr.msk.f32.gmra.mrb[42].mxu1 %vm644_vm6, %v17459_v40 }
 0xd50   : > { %12334 = vmatprep.mubr.msk.f32.mxu1 %vm644_vm6, %v17460_v30  ;;  %v16924_v30 = vld [vmem:[%s17073_s19] ss:$0 sm:$0xff] }
 0xd53   : > { %12335 = vmatmul.mubr.msk.f32.gmra.mrb[44].mxu1 %vm644_vm6, %v17461_v12 }
 0xd54   : > { %12337 = vmatprep.mubr.msk.f32.mxu1 %vm644_vm6, %v17462_v62 }
 0xd57   : > { %12338 = vmatmul.mubr.msk.f32.gmra.mrb[14].mxu1 %vm644_vm6, %v17463_v21 }
 0xd58   : > { %12340 = vmatprep.mubr.msk.f32.mxu1 %vm644_vm6, %v17464_v17  ;;  %v17474_v17 = vld [vmem:[#allocation68_spill] sm:$0xff] }
 0xd5b   : > { %12341 = vmatmul.mubr.msk.f32.gmra.mrb[16].mxu1 %vm644_vm6, %v17465_v48  ;;  %v12481_v48 = vadd.f32 %v17474_v17, %v16911_v8 }
 0xd5c   : > { %12343 = vmatprep.mubr.msk.f32.mxu1 %vm644_vm6, %v17466_v58 }
 0xd5f   : > { %12344 = vmatmul.mubr.msk.f32.gmra.mrb[18].mxu1 %vm644_vm6, %v17467_v22  ;;  %v12476_v22 = vadd.f32 %v12475_v3, %v16924_v30 }
 0xd60   : > { %12346 = vmatprep.mubr.msk.f32.mxu1 %vm644_vm6, %v17468_v51  ;;  %v17475_v51 = vld [vmem:[#allocation69_spill] sm:$0xff] }
 0xd63   : > { %12347 = vmatmul.mubr.msk.f32.gmra.mrb[20].mxu1 %vm644_vm6, %v17469_v28  ;;  %v12484_v28 = vadd.f32 %v16911_v8, %v17475_v51 }
 0xd64   : > { %12349 = vmatprep.mubr.msk.f32.mxu1 %vm644_vm6, %v8810_v41 }
 0xd67   : > { %12350 = vmatmul.mubr.msk.f32.gmra.mrb[22].mxu1 %vm644_vm6, %v8811_v18  ;;  %v12479_v18 = vadd.f32 %v12478_v46, %v16924_v30 }
 0xd68   : > { %12352 = vmatprep.mubr.msk.f32.mxu1 %vm644_vm6, %v8812_v50 }
 0xd6b   : > { %12353 = vmatmul.mubr.msk.f32.gmra.mrb[24].mxu1 %vm644_vm6, %v8813_v31 }
 0xd6c   : > { %12357 = vmatprep.mubr.msk.f32.mxu1 %vm644_vm6, %v17414_v14  ;;  %v9199_v14 = vld [vmem:[#allocation2 + $0x19a] sm:$0xff] }
 0xd6f   : > { %12358 = vmatmul.mubr.msk.f32.vlgmr.msra.gmra.mrb[26].mxu1 %vm644_vm6, %v17415_v27  ;;  %v13355_v27 = vld [vmem:[%s13548_s0 + $0x18] sm:$0xff] }
 0xd70   : > { %12406 = vmatpush3.msk.msra.mxu1 %vm959_vm3, %v9595_v26  ;;  %12360 = vmatprep.mubr.msk.f32.mxu1 %vm644_vm6, %v17416_v0  ;;  %v13356_v0 = vld [vmem:[%s13548_s0 + $0x20] sm:$0xff] }
 0xd71   : > { %v13380_v26 = vld [vmem:[%s13548_s0 + $0xe0] sm:$0xff] }
 0xd73   : > { %12361 = vmatmul.mubr.msk.f32.gmra.mrb[28].mxu1 %vm644_vm6, %v17417_v56  ;;  %v13357_v56 = vld [vmem:[%s13548_s0 + $0x28] sm:$0xff] }
 0xd74   : > { %12363 = vmatprep.mubr.msk.f32.mxu1 %vm644_vm6, %v17418_v63  ;;  %v13358_v63 = vld [vmem:[%s13548_s0 + $0x30] sm:$0xff] }
 0xd77   : > { %12364 = vmatmul.mubr.msk.f32.gmra.mrb[30].mxu1 %vm644_vm6, %v17419_v16  ;;  %v13359_v16 = vld [vmem:[%s13548_s0 + $0x38] sm:$0xff] }
 0xd78   : > { %12366 = vmatprep.mubr.msk.f32.mxu1 %vm644_vm6, %v17420_v23  ;;  %v13360_v23 = vld [vmem:[%s13548_s0 + $0x40] sm:$0xff] }
 0xd7b   : > { %12367 = vmatmul.mubr.msk.f32.gmra.mrb[32].mxu1 %vm644_vm6, %v17421_v60  ;;  %v13361_v60 = vld [vmem:[%s13548_s0 + $0x48] sm:$0xff] }
 0xd7c   : > { %12369 = vmatprep.mubr.msk.f32.mxu1 %vm644_vm6, %v17422_v61  ;;  %v13362_v61 = vld [vmem:[%s13548_s0 + $0x50] sm:$0xff] }
 0xd7f   : > { %12370 = vmatmul.mubr.msk.f32.gmra.mrb[34].mxu1 %vm644_vm6, %v17423_v55  ;;  %v13363_v55 = vld [vmem:[%s13548_s0 + $0x58] sm:$0xff] }
 0xd80   : > { %12372 = vmatprep.mubr.msk.f32.mxu1 %vm644_vm6, %v17424_v37  ;;  %v13364_v37 = vld [vmem:[%s13548_s0 + $0x60] sm:$0xff] }
 0xd83   : > { %12373 = vmatmul.mubr.msk.f32.gmra.mrb[36].mxu1 %vm644_vm6, %v17425_v13  ;;  %v13365_v13 = vld [vmem:[%s13548_s0 + $0x68] sm:$0xff] }
 0xd84   : > { %12375 = vmatprep.mubr.msk.f32.mxu1 %vm644_vm6, %v17426_v47  ;;  %v13366_v47 = vld [vmem:[%s13548_s0 + $0x70] sm:$0xff] }
 0xd87   : > { %12376 = vmatmul.mubr.msk.f32.gmra.mrb[38].mxu1 %vm644_vm6, %v17427_v57  ;;  %v13367_v57 = vld [vmem:[%s13548_s0 + $0x78] sm:$0xff] }
 0xd88   : > { %12378 = vmatprep.mubr.msk.f32.mxu1 %vm644_vm6, %v17428_v34  ;;  %v13368_v34 = vld [vmem:[%s13548_s0 + $0x80] sm:$0xff] }
 0xd8b   : > { %12379 = vmatmul.mubr.msk.f32.gmra.mrb[40].mxu1 %vm644_vm6, %v17429_v35  ;;  %v13369_v35 = vld [vmem:[%s13548_s0 + $0x88] sm:$0xff] }
 0xd8c   : > { %12381 = vmatprep.mubr.msk.f32.mxu1 %vm644_vm6, %v17430_v54  ;;  %v13370_v54 = vld [vmem:[%s13548_s0 + $0x90] sm:$0xff] }
 0xd8f   : > { %12382 = vmatmul.mubr.msk.f32.gmra.mrb[42].mxu1 %vm644_vm6, %v17431_v11  ;;  %v13371_v11 = vld [vmem:[%s13548_s0 + $0x98] sm:$0xff] }
 0xd90   : > { %12384 = vmatprep.mubr.msk.f32.mxu1 %vm644_vm6, %v17432_v6  ;;  %v13372_v6 = vld [vmem:[%s13548_s0 + $0xa0] sm:$0xff] }
 0xd93   : > { %12385 = vmatmul.mubr.msk.f32.gmra.mrb[44].mxu1 %vm644_vm6, %v17433_v33  ;;  %v13373_v33 = vld [vmem:[%s13548_s0 + $0xa8] sm:$0xff] }
 0xd94   : > { %12387 = vmatprep.mubr.msk.f32.mxu1 %vm644_vm6, %v17434_v42  ;;  %v13374_v42 = vld [vmem:[%s13548_s0 + $0xb0] sm:$0xff] }
 0xd97   : > { %12388 = vmatmul.mubr.msk.f32.gmra.mrb[14].mxu1 %vm644_vm6, %v17435_v2  ;;  %v13375_v2 = vld [vmem:[%s13548_s0 + $0xb8] sm:$0xff] }
 0xd98   : > { %12390 = vmatprep.mubr.msk.f32.mxu1 %vm644_vm6, %v17436_v1  ;;  %v13376_v1 = vld [vmem:[%s13548_s0 + $0xc0] sm:$0xff] }
 0xd9b   : > { %12391 = vmatmul.mubr.msk.f32.gmra.mrb[16].mxu1 %vm644_vm6, %v16386_v36  ;;  %v9200_v36 = vld [vmem:[#allocation2 + $0x1a2] sm:$0xff] }
 0xd9c   : > { %12393 = vmatprep.mubr.msk.f32.mxu1 %vm644_vm6, %v17437_v44  ;;  %v13377_v44 = vld [vmem:[%s13548_s0 + $0xc8] sm:$0xff] }
 0xd9f   : > { %12394 = vmatmul.mubr.msk.f32.gmra.mrb[18].mxu1 %vm644_vm6, %v16394_v59  ;;  %v13352_v59 = vld [vmem:[%s13548_s0] sm:$0xff] }
 0xda0   : > { %12396 = vmatprep.mubr.msk.f32.mxu1 %vm644_vm6, %v16398_v45  ;;  %v13353_v45 = vld [vmem:[%s13548_s0 + $0x8] sm:$0xff] }
 0xda3   : > { %12397 = vmatmul.mubr.msk.f32.gmra.mrb[20].mxu1 %vm644_vm6, %v16402_v38  ;;  %v13354_v38 = vld [vmem:[%s13548_s0 + $0x10] sm:$0xff] }
 0xda4   : > { %12399 = vmatprep.mubr.msk.f32.mxu1 %vm644_vm6, %v16644_v7  ;;  %v13378_v7 = vld [vmem:[%s13548_s0 + $0xd0] sm:$0xff] }
 0xda7   : > { %12400 = vmatmul.mubr.msk.f32.gmra.mrb[22].mxu1 %vm644_vm6, %v16648_v24  ;;  %v13379_v24 = vld [vmem:[%s13548_s0 + $0xd8] sm:$0xff] }
 0xda8   : > { %12402 = vmatprep.mubr.msk.f32.mxu1 %vm644_vm6, %v9199_v14 }
 0xdab   : > { %12403 = vmatmul.mubr.msk.f32.gmra.mrb[24].mxu1 %vm644_vm6, %v9200_v36 }
 0xdac   : > { %12407 = vmatprep.mubr.msk.f32.mxu1 %vm884_vm1, %v13352_v59  ;;  %v17476_v59 = vld [vmem:[#allocation70_spill] sm:$0xff] }
 0xdaf   : > { %12408 = vmatmul.mubr.msk.f32.vlgmr.msra.gmra.mrb[26].mxu1 %vm884_vm1, %v13353_v45  ;;  %v12487_v45 = vadd.f32 %v17476_v59, %v16911_v8 }
 0xdb0   : > { %12410 = vmatprep.mubr.msk.f32.mxu1 %vm884_vm1, %v13354_v38  ;;  %v12482_v38 = vadd.f32 %v12481_v48, %v16924_v30 }
 0xdb3   : > { %12411 = vmatmul.mubr.msk.f32.gmra.mrb[28].mxu1 %vm884_vm1, %v13355_v27  ;;  %v17477_v27 = vld [vmem:[#allocation71_spill] sm:$0xff] }
 0xdb4   : > { %12413 = vmatprep.mubr.msk.f32.mxu1 %vm884_vm1, %v13356_v0  ;;  %v12490_v0 = vadd.f32 %v16911_v8, %v17477_v27 }
 0xdb7   : > { %12414 = vmatmul.mubr.msk.f32.gmra.mrb[30].mxu1 %vm884_vm1, %v13357_v56 }
 0xdb8   : > { %12416 = vmatprep.mubr.msk.f32.mxu1 %vm884_vm1, %v13358_v63  ;;  %v12485_v63 = vadd.f32 %v12484_v28, %v16924_v30 }
 0xdbb   : > { %12417 = vmatmul.mubr.msk.f32.gmra.mrb[32].mxu1 %vm884_vm1, %v13359_v16 }
 0xdbc   : > { %12419 = vmatprep.mubr.msk.f32.mxu1 %vm884_vm1, %v13360_v23 }
 0xdbf   : > { %12420 = vmatmul.mubr.msk.f32.gmra.mrb[34].mxu1 %vm884_vm1, %v13361_v60 }
 0xdc0   : > { %12422 = vmatprep.mubr.msk.f32.mxu1 %vm884_vm1, %v13362_v61  ;;  %v17478_v61 = vld [vmem:[#allocation72_spill] sm:$0xff] }
 0xdc3   : > { %12423 = vmatmul.mubr.msk.f32.gmra.mrb[36].mxu1 %vm884_vm1, %v13363_v55  ;;  %v12493_v55 = vadd.f32 %v17478_v61, %v16911_v8 }
 0xdc4   : > { %12425 = vmatprep.mubr.msk.f32.mxu1 %vm884_vm1, %v13364_v37  ;;  %v12488_v37 = vadd.f32 %v12487_v45, %v16924_v30 }
 0xdc7   : > { %12426 = vmatmul.mubr.msk.f32.gmra.mrb[38].mxu1 %vm884_vm1, %v13365_v13  ;;  %v17479_v13 = vld [vmem:[#allocation73_spill] sm:$0xff] }
 0xdc8   : > { %12428 = vmatprep.mubr.msk.f32.mxu1 %vm884_vm1, %v13366_v47  ;;  %v12496_v47 = vadd.f32 %v16911_v8, %v17479_v13 }
 0xdcb   : > { %12429 = vmatmul.mubr.msk.f32.gmra.mrb[40].mxu1 %vm884_vm1, %v13367_v57 }
 0xdcc   : > { %12431 = vmatprep.mubr.msk.f32.mxu1 %vm884_vm1, %v13368_v34  ;;  %v12491_v34 = vadd.f32 %v12490_v0, %v16924_v30 }
 0xdcf   : > { %12432 = vmatmul.mubr.msk.f32.gmra.mrb[42].mxu1 %vm884_vm1, %v13369_v35 }
 0xdd0   : > { %12434 = vmatprep.mubr.msk.f32.mxu1 %vm884_vm1, %v13370_v54 }
 0xdd3   : > { %12435 = vmatmul.mubr.msk.f32.gmra.mrb[44].mxu1 %vm884_vm1, %v13371_v11 }
 0xdd4   : > { %12437 = vmatprep.mubr.msk.f32.mxu1 %vm884_vm1, %v13372_v6  ;;  %v17480_v6 = vld [vmem:[#allocation75_spill] sm:$0xff] }
 0xdd7   : > { %12438 = vmatmul.mubr.msk.f32.gmra.mrb[14].mxu1 %vm884_vm1, %v13373_v33  ;;  %v12499_v33 = vadd.f32 %v17480_v6, %v16911_v8 }
 0xdd8   : > { %12440 = vmatprep.mubr.msk.f32.mxu1 %vm884_vm1, %v13374_v42  ;;  %v12494_v42 = vadd.f32 %v12493_v55, %v16924_v30 }
 0xddb   : > { %12441 = vmatmul.mubr.msk.f32.gmra.mrb[16].mxu1 %vm884_vm1, %v13375_v2  ;;  %v17481_v2 = vld [vmem:[#allocation76_spill] sm:$0xff] }
 0xddc   : > { %12443 = vmatprep.mubr.msk.f32.mxu1 %vm884_vm1, %v13376_v1  ;;  %v12502_v1 = vadd.f32 %v16911_v8, %v17481_v2 }
 0xddf   : > { %12444 = vmatmul.mubr.msk.f32.gmra.mrb[18].mxu1 %vm884_vm1, %v13377_v44 }
 0xde0   : > { %12446 = vmatprep.mubr.msk.f32.mxu1 %vm884_vm1, %v13378_v7  ;;  %v12497_v7 = vadd.f32 %v12496_v47, %v16924_v30 }
 0xde3   : > { %12447 = vmatmul.mubr.msk.f32.gmra.mrb[20].mxu1 %vm884_vm1, %v13379_v24 }
 0xde4   : > { %12449 = vmatprep.mubr.msk.f32.mxu1 %vm884_vm1, %v13380_v26 }
 0xde7   : > { %12450 = vmatmul.mubr.msk.f32.gmra.mrb[22].mxu1 %vm884_vm1, %v13381_v32 }
 0xde8   : > { %12452 = vmatprep.mubr.msk.f32.mxu1 %vm884_vm1, %v13382_v10  ;;  %v12505_v10 = vadd.f32 %v16500_v49, %v16911_v8  ;;  %v12511_v49 = vadd.f32 %v16511_v15, %v16911_v8  ;;  %v12517_v15 = vadd.f32 %v16519_v53, %v16911_v8  ;;  %v12523_v53 = vadd.f32 %v16527_v4, %v16911_v8 }
 0xdea   : > { %v12506_v46 = vadd.f32 %v12505_v10, %v16924_v30  ;;  %v12524_v4 = vadd.f32 %v12523_v53, %v16924_v30 }
 0xdeb   : > { %12453 = vmatmul.mubr.msk.f32.gmra.mrb[24].mxu1 %vm884_vm1, %v13383_v43  ;;  %v12500_v43 = vadd.f32 %v12499_v33, %v16924_v30 }
 0xe82   : > { %v12409_v40 = vpop.f32.mrb[26].mxu1 }
 0xe83   : > { %v12470_v12 = vadd.f32 %v12469_v29, %v12409_v40  ;;  %v9768_v62 = vpop.f32.mrb[27].mxu1  ;;  %v12508_v29 = vadd.f32 %v16911_v8, %v17482_v20  ;;  %v12514_v40 = vadd.f32 %v16911_v8, %v16513_v9  ;;  %v12520_v9 = vadd.f32 %v16911_v8, %v16521_v19 }
 0xe84   : > { %v12473_v21 = vadd.f32 %v12472_v25, %v9768_v62  ;;  %v12503_v25 = vadd.f32 %v12502_v1, %v16924_v30 }
 0xe85   : > { %v12471_v58 = vadd.f32 %v12470_v12, %v16924_v30  ;;  %v12509_v62 = vadd.f32 %v12508_v29, %v16924_v30  ;;  %v12515_v51 = vadd.f32 %v12514_v40, %v16924_v30 }
 0xe86   : > { %v12474_v41 = vadd.f32 %v12473_v21, %v16924_v30  ;;  %v12412_v50 = vpop.f32.mrb[28].mxu1 }
 0xe87   : > { %9960 = vst.msk [vmem:[%s16931_s24 + $0x8] sm:$0xff] %vm644_vm6, %v12471_v58  ;;  %v12477_v31 = vadd.f32 %v12476_v22, %v12412_v50  ;;  %v9778_v14 = vpop.f32.mrb[29].mxu1  ;;  %v12512_v58 = vadd.f32 %v12511_v49, %v16924_v30 }
 0xe88   : > { %9959 = vst.msk [vmem:[%s16931_s24] sm:$0xff] %vm644_vm6, %v12474_v41  ;;  %v12480_v36 = vadd.f32 %v12479_v18, %v9778_v14  ;;  %v12518_v18 = vadd.f32 %v12517_v15, %v16924_v30 }
 0xe89   : > { %9962 = vst.msk [vmem:[%s16931_s24 + $0x18] sm:$0xff] %vm644_vm6, %v12477_v31  ;;  %v17483_v31 = vld [vmem:[#allocation78_spill] sm:$0xff] }
 0xe8a   : > { %9961 = vst.msk [vmem:[%s16931_s24 + $0x10] sm:$0xff] %vm644_vm6, %v12480_v36  ;;  %v12415_v56 = vpop.f32.mrb[30].mxu1  ;;  %v12526_v19 = vadd.f32 %v16911_v8, %v17483_v31  ;;  %v12521_v36 = vadd.f32 %v12520_v9, %v16924_v30 }
 0xe8b   : > { %v12483_v16 = vadd.f32 %v12482_v38, %v12415_v56  ;;  %v9788_v23 = vpop.f32.mrb[31].mxu1 }
 0xe8c   : > { %v12486_v60 = vadd.f32 %v12485_v63, %v9788_v23  ;;  %v12527_v0 = vadd.f32 %v12526_v19, %v16924_v30 }
 0xe8d   : > { %9964 = vst.msk [vmem:[%s16931_s24 + $0x28] sm:$0xff] %vm644_vm6, %v12483_v16  ;;  %v12531_v16 = vadd.f32 %v16924_v30, %v16911_v8 }
 0xe8e   : > { %9963 = vst.msk [vmem:[%s16931_s24 + $0x20] sm:$0xff] %vm644_vm6, %v12486_v60  ;;  %v12418_v57 = vpop.f32.mrb[32].mxu1 }
 0xe8f   : > { %v12489_v35 = vadd.f32 %v12488_v37, %v12418_v57  ;;  %v9798_v54 = vpop.f32.mrb[33].mxu1 }
 0xe90   : > { %v12492_v11 = vadd.f32 %v12491_v34, %v9798_v54 }
 0xe91   : > { %9966 = vst.msk [vmem:[%s16931_s24 + $0x38] sm:$0xff] %vm644_vm6, %v12489_v35 }
 0xe92   : > { %9965 = vst.msk [vmem:[%s16931_s24 + $0x30] sm:$0xff] %vm644_vm6, %v12492_v11  ;;  %v12421_v44 = vpop.f32.mrb[34].mxu1 }
 0xe93   : > { %v12495_v24 = vadd.f32 %v12494_v42, %v12421_v44  ;;  %v9808_v26 = vpop.f32.mrb[35].mxu1 }
 0xe94   : > { %v12498_v32 = vadd.f32 %v12497_v7, %v9808_v26 }
 0xe95   : > { %9968 = vst.msk [vmem:[%s16931_s24 + $0x48] sm:$0xff] %vm644_vm6, %v12495_v24 }
 0xe96   : > { %9967 = vst.msk [vmem:[%s16931_s24 + $0x40] sm:$0xff] %vm644_vm6, %v12498_v32  ;;  %v12424_v5 = vpop.f32.mrb[36].mxu1 }
 0xe97   : > { %v12501_v39 = vadd.f32 %v12500_v43, %v12424_v5  ;;  %v9818_v3 = vpop.f32.mrb[37].mxu1 }
 0xe98   : > { %v12504_v52 = vadd.f32 %v12503_v25, %v9818_v3 }
 0xe99   : > { %9970 = vst.msk [vmem:[%s16931_s24 + $0x58] sm:$0xff] %vm644_vm6, %v12501_v39 }
 0xe9a   : > { %9969 = vst.msk [vmem:[%s16931_s24 + $0x50] sm:$0xff] %vm644_vm6, %v12504_v52  ;;  %v12427_v12 = vpop.f32.mrb[38].mxu1 }
 0xe9b   : > { %v12507_v21 = vadd.f32 %v12506_v46, %v12427_v12  ;;  %v9828_v17 = vpop.f32.mrb[39].mxu1 }
 0xe9c   : > { %v12510_v48 = vadd.f32 %v12509_v62, %v9828_v17 }
 0xe9d   : > { %9972 = vst.msk [vmem:[%s16931_s24 + $0x68] sm:$0xff] %vm644_vm6, %v12507_v21 }
 0xe9e   : > { %9971 = vst.msk [vmem:[%s16931_s24 + $0x60] sm:$0xff] %vm644_vm6, %v12510_v48  ;;  %v12430_v22 = vpop.f32.mrb[40].mxu1 }
 0xe9f   : > { %v12513_v28 = vadd.f32 %v12512_v58, %v12430_v22  ;;  %v9838_v41 = vpop.f32.mrb[41].mxu1 }
 0xea0   : > { %v12516_v50 = vadd.f32 %v12515_v51, %v9838_v41 }
 0xea1   : > { %9974 = vst.msk [vmem:[%s16931_s24 + $0x78] sm:$0xff] %vm644_vm6, %v12513_v28 }
 0xea2   : > { %9973 = vst.msk [vmem:[%s16931_s24 + $0x70] sm:$0xff] %vm644_vm6, %v12516_v50  ;;  %v12433_v14 = vpop.f32.mrb[42].mxu1 }
 0xea3   : > { %v12519_v59 = vadd.f32 %v12518_v18, %v12433_v14  ;;  %v9848_v45 = vpop.f32.mrb[43].mxu1 }
 0xea4   : > { %v12522_v38 = vadd.f32 %v12521_v36, %v9848_v45 }
 0xea5   : > { %9976 = vst.msk [vmem:[%s16931_s24 + $0x88] sm:$0xff] %vm644_vm6, %v12519_v59 }
 0xea6   : > { %9975 = vst.msk [vmem:[%s16931_s24 + $0x80] sm:$0xff] %vm644_vm6, %v12522_v38  ;;  %v12436_v27 = vpop.f32.mrb[44].mxu1 }
 0xea7   : > { %v12525_v56 = vadd.f32 %v12524_v4, %v12436_v27  ;;  %v9858_v63 = vpop.f32.mrb[45].mxu1 }
 0xea8   : > { %v12528_v23 = vadd.f32 %v12527_v0, %v9858_v63 }
 0xea9   : > { %9978 = vst.msk [vmem:[%s16931_s24 + $0x98] sm:$0xff] %vm644_vm6, %v12525_v56 }
 0xeaa   : > { %9977 = vst.msk [vmem:[%s16931_s24 + $0x90] sm:$0xff] %vm644_vm6, %v12528_v23  ;;  %v12439_v60 = vpop.f32.mrb[14].mxu1 }
 0xeab   : > { %v12530_v61 = vadd.f32 %v12531_v16, %v12439_v60  ;;  %v9868_v55 = vpop.f32.mrb[15].mxu1 }
 0xeac   : > { %v12532_v37 = vadd.f32 %v12531_v16, %v9868_v55 }
 0xead   : > { %9980 = vst.msk [vmem:[%s16931_s24 + $0xa8] sm:$0xff] %vm644_vm6, %v12530_v61 }
 0xeae   : > { %9979 = vst.msk [vmem:[%s16931_s24 + $0xa0] sm:$0xff] %vm644_vm6, %v12532_v37  ;;  %v12442_v13 = vpop.f32.mrb[16].mxu1 }
 0xeaf   : > { %v12534_v47 = vadd.f32 %v12531_v16, %v12442_v13  ;;  %v9878_v8 = vpop.f32.mrb[17].mxu1 }
 0xeb0   : > { %v12536_v30 = vadd.f32 %v12531_v16, %v9878_v8 }
 0xeb1   : > { %9982 = vst.msk [vmem:[%s16931_s24 + $0xb8] sm:$0xff] %vm644_vm6, %v12534_v47 }
 0xeb2   : > { %9981 = vst.msk [vmem:[%s16931_s24 + $0xb0] sm:$0xff] %vm644_vm6, %v12536_v30  ;;  %v12445_v57 = vpop.f32.mrb[18].mxu1 }
 0xeb3   : > { %v12538_v34 = vadd.f32 %v12531_v16, %v12445_v57  ;;  %v9888_v35 = vpop.f32.mrb[19].mxu1 }
 0xeb4   : > { %v12540_v54 = vadd.f32 %v12531_v16, %v9888_v35 }
 0xeb5   : > { %9984 = vst.msk [vmem:[%s16931_s24 + $0xc8] sm:$0xff] %vm644_vm6, %v12538_v34 }
 0xeb6   : > { %9983 = vst.msk [vmem:[%s16931_s24 + $0xc0] sm:$0xff] %vm644_vm6, %v12540_v54  ;;  %v12448_v11 = vpop.f32.mrb[20].mxu1 }
 0xeb7   : > { %v12542_v6 = vadd.f32 %v12531_v16, %v12448_v11  ;;  %v9898_v33 = vpop.f32.mrb[21].mxu1 }
 0xeb8   : > { %v12544_v42 = vadd.f32 %v12531_v16, %v9898_v33 }
 0xeb9   : > { %9986 = vst.msk [vmem:[%s16931_s24 + $0xd8] sm:$0xff] %vm644_vm6, %v12542_v6 }
 0xeba   : > { %9985 = vst.msk [vmem:[%s16931_s24 + $0xd0] sm:$0xff] %vm644_vm6, %v12544_v42  ;;  %v12451_v2 = vpop.f32.mrb[22].mxu1 }
 0xebb   : > { %v12546_v1 = vadd.f32 %v12531_v16, %v12451_v2  ;;  %v9908_v44 = vpop.f32.mrb[23].mxu1 }
 0xebc   : > { %v12548_v7 = vadd.f32 %v12531_v16, %v9908_v44 }
 0xebd   : > { %9988 = vst.msk [vmem:[%s16931_s24 + $0xe8] sm:$0xff] %vm644_vm6, %v12546_v1 }
 0xebe   : > { %9987 = vst.msk [vmem:[%s16931_s24 + $0xe0] sm:$0xff] %vm644_vm6, %v12548_v7  ;;  %v12454_v24 = vpop.f32.mrb[24].mxu1 }
 0xebf   : > { %v12550_v26 = vadd.f32 %v12531_v16, %v12454_v24  ;;  %v9918_v32 = vpop.f32.mrb[25].mxu1 }
 0xec0   : > { %v12552_v10 = vadd.f32 %v12531_v16, %v9918_v32 }
 0xec1   : > { %9990 = vst.msk [vmem:[%s16931_s24 + $0xf8] sm:$0xff] %vm644_vm6, %v12550_v26 }
 0xec2   : > { %9989 = vst.msk [vmem:[%s16931_s24 + $0xf0] sm:$0xff] %vm644_vm6, %v12552_v10 }
 0xec3 PF: > { %s30_s1 = sadd.s32 1, %s13390_s1  }
 0xec4   : > { %p27_p4 = scmp.ge.s32.totalorder %s30_s1, 4  }
 0xec6   :  { %29 = sbr.rel (!%p27_p4) target bundleno = 6 (0x6), region = 152 }

</bundles_post_ra>
